<compile_context>
chip_gen: v6e
topology: v6e:2x2x1
jax: 0.10.0
libtpu: 0.0.40
codegen_flags: <defaults>
</compile_context>

<pallas_src>
import jax
import jax.numpy as jnp
from jax.experimental import pallas as pl
from jax.experimental.pallas import tpu as pltpu

B = 4        # batch
S = 32       # sequence length
D = 512      # d_model (matches the PyTorch spec)
FH = 1024    # ffn hidden
N = B * S    # flattened token count


def _token_tile(n):
    # Largest token tile <= 512 that divides n. Review: tiles of a few hundred rows
    # amortize the ~0.35 us/step grid overhead and fill the 128/256-row MXU; at
    # n = 128 this collapses the whole token axis into a single grid step.
    for tm in (512, 256, 128, 64, 32, 16, 8):
        if n % tm == 0:
            return tm
    return n


# ---------------------------------------------------------------------------
# Fused kernel: token tile -> fc1 -> ReLU -> (dropout=identity) -> fc2
# ---------------------------------------------------------------------------
def ffn_kernel(x_ref, w1_ref, b1_ref, w2_ref, b2_ref, o_ref):
    # bf16 MXU inputs, f32 accumulation.
    h = jnp.dot(x_ref[...], w1_ref[...], preferred_element_type=jnp.float32)
    # Bias add + ReLU in f32 on the VPU (v5e has no bf16 VPU path).
    h = jnp.maximum(h + b1_ref[...], 0.0)
    # TODO(synk): dropout is identity here (eval mode); training-mode dropout would
    # need pltpu.prng_seed / pltpu.prng_random_bits and a mask inside the kernel.
    y = jnp.dot(h.astype(jnp.bfloat16), w2_ref[...],
                preferred_element_type=jnp.float32) + b2_ref[...]
    o_ref[...] = y.astype(o_ref.dtype)


# ---------------------------------------------------------------------------
# Wrapper
# ---------------------------------------------------------------------------
def positionwise_feed(x, params):
    """x: (B, S, D) f32 -> (B, S, D) f32."""
    b, s, d = x.shape
    n = b * s
    fh = params["w1"].shape[1]
    tm = _token_tile(n)
    n_tiles = n // tm

    # Flatten (B, S) into one tall token axis and feed the MXU bf16.
    xt = x.reshape(n, d).astype(jnp.bfloat16)

    # Advisory cost estimate: 2 matmuls of 2*n*d*fh flops each; bytes are the bf16
    # activations/weights plus f32 biases and the f32 output.
    bytes_accessed = (xt.size * 2
                      + params["w1"].size * 2 + params["w2"].size * 2
                      + params["b1"].size * 4 + params["b2"].size * 4
                      + n * d * 4)
    cost = pl.CostEstimate(flops=4 * n * d * fh, transcendentals=0,
                           bytes_accessed=bytes_accessed)

    # Megacore: only shard the token axis when each core gets plenty of tiles to
    # run against its resident weight copy; at small n a parallel split would just
    # duplicate the weight DMA per TC on v7x (weight-DMA-bound -> strictly worse).
    semantics = ("parallel",) if n_tiles >= 16 else ("arbitrary",)

    out = pl.pallas_call(
        ffn_kernel,
        out_shape=jax.ShapeDtypeStruct((n, d), jnp.float32),
        grid_spec=pltpu.PrefetchScalarGridSpec(
            num_scalar_prefetch=0,
            grid=(n_tiles,),
            in_specs=[
                pl.BlockSpec((tm, d), lambda i: (i, 0)),    # token tile (bf16)
                # Constant index_map -> weights/biases DMA'd once, stay resident.
                pl.BlockSpec((d, fh), lambda i: (0, 0)),    # W1 (bf16)
                pl.BlockSpec((1, fh), lambda i: (0, 0)),    # b1 (f32)
                pl.BlockSpec((fh, d), lambda i: (0, 0)),    # W2 (bf16)
                pl.BlockSpec((1, d), lambda i: (0, 0)),     # b2 (f32)
            ],
            out_specs=pl.BlockSpec((tm, d), lambda i: (i, 0)),   # lane-dense (D=512)
        ),
        compiler_params=pltpu.CompilerParams(
            dimension_semantics=semantics,
            # Explicit scoped-VMEM budget (~6 MiB actual footprint): independent of
            # per-generation defaults (16 MiB v5e / 32 MiB v6e,v7x) and safely under
            # v7x's 64 MiB physical VMEM.
            vmem_limit_bytes=32 * 1024 * 1024,
        ),
        cost_estimate=cost,
    )(xt, params["w1"], params["b1"], params["w2"], params["b2"])
    return out.reshape(b, s, d)


@jax.jit
def forward(x, params):
    return positionwise_feed(x, params)


# ---------------------------------------------------------------------------
# Pure-JAX reference with the SAME bf16-at-the-dot-boundary semantics
# (PyTorch-equivalent structure: y = relu(x @ W1 + b1) @ W2 + b2, eval mode)
# ---------------------------------------------------------------------------
def reference(x, p):
    xb = x.astype(jnp.bfloat16)
    h = jnp.dot(xb, p["w1"], preferred_element_type=jnp.float32) + p["b1"]
    h = jnp.maximum(h, 0.0)
    return jnp.dot(h.astype(jnp.bfloat16), p["w2"],
                   preferred_element_type=jnp.float32) + p["b2"]


def init_params(key):
    k1, k2, k3, k4 = jax.random.split(key, 4)
    s = 0.02
    return {
        # Weights stored as (in, out) = PyTorch weight.T, in bf16 (halves weight DMA).
        "w1": (jax.random.normal(k1, (D, FH), jnp.float32) * s).astype(jnp.bfloat16),
        "b1": jax.random.normal(k2, (1, FH), jnp.float32) * s,   # f32 bias
        "w2": (jax.random.normal(k3, (FH, D), jnp.float32) * s).astype(jnp.bfloat16),
        "b2": jax.random.normal(k4, (1, D), jnp.float32) * s,    # f32 bias
    }


if __name__ == "__main__":
    key = jax.random.PRNGKey(0)
    kx, kp = jax.random.split(key)
    x = jax.random.uniform(kx, (B, S, D), jnp.float32)
    params = init_params(kp)

    out = jax.block_until_ready(forward(x, params))
    ref = reference(x, params)

    assert out.shape == (B, S, D)
    max_err = float(jnp.max(jnp.abs(out - ref)))
    assert jnp.allclose(out, ref, atol=2e-3, rtol=2e-3), max_err

    print("KERNEL_OK")
</pallas_src>

<mosaic_0001>
module attributes {stable_mosaic.version = 11 : i64} {
  func.func @ffn_kernel(%arg0: i32, %arg1: memref<128x512xbf16, #tpu.memory_space<vmem>>, %arg2: memref<512x1024xbf16, #tpu.memory_space<vmem>>, %arg3: memref<1x1024xf32, #tpu.memory_space<vmem>>, %arg4: memref<1024x512xbf16, #tpu.memory_space<vmem>>, %arg5: memref<1x512xf32, #tpu.memory_space<vmem>>, %arg6: memref<128x512xf32, #tpu.memory_space<vmem>>) attributes {dimension_semantics = [#tpu.dimension_semantics<arbitrary>], iteration_bounds = array<i64: 1>, scalar_prefetch = 0 : i64, scratch_operands = 0 : i64, tpu.core_type = #tpu.core_type<tc>, window_params = [{transform_indices = @transform_0, window_bounds = array<i64: 128, 512>}, {pipeline_mode = #tpu.pipeline_mode<synchronous>, transform_indices = @transform_1, window_bounds = array<i64: 512, 1024>}, {pipeline_mode = #tpu.pipeline_mode<synchronous>, transform_indices = @transform_2, window_bounds = array<i64: 1, 1024>}, {pipeline_mode = #tpu.pipeline_mode<synchronous>, transform_indices = @transform_3, window_bounds = array<i64: 1024, 512>}, {pipeline_mode = #tpu.pipeline_mode<synchronous>, transform_indices = @transform_4, window_bounds = array<i64: 1, 512>}, {transform_indices = @transform_5, window_bounds = array<i64: 128, 512>}]} {
    %c0 = arith.constant 0 : index
    %c0_0 = arith.constant 0 : index
    %0 = vector.load %arg1[%c0, %c0_0] : memref<128x512xbf16, #tpu.memory_space<vmem>>, vector<128x512xbf16>
    %c0_1 = arith.constant 0 : index
    %c0_2 = arith.constant 0 : index
    %1 = vector.load %arg2[%c0_1, %c0_2] : memref<512x1024xbf16, #tpu.memory_space<vmem>>, vector<512x1024xbf16>
    %cst = arith.constant dense<0.000000e+00> : vector<128x1024xf32>
    %2 = tpu.matmul %0, %1, %cst {dimension_numbers = #tpu.dot_dimension_numbers<[1], [0], [0], [1], [0, 0, 1, 1], [], []>} : vector<128x512xbf16>, vector<512x1024xbf16>, vector<128x1024xf32> -> vector<128x1024xf32>
    %c0_3 = arith.constant 0 : index
    %c0_4 = arith.constant 0 : index
    %3 = vector.load %arg3[%c0_3, %c0_4] : memref<1x1024xf32, #tpu.memory_space<vmem>>, vector<1x1024xf32>
    %4 = vector.broadcast %3 : vector<1x1024xf32> to vector<128x1024xf32>
    %5 = arith.addf %2, %4 : vector<128x1024xf32>
    %cst_5 = arith.constant 0.000000e+00 : f32
    %6 = vector.broadcast %cst_5 : f32 to vector<128x1024xf32>
    %7 = arith.maximumf %5, %6 : vector<128x1024xf32>
    %8 = arith.truncf %7 : vector<128x1024xf32> to vector<128x1024xbf16>
    %c0_6 = arith.constant 0 : index
    %c0_7 = arith.constant 0 : index
    %9 = vector.load %arg4[%c0_6, %c0_7] : memref<1024x512xbf16, #tpu.memory_space<vmem>>, vector<1024x512xbf16>
    %cst_8 = arith.constant dense<0.000000e+00> : vector<128x512xf32>
    %10 = tpu.matmul %8, %9, %cst_8 {dimension_numbers = #tpu.dot_dimension_numbers<[1], [0], [0], [1], [0, 0, 1, 1], [], []>} : vector<128x1024xbf16>, vector<1024x512xbf16>, vector<128x512xf32> -> vector<128x512xf32>
    %c0_9 = arith.constant 0 : index
    %c0_10 = arith.constant 0 : index
    %11 = vector.load %arg5[%c0_9, %c0_10] : memref<1x512xf32, #tpu.memory_space<vmem>>, vector<1x512xf32>
    %12 = vector.broadcast %11 : vector<1x512xf32> to vector<128x512xf32>
    %13 = arith.addf %10, %12 : vector<128x512xf32>
    %c0_11 = arith.constant 0 : index
    %c0_12 = arith.constant 0 : index
    %14 = vector.load %arg6[%c0_11, %c0_12] : memref<128x512xf32, #tpu.memory_space<vmem>>, vector<128x512xf32>
    tpu.vector_store %arg6[%c0_11, %c0_12], %13 {strides = array<i32>} : memref<128x512xf32, #tpu.memory_space<vmem>>, vector<128x512xf32>,
    return
  }
  func.func @transform_0(%arg0: i32) -> (i32, i32) {
    %c0_i32 = arith.constant 0 : i32
    %c0_i32_0 = arith.constant 0 : i32
    return %arg0, %c0_i32 : i32, i32
  }
  func.func @transform_1(%arg0: i32) -> (i32, i32) {
    %c0_i32 = arith.constant 0 : i32
    %c0_i32_0 = arith.constant 0 : i32
    %c0_i32_1 = arith.constant 0 : i32
    return %c0_i32, %c0_i32_0 : i32, i32
  }
  func.func @transform_2(%arg0: i32) -> (i32, i32) {
    %c0_i32 = arith.constant 0 : i32
    %c0_i32_0 = arith.constant 0 : i32
    %c0_i32_1 = arith.constant 0 : i32
    return %c0_i32, %c0_i32_0 : i32, i32
  }
  func.func @transform_3(%arg0: i32) -> (i32, i32) {
    %c0_i32 = arith.constant 0 : i32
    %c0_i32_0 = arith.constant 0 : i32
    %c0_i32_1 = arith.constant 0 : i32
    return %c0_i32, %c0_i32_0 : i32, i32
  }
  func.func @transform_4(%arg0: i32) -> (i32, i32) {
    %c0_i32 = arith.constant 0 : i32
    %c0_i32_0 = arith.constant 0 : i32
    %c0_i32_1 = arith.constant 0 : i32
    return %c0_i32, %c0_i32_0 : i32, i32
  }
  func.func @transform_5(%arg0: i32) -> (i32, i32) {
    %c0_i32 = arith.constant 0 : i32
    %c0_i32_0 = arith.constant 0 : i32
    return %arg0, %c0_i32 : i32, i32
  }
}

</mosaic_0001>

<bundles_post_ra>
// kernel: forward.1
= control target key start
LH: loop header
LB: loop body
LE: loop exit
PB: predicated region body
PF: predicated region fallthrough
CT: control target
= control target key end

     0   :  { %10 = vsyncpa [#allocation3], 0  ;;  %s8279_s0 = inlined_call_operand.vmem [shape: bf16[128,512], index: 0, kind: input, shape index: {}]   ;;  %s8280_s1 = inlined_call_operand.hbm [shape: bf16[512,1024], index: 1, kind: input, shape index: {}]   ;;  %s8281_s2 = inlined_call_operand.vmem [shape: f32[1,1024], index: 2, kind: input, shape index: {}]   ;;  %s8282_s3 = inlined_call_operand.hbm [shape: bf16[1024,512], index: 3, kind: input, shape index: {}]   ;;  %s8283_s4 = inlined_call_operand.vmem [shape: f32[1,512], index: 4, kind: input, shape index: {}]   ;;  %s8284_s5 = inlined_call_operand.hbm [shape: f32[128,512], index: 5, kind: output, shape index: {}]  }
   0x1   :  { %11 = vsyncpa [#allocation6], 0 }
   0x2   :  { %12 = vsyncpa [#allocation4], 0  ;;  %s6541_s18 = smov [#allocation2]  }
   0x3   :  { %s20_s19 = sshll.u32 %s6541_s18, 4  ;;  %s21_s19 = int_to_ptr.vmem [resolvable:$true] %s20_s19 }
   0x4   :  { %s6483_s20 = scalar_lea.vmem %s21_s19, 32768  ;;  %p6488_p1 = scmp.lt.s32.totalorder %s21_s19, %s21_s19 }
   0x5   :  { %p6484_p0 = scmp.ne.s32.totalorder %s21_s19, %s6483_s20  ;;  %p6489_p2 = scmp.lt.s32.totalorder %s6483_s20, %s6483_s20 }
   0x7   :  { %p6490_p3 = por %p6489_p2, %p6488_p1 }
   0x9   :  { %p6491_p4 = pnand %p6490_p3, %p6484_p0 }
   0xb   :  { %6494 = shalt.err (!%p6491_p4)
}
   0xc   :  { %s6542_s21 = smov 512   ;;  %s6543_s22 = smov 32  }
   0xd   :  { %26 = dma.hbm_to_vmem [thread:$0]  %s8280_s1, 32768, %s21_s19, [#allocation3], %s6542_s21, %s6542_s21, %s6543_s22  }
   0xe   :  { %s6544_s25 = smov [#allocation5]  }
   0xf   :  { %s34_s26 = sshll.u32 %s6544_s25, 4  ;;  %s35_s26 = int_to_ptr.vmem [resolvable:$true] %s34_s26 }
  0x10   :  { %s6503_s27 = scalar_lea.vmem %s35_s26, 32768  ;;  %p6508_p6 = scmp.lt.s32.totalorder %s35_s26, %s35_s26 }
  0x11   :  { %p6504_p5 = scmp.ne.s32.totalorder %s35_s26, %s6503_s27  ;;  %p6509_p7 = scmp.lt.s32.totalorder %s6503_s27, %s6503_s27 }
  0x13   :  { %p6510_p8 = por %p6509_p7, %p6508_p6 }
  0x15   :  { %p6511_p9 = pnand %p6510_p8, %p6504_p5 }
  0x17   :  { %6514 = shalt.err (!%p6511_p9)
}
  0x18   :  { %s6545_s28 = smov 256   ;;  %s6546_s29 = smov 16  }
  0x19   :  { %40 = dma.hbm_to_vmem [thread:$0]  %s8282_s3, 32768, %s35_s26, [#allocation6], %s6545_s28, %s6545_s28, %s6546_s29  }
  0x1a   :  { %6535 = dma.done.wait [#allocation3], 32768  }
  0x1b   :  { %6536 = vsyncadd [#allocation3], 4294934528 }
  0x1c   :  { %6537 = dma.done.wait [#allocation6], 32768  }
  0x1d   :  { %6538 = vsyncadd [#allocation6], 4294934528  ;;  %v137_v0 = vld [vmem:[#allocation2 + $0x1c0] sm:$0xff]  ;;  %v6595_v59 = vld [vmem:[%s8279_s0 + $0xc] ss:$16 sps:$4 sm:$0xff]  }
  0x1e   :  { %v141_v1 = vld [vmem:[#allocation2 + $0x1e0] sm:$0xff]  ;;  %1964 = vmatprep.mubr.bf16.mxu1 %v6595_v59 }
  0x1f   :  { %v265_v2 = vld [vmem:[#allocation2 + $0x5c0] sm:$0xff]  ;;  %v5548_v3 = vcombine.high %v137_v0, %v141_v1  ;;  %v5547_v5 = vcombine.low %v137_v0, %v141_v1 }
  0x20   :  { %v269_v4 = vld [vmem:[#allocation2 + $0x5e0] sm:$0xff] }
  0x21   :  { %v129_v6 = vld [vmem:[#allocation2 + $0x180] sm:$0xff]  ;;  %v5676_v8 = vcombine.high %v265_v2, %v269_v4  ;;  %v5675_v9 = vcombine.low %v265_v2, %v269_v4  ;;  %1819 = vmatprep.subr.bf16.mxu0 %v5548_v3 }
  0x22   :  { %v133_v7 = vld [vmem:[#allocation2 + $0x1a0] sm:$0xff]  ;;  %1820 = vmatpush1.bf16.msra.mxu0 %v5547_v5 }
  0x23   :  { %v5540_v10 = vcombine.high %v129_v6, %v133_v7  ;;  %v257_v11 = vld [vmem:[#allocation2 + $0x580] sm:$0xff]  ;;  %1932 = vmatprep.subr.bf16.mxu1 %v5676_v8  ;;  %v5539_v18 = vcombine.low %v129_v6, %v133_v7 }
  0x24   :  { %v261_v12 = vld [vmem:[#allocation2 + $0x5a0] sm:$0xff]  ;;  %1933 = vmatpush1.bf16.msra.mxu1 %v5675_v9 }
  0x25   :  { %v121_v13 = vld [vmem:[#allocation2 + $0x140] sm:$0xff]  ;;  %v5668_v14 = vcombine.high %v257_v11, %v261_v12  ;;  %1821 = vmatprep.subr.bf16.mxu0 %v5540_v10  ;;  %v5667_v19 = vcombine.low %v257_v11, %v261_v12 }
  0x26   :  { %v125_v15 = vld [vmem:[#allocation2 + $0x160] sm:$0xff]  ;;  %1822 = vmatpush1.bf16.msra.mxu0 %v5539_v18 }
  0x27   :  { %v249_v16 = vld [vmem:[#allocation2 + $0x540] sm:$0xff]  ;;  %v5532_v20 = vcombine.high %v121_v13, %v125_v15  ;;  %1934 = vmatprep.subr.bf16.mxu1 %v5668_v14  ;;  %v5531_v26 = vcombine.low %v121_v13, %v125_v15 }
  0x28   :  { %v253_v17 = vld [vmem:[#allocation2 + $0x560] sm:$0xff]  ;;  %1935 = vmatpush1.bf16.msra.mxu1 %v5667_v19 }
  0x29   :  { %v5660_v21 = vcombine.high %v249_v16, %v253_v17  ;;  %v113_v22 = vld [vmem:[#allocation2 + $0x100] sm:$0xff]  ;;  %1823 = vmatprep.subr.bf16.mxu0 %v5532_v20  ;;  %v5659_v27 = vcombine.low %v249_v16, %v253_v17 }
  0x2a   :  { %v117_v23 = vld [vmem:[#allocation2 + $0x120] sm:$0xff]  ;;  %1824 = vmatpush1.bf16.msra.mxu0 %v5531_v26 }
  0x2b   :  { %v241_v24 = vld [vmem:[#allocation2 + $0x500] sm:$0xff]  ;;  %v5524_v28 = vcombine.high %v113_v22, %v117_v23  ;;  %1936 = vmatprep.subr.bf16.mxu1 %v5660_v21  ;;  %v5523_v34 = vcombine.low %v113_v22, %v117_v23 }
  0x2c   :  { %v245_v25 = vld [vmem:[#allocation2 + $0x520] sm:$0xff]  ;;  %1937 = vmatpush1.bf16.msra.mxu1 %v5659_v27 }
  0x2d   :  { %v5652_v29 = vcombine.high %v241_v24, %v245_v25  ;;  %v105_v30 = vld [vmem:[#allocation2 + $0xc0] sm:$0xff]  ;;  %1825 = vmatprep.subr.bf16.mxu0 %v5524_v28  ;;  %v5651_v35 = vcombine.low %v241_v24, %v245_v25 }
  0x2e   :  { %v109_v31 = vld [vmem:[#allocation2 + $0xe0] sm:$0xff]  ;;  %1826 = vmatpush1.bf16.msra.mxu0 %v5523_v34 }
  0x2f   :  { %v233_v32 = vld [vmem:[#allocation2 + $0x4c0] sm:$0xff]  ;;  %v5516_v36 = vcombine.high %v105_v30, %v109_v31  ;;  %1938 = vmatprep.subr.bf16.mxu1 %v5652_v29  ;;  %v5515_v42 = vcombine.low %v105_v30, %v109_v31 }
  0x30   :  { %v237_v33 = vld [vmem:[#allocation2 + $0x4e0] sm:$0xff]  ;;  %1939 = vmatpush1.bf16.msra.mxu1 %v5651_v35 }
  0x31   :  { %v5644_v37 = vcombine.high %v233_v32, %v237_v33  ;;  %v97_v38 = vld [vmem:[#allocation2 + $0x80] sm:$0xff]  ;;  %1827 = vmatprep.subr.bf16.mxu0 %v5516_v36  ;;  %v5643_v43 = vcombine.low %v233_v32, %v237_v33 }
  0x32   :  { %v101_v39 = vld [vmem:[#allocation2 + $0xa0] sm:$0xff]  ;;  %1828 = vmatpush1.bf16.msra.mxu0 %v5515_v42 }
  0x33   :  { %v225_v40 = vld [vmem:[#allocation2 + $0x480] sm:$0xff]  ;;  %v5508_v44 = vcombine.high %v97_v38, %v101_v39  ;;  %1940 = vmatprep.subr.bf16.mxu1 %v5644_v37  ;;  %v5507_v50 = vcombine.low %v97_v38, %v101_v39 }
  0x34   :  { %v229_v41 = vld [vmem:[#allocation2 + $0x4a0] sm:$0xff]  ;;  %1941 = vmatpush1.bf16.msra.mxu1 %v5643_v43 }
  0x35   :  { %v5636_v45 = vcombine.high %v225_v40, %v229_v41  ;;  %v89_v46 = vld [vmem:[#allocation2 + $0x40] sm:$0xff]  ;;  %1829 = vmatprep.subr.bf16.mxu0 %v5508_v44  ;;  %v5635_v52 = vcombine.low %v225_v40, %v229_v41 }
  0x36   :  { %v93_v47 = vld [vmem:[#allocation2 + $0x60] sm:$0xff]  ;;  %1830 = vmatpush1.bf16.msra.mxu0 %v5507_v50 }
  0x37   :  { %v217_v48 = vld [vmem:[#allocation2 + $0x440] sm:$0xff]  ;;  %v5500_v53 = vcombine.high %v89_v46, %v93_v47  ;;  %1942 = vmatprep.subr.bf16.mxu1 %v5636_v45  ;;  %v5499_v60 = vcombine.low %v89_v46, %v93_v47 }
  0x38   :  { %v221_v49 = vld [vmem:[#allocation2 + $0x460] sm:$0xff]  ;;  %1943 = vmatpush1.bf16.msra.mxu1 %v5635_v52 }
  0x39   :  { %v81_v51 = vld [vmem:[#allocation2] sm:$0xff]  ;;  %v5628_v55 = vcombine.high %v217_v48, %v221_v49  ;;  %1831 = vmatprep.subr.bf16.mxu0 %v5500_v53  ;;  %v5627_v61 = vcombine.low %v217_v48, %v221_v49 }
  0x3a   :  { %v85_v54 = vld [vmem:[#allocation2 + $0x20] sm:$0xff]  ;;  %1832 = vmatpush1.bf16.msra.mxu0 %v5499_v60 }
  0x3b   :  { %v6590_v56 = vld [vmem:[%s8279_s0 + $0x4] ss:$16 sps:$4 sm:$0xff]   ;;  %v5492_v62 = vcombine.high %v81_v51, %v85_v54  ;;  %1944 = vmatprep.subr.bf16.mxu1 %v5628_v55  ;;  %v5491_v4 = vcombine.low %v81_v51, %v85_v54 }
  0x3c   :  { %v209_v57 = vld [vmem:[#allocation2 + $0x400] sm:$0xff]  ;;  %1851 = vmatprep.mubr.bf16.mxu0 %v6590_v56  ;;  %1945 = vmatpush1.bf16.msra.mxu1 %v5627_v61 }
  0x3d   :  { %v213_v58 = vld [vmem:[#allocation2 + $0x420] sm:$0xff]  ;;  %1833 = vmatprep.subr.bf16.mxu0 %v5492_v62 }
  0x3e   :  { %v201_v63 = vld [vmem:[#allocation2 + $0x3c0] sm:$0xff]  ;;  %v5620_v0 = vcombine.high %v209_v57, %v213_v58  ;;  %v5619_v5 = vcombine.low %v209_v57, %v213_v58  ;;  %1834 = vmatpush1.bf16.msra.mxu0 %v5491_v4  ;;  %v266_v4 = vld [vmem:[#allocation2 + $0x5c8] sm:$0xff] }
  0x3f   :  { %v205_v1 = vld [vmem:[#allocation2 + $0x3e0] sm:$0xff] }
  0x40   :  { %v329_v2 = vld [vmem:[#allocation2 + $0x7c0] sm:$0xff]  ;;  %v5612_v6 = vcombine.high %v201_v63, %v205_v1  ;;  %1946 = vmatprep.subr.bf16.mxu1 %v5620_v0  ;;  %v5611_v12 = vcombine.low %v201_v63, %v205_v1  ;;  %v138_v1 = vld [vmem:[#allocation2 + $0x1c8] sm:$0xff] }
  0x41   :  { %v333_v3 = vld [vmem:[#allocation2 + $0x7e0] sm:$0xff]  ;;  %1947 = vmatpush1.bf16.msra.mxu1 %v5619_v5  ;;  %v270_v5 = vld [vmem:[#allocation2 + $0x5e8] sm:$0xff] }
  0x42   :  { %v5740_v7 = vcombine.high %v329_v2, %v333_v3  ;;  %v193_v8 = vld [vmem:[#allocation2 + $0x380] sm:$0xff]  ;;  %1835 = vmatprep.subr.bf16.mxu0 %v5612_v6  ;;  %v5739_v13 = vcombine.low %v329_v2, %v333_v3  ;;  %v142_v3 = vld [vmem:[#allocation2 + $0x1e8] sm:$0xff] }
  0x43   :  { %v197_v9 = vld [vmem:[#allocation2 + $0x3a0] sm:$0xff]  ;;  %1836 = vmatpush2.bf16.msra.mxu0 %v5611_v12 }
  0x44   :  { %v321_v10 = vld [vmem:[#allocation2 + $0x780] sm:$0xff]  ;;  %v5604_v14 = vcombine.high %v193_v8, %v197_v9  ;;  %1948 = vmatprep.subr.bf16.mxu1 %v5740_v7  ;;  %v5603_v20 = vcombine.low %v193_v8, %v197_v9  ;;  %v5550_v8 = vcombine.high %v138_v1, %v142_v3  ;;  %v5678_v9 = vcombine.high %v266_v4, %v270_v5 }
  0x45   :  { %v325_v11 = vld [vmem:[#allocation2 + $0x7a0] sm:$0xff]  ;;  %1949 = vmatpush2.bf16.msra.mxu1 %v5739_v13  ;;  %v258_v13 = vld [vmem:[#allocation2 + $0x588] sm:$0xff] }
  0x46   :  { %v5732_v15 = vcombine.high %v321_v10, %v325_v11  ;;  %v185_v16 = vld [vmem:[#allocation2 + $0x340] sm:$0xff]  ;;  %1837 = vmatprep.subr.bf16.mxu0 %v5604_v14  ;;  %v5731_v21 = vcombine.low %v321_v10, %v325_v11  ;;  %v130_v10 = vld [vmem:[#allocation2 + $0x188] sm:$0xff] }
  0x47   :  { %v189_v17 = vld [vmem:[#allocation2 + $0x360] sm:$0xff]  ;;  %1838 = vmatpush2.bf16.msra.mxu0 %v5603_v20  ;;  %v134_v11 = vld [vmem:[#allocation2 + $0x1a8] sm:$0xff] }
  0x48   :  { %v313_v18 = vld [vmem:[#allocation2 + $0x740] sm:$0xff]  ;;  %v5596_v22 = vcombine.high %v185_v16, %v189_v17  ;;  %1950 = vmatprep.subr.bf16.mxu1 %v5732_v15  ;;  %v5595_v28 = vcombine.low %v185_v16, %v189_v17  ;;  %v262_v14 = vld [vmem:[#allocation2 + $0x5a8] sm:$0xff]  ;;  %v5549_v16 = vcombine.low %v138_v1, %v142_v3  ;;  %v5677_v17 = vcombine.low %v266_v4, %v270_v5 }
  0x49   :  { %v317_v19 = vld [vmem:[#allocation2 + $0x760] sm:$0xff]  ;;  %1951 = vmatpush2.bf16.msra.mxu1 %v5731_v21  ;;  %v6607_v15 = vld [vmem:[%s8279_s0 + $0x8] ss:$16 sps:$4 sm:$0xff]   ;;  %v6666_v1 = vld [vmem:[%s8279_s0 + $0x6c] ss:$16 sps:$4 sm:$0xff]  }
  0x4a   :  { %v177_v23 = vld [vmem:[#allocation2 + $0x300] sm:$0xff]  ;;  %v5724_v24 = vcombine.high %v313_v18, %v317_v19  ;;  %1839 = vmatprep.subr.bf16.mxu0 %v5596_v22  ;;  %v5723_v29 = vcombine.low %v313_v18, %v317_v19  ;;  %v5542_v18 = vcombine.high %v130_v10, %v134_v11  ;;  %v5670_v19 = vcombine.high %v258_v13, %v262_v14  ;;  %v122_v21 = vld [vmem:[#allocation2 + $0x148] sm:$0xff] }
  0x4b   :  { %v181_v25 = vld [vmem:[#allocation2 + $0x320] sm:$0xff]  ;;  %1840 = vmatpush2.bf16.msra.mxu0 %v5595_v28  ;;  %v126_v22 = vld [vmem:[#allocation2 + $0x168] sm:$0xff] }
  0x4c   :  { %v305_v26 = vld [vmem:[#allocation2 + $0x700] sm:$0xff]  ;;  %v5588_v30 = vcombine.high %v177_v23, %v181_v25  ;;  %1952 = vmatprep.subr.bf16.mxu1 %v5724_v24  ;;  %v5587_v36 = vcombine.low %v177_v23, %v181_v25  ;;  %v6618_v23 = vld [vmem:[%s8279_s0 + $0x2c] ss:$16 sps:$4 sm:$0xff]   ;;  %v5534_v28 = vcombine.high %v122_v21, %v126_v22 }
  0x4d   :  { %v309_v27 = vld [vmem:[#allocation2 + $0x720] sm:$0xff]  ;;  %1953 = vmatpush2.bf16.msra.mxu1 %v5723_v29  ;;  %v250_v24 = vld [vmem:[#allocation2 + $0x548] sm:$0xff] }
  0x4e   :  { %v169_v31 = vld [vmem:[#allocation2 + $0x2c0] sm:$0xff]  ;;  %v5716_v32 = vcombine.high %v305_v26, %v309_v27  ;;  %1841 = vmatprep.subr.bf16.mxu0 %v5588_v30  ;;  %v5715_v37 = vcombine.low %v305_v26, %v309_v27  ;;  %v254_v25 = vld [vmem:[#allocation2 + $0x568] sm:$0xff]  ;;  %v5541_v26 = vcombine.low %v130_v10, %v134_v11  ;;  %v5669_v27 = vcombine.low %v258_v13, %v262_v14 }
  0x4f   :  { %v173_v33 = vld [vmem:[#allocation2 + $0x2e0] sm:$0xff]  ;;  %1842 = vmatpush2.bf16.msra.mxu0 %v5587_v36  ;;  %v5662_v29 = vcombine.high %v250_v24, %v254_v25  ;;  %v114_v30 = vld [vmem:[#allocation2 + $0x108] sm:$0xff]  ;;  %v5533_v36 = vcombine.low %v122_v21, %v126_v22 }
  0x50   :  { %v297_v34 = vld [vmem:[#allocation2 + $0x6c0] sm:$0xff]  ;;  %v5580_v38 = vcombine.high %v169_v31, %v173_v33  ;;  %1954 = vmatprep.subr.bf16.mxu1 %v5716_v32  ;;  %v5579_v44 = vcombine.low %v169_v31, %v173_v33  ;;  %v118_v31 = vld [vmem:[#allocation2 + $0x128] sm:$0xff] }
  0x51   :  { %v301_v35 = vld [vmem:[#allocation2 + $0x6e0] sm:$0xff]  ;;  %1955 = vmatpush2.bf16.msra.mxu1 %v5715_v37  ;;  %v242_v33 = vld [vmem:[#allocation2 + $0x508] sm:$0xff]  ;;  %v5661_v37 = vcombine.low %v250_v24, %v254_v25 }
  0x52   :  { %v5708_v39 = vcombine.high %v297_v34, %v301_v35  ;;  %v161_v40 = vld [vmem:[#allocation2 + $0x280] sm:$0xff]  ;;  %1843 = vmatprep.subr.bf16.mxu0 %v5580_v38  ;;  %v5707_v45 = vcombine.low %v297_v34, %v301_v35  ;;  %v246_v34 = vld [vmem:[#allocation2 + $0x528] sm:$0xff]  ;;  %v5526_v38 = vcombine.high %v114_v30, %v118_v31 }
  0x53   :  { %v165_v41 = vld [vmem:[#allocation2 + $0x2a0] sm:$0xff]  ;;  %1844 = vmatpush2.bf16.msra.mxu0 %v5579_v44  ;;  %v6631_v35 = vld [vmem:[%s8279_s0 + $0x28] ss:$16 sps:$4 sm:$0xff]   ;;  %v6690_v25 = vld [vmem:[%s8279_s0 + $0x8c] ss:$16 sps:$4 sm:$0xff]  }
  0x54   :  { %v289_v42 = vld [vmem:[#allocation2 + $0x680] sm:$0xff]  ;;  %v5572_v46 = vcombine.high %v161_v40, %v165_v41  ;;  %1956 = vmatprep.subr.bf16.mxu1 %v5708_v39  ;;  %v5571_v52 = vcombine.low %v161_v40, %v165_v41  ;;  %v5654_v39 = vcombine.high %v242_v33, %v246_v34  ;;  %v106_v41 = vld [vmem:[#allocation2 + $0xc8] sm:$0xff] }
  0x55   :  { %v293_v43 = vld [vmem:[#allocation2 + $0x6a0] sm:$0xff]  ;;  %1957 = vmatpush2.bf16.msra.mxu1 %v5707_v45  ;;  %v234_v44 = vld [vmem:[#allocation2 + $0x4c8] sm:$0xff] }
  0x56   :  { %v5700_v47 = vcombine.high %v289_v42, %v293_v43  ;;  %v153_v48 = vld [vmem:[#allocation2 + $0x240] sm:$0xff]  ;;  %1845 = vmatprep.subr.bf16.mxu0 %v5572_v46  ;;  %v5699_v53 = vcombine.low %v289_v42, %v293_v43  ;;  %v110_v42 = vld [vmem:[#allocation2 + $0xe8] sm:$0xff]  ;;  %v5525_v46 = vcombine.low %v114_v30, %v118_v31 }
  0x57   :  { %v157_v49 = vld [vmem:[#allocation2 + $0x260] sm:$0xff]  ;;  %1846 = vmatpush2.bf16.msra.mxu0 %v5571_v52  ;;  %v6642_v43 = vld [vmem:[%s8279_s0 + $0x4c] ss:$16 sps:$4 sm:$0xff]   ;;  %v6679_v14 = vld [vmem:[%s8279_s0 + $0x68] ss:$16 sps:$4 sm:$0xff]  }
  0x58   :  { %v281_v50 = vld [vmem:[#allocation2 + $0x640] sm:$0xff]  ;;  %v5564_v54 = vcombine.high %v153_v48, %v157_v49  ;;  %1958 = vmatprep.subr.bf16.mxu1 %v5700_v47  ;;  %v5563_v62 = vcombine.low %v153_v48, %v157_v49  ;;  %v238_v45 = vld [vmem:[#allocation2 + $0x4e8] sm:$0xff]  ;;  %v5653_v47 = vcombine.low %v242_v33, %v246_v34  ;;  %v5518_v48 = vcombine.high %v106_v41, %v110_v42 }
  0x59   :  { %v285_v51 = vld [vmem:[#allocation2 + $0x660] sm:$0xff]  ;;  %1959 = vmatpush2.bf16.msra.mxu1 %v5699_v53  ;;  %v5646_v49 = vcombine.high %v234_v44, %v238_v45  ;;  %v226_v53 = vld [vmem:[#allocation2 + $0x488] sm:$0xff] }
  0x5a   :  { %v145_v55 = vld [vmem:[#allocation2 + $0x200] sm:$0xff]  ;;  %v5692_v57 = vcombine.high %v281_v50, %v285_v51  ;;  %1847 = vmatprep.subr.bf16.mxu0 %v5564_v54  ;;  %v5691_v63 = vcombine.low %v281_v50, %v285_v51  ;;  %v98_v50 = vld [vmem:[#allocation2 + $0x88] sm:$0xff] }
  0x5b   :  { %v149_v58 = vld [vmem:[#allocation2 + $0x220] sm:$0xff]  ;;  %1848 = vmatpush2.bf16.msra.mxu0 %v5563_v62  ;;  %v102_v51 = vld [vmem:[#allocation2 + $0xa8] sm:$0xff] }
  0x5c   :  { %v273_v60 = vld [vmem:[#allocation2 + $0x600] sm:$0xff]  ;;  %v5556_v0 = vcombine.high %v145_v55, %v149_v58  ;;  %1960 = vmatprep.subr.bf16.mxu1 %v5692_v57  ;;  %v5555_v6 = vcombine.low %v145_v55, %v149_v58  ;;  %v230_v54 = vld [vmem:[#allocation2 + $0x4a8] sm:$0xff]  ;;  %v5517_v57 = vcombine.low %v106_v41, %v110_v42  ;;  %v5645_v58 = vcombine.low %v234_v44, %v238_v45 }
  0x5d   :  { %v277_v61 = vld [vmem:[#allocation2 + $0x620] sm:$0xff]  ;;  %1961 = vmatpush2.bf16.msra.mxu1 %v5691_v63  ;;  %v6655_v55 = vld [vmem:[%s8279_s0 + $0x48] ss:$16 sps:$4 sm:$0xff]   ;;  %v5509_v4 = vcombine.low %v98_v50, %v102_v51  ;;  %v5637_v5 = vcombine.low %v226_v53, %v230_v54 }
  0x5e   :  { %v5684_v2 = vcombine.high %v273_v60, %v277_v61  ;;  %1849 = vmatprep.subr.bf16.mxu0 %v5556_v0  ;;  %v5683_v7 = vcombine.low %v273_v60, %v277_v61  ;;  %v6602_v12 = vld [vmem:[%s8279_s0] ss:$16 sps:$4 sm:$0xff]   ;;  %v6612_v20 = vld [vmem:[%s8279_s0 + $0x24] ss:$16 sps:$4 sm:$0xff]   ;;  %v5510_v60 = vcombine.high %v98_v50, %v102_v51  ;;  %v5638_v61 = vcombine.high %v226_v53, %v230_v54  ;;  %v90_v63 = vld [vmem:[#allocation2 + $0x48] sm:$0xff] }
  0x5f   :  { %1850 = vmatpush2.bf16.msra.mxu0 %v5555_v6  ;;  %v6626_v32 = vld [vmem:[%s8279_s0 + $0x20] ss:$16 sps:$4 sm:$0xff]   ;;  %v6636_v40 = vld [vmem:[%s8279_s0 + $0x44] ss:$16 sps:$4 sm:$0xff]   ;;  %v94_v0 = vld [vmem:[#allocation2 + $0x68] sm:$0xff] }
  0x60   :  { %1962 = vmatprep.subr.bf16.mxu1 %v5684_v2  ;;  %2045 = vmatprep.subr.bf16.mxu0 %v5550_v8  ;;  %v6650_v52 = vld [vmem:[%s8279_s0 + $0x40] ss:$16 sps:$4 sm:$0xff]   ;;  %v6660_v62 = vld [vmem:[%s8279_s0 + $0x64] ss:$16 sps:$4 sm:$0xff]   ;;  %v218_v2 = vld [vmem:[#allocation2 + $0x448] sm:$0xff]  ;;  %v5502_v6 = vcombine.high %v90_v63, %v94_v0 }
  0x61   :  { %1963 = vmatpush2.bf16.msra.mxu1 %v5683_v7  ;;  %v222_v3 = vld [vmem:[#allocation2 + $0x468] sm:$0xff]  ;;  %v6674_v10 = vld [vmem:[%s8279_s0 + $0x60] ss:$16 sps:$4 sm:$0xff]   ;;  %v6684_v21 = vld [vmem:[%s8279_s0 + $0x84] ss:$16 sps:$4 sm:$0xff]  }
  0x62   :  { %2158 = vmatprep.subr.bf16.mxu1 %v5678_v9  ;;  %1852 = vmatmul.mubr.bf16.vlgmr.msra.gmra.mxu0 %v6602_v12  ;;  %v5630_v7 = vcombine.high %v218_v2, %v222_v3  ;;  %v82_v8 = vld [vmem:[#allocation2 + $0x8] sm:$0xff]  ;;  %v6697_v31 = vld [vmem:[%s8279_s0 + $0x80] ss:$16 sps:$4 sm:$0xff]   ;;  %v6708_v42 = vld [vmem:[%s8279_s0 + $0xa4] ss:$16 sps:$4 sm:$0xff]  }
  0x63   :  { %2046 = vmatpush1.bf16.msra.mxu0 %v5549_v16  ;;  %1861 = vmatprep.mubr.bf16.mxu0 %v6612_v20  ;;  %v86_v9 = vld [vmem:[#allocation2 + $0x28] sm:$0xff]  ;;  %v5501_v16 = vcombine.low %v90_v63, %v94_v0 }
  0x64   :  { %1965 = vmatmul.mubr.bf16.vlgmr.msra.gmra.mxu1 %v6607_v15  ;;  %2047 = vmatprep.subr.bf16.mxu0 %v5542_v18  ;;  %v210_v11 = vld [vmem:[#allocation2 + $0x408] sm:$0xff]  ;;  %v5494_v18 = vcombine.high %v82_v8, %v86_v9 }
  0x65   :  { %2159 = vmatpush1.bf16.msra.mxu1 %v5677_v17  ;;  %1974 = vmatprep.mubr.bf16.mxu1 %v6618_v23  ;;  %v214_v13 = vld [vmem:[#allocation2 + $0x428] sm:$0xff]  ;;  %v5629_v17 = vcombine.low %v218_v2, %v222_v3 }
  0x66   :  { %2160 = vmatprep.subr.bf16.mxu1 %v5670_v19  ;;  %v5622_v19 = vcombine.high %v210_v11, %v214_v13  ;;  %v202_v22 = vld [vmem:[#allocation2 + $0x3c8] sm:$0xff] }
  0x67   :  { %2048 = vmatpush1.bf16.msra.mxu0 %v5541_v26  ;;  %v206_v24 = vld [vmem:[#allocation2 + $0x3e8] sm:$0xff] }
  0x68   :  { %2049 = vmatprep.subr.bf16.mxu0 %v5534_v28  ;;  %v330_v26 = vld [vmem:[#allocation2 + $0x7c8] sm:$0xff]  ;;  %v5493_v28 = vcombine.low %v82_v8, %v86_v9  ;;  %v5614_v30 = vcombine.high %v202_v22, %v206_v24  ;;  %v5613_v41 = vcombine.low %v202_v22, %v206_v24  ;;  %v6744_v22 = vld [vmem:[%s8279_s0 + $0xc0] ss:$16 sps:$4 sm:$0xff]  }
  0x69   :  { %2161 = vmatpush1.bf16.msra.mxu1 %v5669_v27  ;;  %v334_v27 = vld [vmem:[#allocation2 + $0x7e8] sm:$0xff] }
  0x6a   :  { %2162 = vmatprep.subr.bf16.mxu1 %v5662_v29  ;;  %1862 = vmatmul.mubr.bf16.gmra.mxu0 %v6626_v32  ;;  %v5621_v29 = vcombine.low %v210_v11, %v214_v13  ;;  %v5742_v33 = vcombine.high %v330_v26, %v334_v27  ;;  %v194_v34 = vld [vmem:[#allocation2 + $0x388] sm:$0xff]  ;;  %v5741_v44 = vcombine.low %v330_v26, %v334_v27 }
  0x6b   :  { %2050 = vmatpush1.bf16.msra.mxu0 %v5533_v36  ;;  %1871 = vmatprep.mubr.bf16.mxu0 %v6636_v40  ;;  %v198_v36 = vld [vmem:[#allocation2 + $0x3a8] sm:$0xff] }
  0x6c   :  { %1975 = vmatmul.mubr.bf16.gmra.mxu1 %v6631_v35  ;;  %2051 = vmatprep.subr.bf16.mxu0 %v5526_v38  ;;  %v322_v38 = vld [vmem:[#allocation2 + $0x788] sm:$0xff]  ;;  %v5606_v45 = vcombine.high %v194_v34, %v198_v36  ;;  %v5605_v53 = vcombine.low %v194_v34, %v198_v36  ;;  %v6756_v36 = vld [vmem:[%s8279_s0 + $0xe4] ss:$16 sps:$4 sm:$0xff]  }
  0x6d   :  { %2163 = vmatpush1.bf16.msra.mxu1 %v5661_v37  ;;  %1984 = vmatprep.mubr.bf16.mxu1 %v6642_v43  ;;  %v6703_v37 = vld [vmem:[%s8279_s0 + $0x88] ss:$16 sps:$4 sm:$0xff]   ;;  %v6737_v8 = vld [vmem:[%s8279_s0 + $0xcc] ss:$16 sps:$4 sm:$0xff]  }
  0x6e   :  { %2164 = vmatprep.subr.bf16.mxu1 %v5654_v39  ;;  %v326_v39 = vld [vmem:[#allocation2 + $0x7a8] sm:$0xff] }
  0x6f   :  { %2052 = vmatpush1.bf16.msra.mxu0 %v5525_v46  ;;  %v6713_v46 = vld [vmem:[%s8279_s0 + $0xac] ss:$16 sps:$4 sm:$0xff]   ;;  %v5734_v50 = vcombine.high %v322_v38, %v326_v39  ;;  %v5733_v54 = vcombine.low %v322_v38, %v326_v39  ;;  %v6726_v0 = vld [vmem:[%s8279_s0 + $0xa8] ss:$16 sps:$4 sm:$0xff]  }
  0x70   :  { %2053 = vmatprep.subr.bf16.mxu0 %v5518_v48  ;;  %v190_v48 = vld [vmem:[#allocation2 + $0x368] sm:$0xff] }
  0x71   :  { %2165 = vmatpush1.bf16.msra.mxu1 %v5653_v47  ;;  %v186_v47 = vld [vmem:[#allocation2 + $0x348] sm:$0xff] }
  0x72   :  { %2166 = vmatprep.subr.bf16.mxu1 %v5646_v49  ;;  %1872 = vmatmul.mubr.bf16.gmra.mxu0 %v6650_v52  ;;  %v314_v49 = vld [vmem:[#allocation2 + $0x748] sm:$0xff] }
  0x73   :  { %2054 = vmatpush1.bf16.msra.mxu0 %v5517_v57  ;;  %1881 = vmatprep.mubr.bf16.mxu0 %v6660_v62  ;;  %v318_v51 = vld [vmem:[#allocation2 + $0x768] sm:$0xff]  ;;  %v6720_v57 = vld [vmem:[%s8279_s0 + $0xa0] ss:$16 sps:$4 sm:$0xff]  }
  0x74   :  { %1985 = vmatmul.mubr.bf16.gmra.mxu1 %v6655_v55  ;;  %2055 = vmatprep.subr.bf16.mxu0 %v5510_v60  ;;  %v178_v60 = vld [vmem:[#allocation2 + $0x308] sm:$0xff]  ;;  %v5726_v2 = vcombine.high %v314_v49, %v318_v51 }
  0x75   :  { %2167 = vmatpush1.bf16.msra.mxu1 %v5645_v58  ;;  %1994 = vmatprep.mubr.bf16.mxu1 %v6666_v1  ;;  %v5598_v58 = vcombine.high %v186_v47, %v190_v48  ;;  %v306_v63 = vld [vmem:[#allocation2 + $0x708] sm:$0xff] }
  0x76   :  { %2168 = vmatprep.subr.bf16.mxu1 %v5638_v61  ;;  %v182_v61 = vld [vmem:[#allocation2 + $0x328] sm:$0xff] }
  0x77   :  { %2056 = vmatpush1.bf16.msra.mxu0 %v5509_v4  ;;  %v310_v3 = vld [vmem:[#allocation2 + $0x728] sm:$0xff]  ;;  %v5597_v4 = vcombine.low %v186_v47, %v190_v48 }
  0x78   :  { %2057 = vmatprep.subr.bf16.mxu0 %v5502_v6  ;;  %v5725_v6 = vcombine.low %v314_v49, %v318_v51  ;;  %v170_v9 = vld [vmem:[#allocation2 + $0x2c8] sm:$0xff] }
  0x79   :  { %2169 = vmatpush1.bf16.msra.mxu1 %v5637_v5  ;;  %v6732_v5 = vld [vmem:[%s8279_s0 + $0xc4] ss:$16 sps:$4 sm:$0xff]   ;;  %v174_v11 = vld [vmem:[#allocation2 + $0x2e8] sm:$0xff] }
  0x7a   :  { %2170 = vmatprep.subr.bf16.mxu1 %v5630_v7  ;;  %1882 = vmatmul.mubr.bf16.gmra.mxu0 %v6674_v10  ;;  %v5590_v7 = vcombine.high %v178_v60, %v182_v61  ;;  %v298_v13 = vld [vmem:[#allocation2 + $0x6c8] sm:$0xff]  ;;  %v5582_v24 = vcombine.high %v170_v9, %v174_v11  ;;  %v5581_v34 = vcombine.low %v170_v9, %v174_v11  ;;  %v139_v9 = vld [vmem:[#allocation2 + $0x1d0] sm:$0xff] }
  0x7b   :  { %2058 = vmatpush1.bf16.msra.mxu0 %v5501_v16  ;;  %1891 = vmatprep.mubr.bf16.mxu0 %v6684_v21  ;;  %v5718_v16 = vcombine.high %v306_v63, %v310_v3  ;;  %v162_v26 = vld [vmem:[#allocation2 + $0x288] sm:$0xff]  ;;  %v143_v11 = vld [vmem:[#allocation2 + $0x1f0] sm:$0xff] }
  0x7c   :  { %1995 = vmatmul.mubr.bf16.gmra.mxu1 %v6679_v14  ;;  %2059 = vmatprep.subr.bf16.mxu0 %v5494_v18  ;;  %v5589_v18 = vcombine.low %v178_v60, %v182_v61  ;;  %v166_v27 = vld [vmem:[#allocation2 + $0x2a8] sm:$0xff] }
  0x7d   :  { %2171 = vmatpush1.bf16.msra.mxu1 %v5629_v17  ;;  %2004 = vmatprep.mubr.bf16.mxu1 %v6690_v25  ;;  %v302_v17 = vld [vmem:[#allocation2 + $0x6e8] sm:$0xff]  ;;  %v5574_v39 = vcombine.high %v162_v26, %v166_v27 }
  0x7e   :  { %2172 = vmatprep.subr.bf16.mxu1 %v5622_v19  ;;  %v5717_v19 = vcombine.low %v306_v63, %v310_v3  ;;  %v5709_v38 = vcombine.low %v298_v13, %v302_v17  ;;  %v282_v47 = vld [vmem:[#allocation2 + $0x648] sm:$0xff] }
  0x7f   :  { %2060 = vmatpush1.bf16.msra.mxu0 %v5493_v28  ;;  %v290_v28 = vld [vmem:[#allocation2 + $0x688] sm:$0xff] }
  0x80   :  { %2061 = vmatprep.subr.bf16.mxu0 %v5614_v30  ;;  %v5710_v30 = vcombine.high %v298_v13, %v302_v17  ;;  %v286_v49 = vld [vmem:[#allocation2 + $0x668] sm:$0xff]  ;;  %v267_v13 = vld [vmem:[#allocation2 + $0x5d0] sm:$0xff] }
  0x81   :  { %2173 = vmatpush1.bf16.msra.mxu1 %v5621_v29  ;;  %v6750_v29 = vld [vmem:[%s8279_s0 + $0xc8] ss:$16 sps:$4 sm:$0xff]   ;;  %v271_v17 = vld [vmem:[#allocation2 + $0x5f0] sm:$0xff] }
  0x82   :  { %2174 = vmatprep.subr.bf16.mxu1 %v5742_v33  ;;  %1892 = vmatmul.mubr.bf16.gmra.mxu0 %v6697_v31  ;;  %v294_v33 = vld [vmem:[#allocation2 + $0x6a8] sm:$0xff] }
  0x83   :  { %2062 = vmatpush2.bf16.msra.mxu0 %v5613_v41  ;;  %1901 = vmatprep.mubr.bf16.mxu0 %v6708_v42  ;;  %v6761_v41 = vld [vmem:[%s8279_s0 + $0xec] ss:$16 sps:$4 sm:$0xff]   ;;  %v5702_v48 = vcombine.high %v290_v28, %v294_v33  ;;  %v5701_v51 = vcombine.low %v290_v28, %v294_v33  ;;  %v6774_v63 = vld [vmem:[%s8279_s0 + $0xe8] ss:$16 sps:$4 sm:$0xff]   ;;  %v259_v28 = vld [vmem:[#allocation2 + $0x590] sm:$0xff] }
  0x84   :  { %2005 = vmatmul.mubr.bf16.gmra.mxu1 %v6703_v37  ;;  %2063 = vmatprep.subr.bf16.mxu0 %v5606_v45  ;;  %v158_v45 = vld [vmem:[#allocation2 + $0x268] sm:$0xff]  ;;  %v263_v33 = vld [vmem:[#allocation2 + $0x5b0] sm:$0xff] }
  0x85   :  { %2175 = vmatpush2.bf16.msra.mxu1 %v5741_v44  ;;  %2014 = vmatprep.mubr.bf16.mxu1 %v6713_v46  ;;  %v154_v44 = vld [vmem:[#allocation2 + $0x248] sm:$0xff] }
  0x86   :  { %2176 = vmatprep.subr.bf16.mxu1 %v5734_v50  ;;  %v5573_v50 = vcombine.low %v162_v26, %v166_v27  ;;  %v150_v60 = vld [vmem:[#allocation2 + $0x228] sm:$0xff]  ;;  %v131_v26 = vld [vmem:[#allocation2 + $0x190] sm:$0xff] }
  0x87   :  { %2064 = vmatpush2.bf16.msra.mxu0 %v5605_v53  ;;  %v6768_v53 = vld [vmem:[%s8279_s0 + $0xe0] ss:$16 sps:$4 sm:$0xff]   ;;  %v274_v61 = vld [vmem:[#allocation2 + $0x608] sm:$0xff] }
  0x88   :  { %2065 = vmatprep.subr.bf16.mxu0 %v5598_v58  ;;  %v146_v58 = vld [vmem:[#allocation2 + $0x208] sm:$0xff]  ;;  %v135_v27 = vld [vmem:[#allocation2 + $0x1b0] sm:$0xff] }
  0x89   :  { %2177 = vmatpush2.bf16.msra.mxu1 %v5733_v54  ;;  %v5566_v54 = vcombine.high %v154_v44, %v158_v45  ;;  %v278_v3 = vld [vmem:[#allocation2 + $0x628] sm:$0xff] }
  0x8a   :  { %2178 = vmatprep.subr.bf16.mxu1 %v5726_v2  ;;  %1902 = vmatmul.mubr.bf16.gmra.mxu0 %v6720_v57  ;;  %v5694_v2 = vcombine.high %v282_v47, %v286_v49 }
  0x8b   :  { %2066 = vmatpush2.bf16.msra.mxu0 %v5597_v4  ;;  %1911 = vmatprep.mubr.bf16.mxu0 %v6732_v5  ;;  %v5565_v4 = vcombine.low %v154_v44, %v158_v45  ;;  %v5544_v44 = vcombine.high %v131_v26, %v135_v27  ;;  %v127_v45 = vld [vmem:[#allocation2 + $0x170] sm:$0xff] }
  0x8c   :  { %2015 = vmatmul.mubr.bf16.gmra.mxu1 %v6726_v0  ;;  %2067 = vmatprep.subr.bf16.mxu0 %v5590_v7  ;;  %v5558_v7 = vcombine.high %v146_v58, %v150_v60 }
  0x8d   :  { %2179 = vmatpush2.bf16.msra.mxu1 %v5725_v6  ;;  %2024 = vmatprep.mubr.bf16.mxu1 %v6737_v8  ;;  %v5693_v6 = vcombine.low %v282_v47, %v286_v49  ;;  %v5672_v47 = vcombine.high %v259_v28, %v263_v33  ;;  %v255_v49 = vld [vmem:[#allocation2 + $0x570] sm:$0xff] }
  0x8e   :  { %2180 = vmatprep.subr.bf16.mxu1 %v5718_v16  ;;  %v5686_v16 = vcombine.high %v274_v61, %v278_v3 }
  0x8f   :  { %2068 = vmatpush2.bf16.msra.mxu0 %v5589_v18  ;;  %v5557_v18 = vcombine.low %v146_v58, %v150_v60  ;;  %v243_v60 = vld [vmem:[#allocation2 + $0x510] sm:$0xff] }
  0x90   :  { %2069 = vmatprep.subr.bf16.mxu0 %v5582_v24  ;;  %v5552_v24 = vcombine.high %v139_v9, %v143_v11 }
  0x91   :  { %2181 = vmatpush2.bf16.msra.mxu1 %v5717_v19  ;;  %v5685_v19 = vcombine.low %v274_v61, %v278_v3  ;;  %v247_v61 = vld [vmem:[#allocation2 + $0x530] sm:$0xff] }
  0x92   :  { %2182 = vmatprep.subr.bf16.mxu1 %v5710_v30  ;;  %1912 = vmatmul.mubr.bf16.gmra.mxu0 %v6744_v22  ;;  %v5680_v30 = vcombine.high %v267_v13, %v271_v17 }
  0x93   :  { %2070 = vmatpush2.bf16.msra.mxu0 %v5581_v34  ;;  %1921 = vmatprep.mubr.bf16.mxu0 %v6756_v36  ;;  %v5551_v34 = vcombine.low %v139_v9, %v143_v11  ;;  %v239_v9 = vld [vmem:[#allocation2 + $0x4f0] sm:$0xff] }
  0x94   :  { %2025 = vmatmul.mubr.bf16.gmra.mxu1 %v6750_v29  ;;  %2071 = vmatprep.subr.bf16.mxu0 %v5574_v39  ;;  %v5679_v39 = vcombine.low %v267_v13, %v271_v17  ;;  %v103_v11 = vld [vmem:[#allocation2 + $0xb0] sm:$0xff]  ;;  %v5655_v13 = vcombine.low %v243_v60, %v247_v61 }
  0x95   :  { %2183 = vmatpush2.bf16.msra.mxu1 %v5709_v38  ;;  %2034 = vmatprep.mubr.bf16.mxu1 %v6761_v41  ;;  %v123_v38 = vld [vmem:[#allocation2 + $0x150] sm:$0xff] }
  0x96   :  { %2184 = vmatprep.subr.bf16.mxu1 %v5702_v48  ;;  %v251_v48 = vld [vmem:[#allocation2 + $0x550] sm:$0xff] }
  0x97   :  { %2072 = vmatpush2.bf16.msra.mxu0 %v5573_v50  ;;  %v115_v50 = vld [vmem:[#allocation2 + $0x110] sm:$0xff]  ;;  %v5664_v58 = vcombine.high %v251_v48, %v255_v49  ;;  %v5663_v3 = vcombine.low %v251_v48, %v255_v49 }
  0x98   :  { %2073 = vmatprep.subr.bf16.mxu0 %v5566_v54  ;;  %v5536_v54 = vcombine.high %v123_v38, %v127_v45 }
  0x99   :  { %2185 = vmatpush2.bf16.msra.mxu1 %v5701_v51  ;;  %v5671_v51 = vcombine.low %v259_v28, %v263_v33  ;;  %v95_v28 = vld [vmem:[#allocation2 + $0x70] sm:$0xff] }
  0x9a   :  { %2186 = vmatprep.subr.bf16.mxu1 %v5694_v2  ;;  %1922 = vmatmul.mubr.bf16.gmra.mxu0 %v6768_v53  ;;  %v107_v2 = vld [vmem:[#allocation2 + $0xd0] sm:$0xff] }
  0x9b   :  { %2074 = vmatpush2.bf16.msra.mxu0 %v5565_v4  ;;  %2077 = vmatprep.mubr.bf16.mxu0 %v6590_v56  ;;  %v5543_v56 = vcombine.low %v131_v26, %v135_v27  ;;  %v91_v27 = vld [vmem:[#allocation2 + $0x50] sm:$0xff] }
  0x9c   :  { %2035 = vmatmul.mubr.bf16.gmra.mxu1 %v6774_v63  ;;  %2075 = vmatprep.subr.bf16.mxu0 %v5558_v7  ;;  %v235_v7 = vld [vmem:[#allocation2 + $0x4d0] sm:$0xff] }
  0x9d   :  { %2187 = vmatpush2.bf16.msra.mxu1 %v5693_v6  ;;  %2190 = vmatprep.mubr.bf16.mxu1 %v6595_v59  ;;  %v119_v59 = vld [vmem:[#allocation2 + $0x130] sm:$0xff]  ;;  %v5656_v6 = vcombine.high %v243_v60, %v247_v61  ;;  %v5648_v17 = vcombine.high %v235_v7, %v239_v9 }
  0x9e   :  { %2188 = vmatprep.subr.bf16.mxu1 %v5686_v16  ;;  %v5528_v4 = vcombine.high %v115_v50, %v119_v59  ;;  %v223_v33 = vld [vmem:[#allocation2 + $0x470] sm:$0xff] }
  0x9f   :  { %2076 = vmatpush2.bf16.msra.mxu0 %v5557_v18  ;;  %v227_v18 = vld [vmem:[#allocation2 + $0x490] sm:$0xff] }
  0xa0   :  { %2271 = vmatprep.subr.bf16.mxu0 %v5552_v24  ;;  %v195_v60 = vld [vmem:[#allocation2 + $0x390] sm:$0xff] }
  0xa1   :  { %2189 = vmatpush2.bf16.msra.mxu1 %v5685_v19  ;;  %v231_v19 = vld [vmem:[#allocation2 + $0x4b0] sm:$0xff] }
  0xa2   :  { %2384 = vmatprep.subr.bf16.mxu1 %v5680_v30  ;;  %2078 = vmatmul.mubr.bf16.vlgmr.msra.gmra.mxu0 %v6602_v12  ;;  %v5535_v12 = vcombine.low %v123_v38, %v127_v45  ;;  %v5640_v26 = vcombine.high %v227_v18, %v231_v19  ;;  %v219_v30 = vld [vmem:[#allocation2 + $0x450] sm:$0xff] }
  0xa3   :  { %2272 = vmatpush1.bf16.msra.mxu0 %v5551_v34  ;;  %2087 = vmatprep.mubr.bf16.mxu0 %v6612_v20  ;;  %v5527_v20 = vcombine.low %v115_v50, %v119_v59  ;;  %v5504_v34 = vcombine.high %v91_v27, %v95_v28  ;;  %v5632_v38 = vcombine.high %v219_v30, %v223_v33  ;;  %v211_v45 = vld [vmem:[#allocation2 + $0x410] sm:$0xff] }
  0xa4   :  { %2191 = vmatmul.mubr.bf16.vlgmr.msra.gmra.mxu1 %v6607_v15  ;;  %2273 = vmatprep.subr.bf16.mxu0 %v5544_v44  ;;  %v111_v15 = vld [vmem:[#allocation2 + $0xf0] sm:$0xff] }
  0xa5   :  { %2385 = vmatpush1.bf16.msra.mxu1 %v5679_v39  ;;  %2200 = vmatprep.mubr.bf16.mxu1 %v6618_v23  ;;  %v99_v23 = vld [vmem:[#allocation2 + $0x90] sm:$0xff]  ;;  %v5520_v16 = vcombine.high %v107_v2, %v111_v15 }
  0xa6   :  { %2386 = vmatprep.subr.bf16.mxu1 %v5672_v47  ;;  %v5512_v24 = vcombine.high %v99_v23, %v103_v11  ;;  %v83_v39 = vld [vmem:[#allocation2 + $0x10] sm:$0xff]  ;;  %v5503_v47 = vcombine.low %v91_v27, %v95_v28 }
  0xa7   :  { %2274 = vmatpush1.bf16.msra.mxu0 %v5543_v56  ;;  %v87_v44 = vld [vmem:[#allocation2 + $0x30] sm:$0xff] }
  0xa8   :  { %2275 = vmatprep.subr.bf16.mxu0 %v5536_v54  ;;  %v5496_v48 = vcombine.high %v83_v39, %v87_v44  ;;  %v203_v56 = vld [vmem:[#allocation2 + $0x3d0] sm:$0xff] }
  0xa9   :  { %2387 = vmatpush1.bf16.msra.mxu1 %v5671_v51  ;;  %v207_v50 = vld [vmem:[#allocation2 + $0x3f0] sm:$0xff] }
  0xaa   :  { %2388 = vmatprep.subr.bf16.mxu1 %v5664_v58  ;;  %2088 = vmatmul.mubr.bf16.gmra.mxu0 %v6626_v32  ;;  %v5519_v32 = vcombine.low %v107_v2, %v111_v15  ;;  %v335_v59 = vld [vmem:[#allocation2 + $0x7f0] sm:$0xff]  ;;  %v5616_v54 = vcombine.high %v203_v56, %v207_v50  ;;  %v5615_v2 = vcombine.low %v203_v56, %v207_v50 }
  0xab   :  { %2276 = vmatpush1.bf16.msra.mxu0 %v5535_v12  ;;  %2097 = vmatprep.mubr.bf16.mxu0 %v6636_v40  ;;  %v5511_v40 = vcombine.low %v99_v23, %v103_v11  ;;  %v199_v61 = vld [vmem:[#allocation2 + $0x3b0] sm:$0xff] }
  0xac   :  { %2201 = vmatmul.mubr.bf16.gmra.mxu1 %v6631_v35  ;;  %2277 = vmatprep.subr.bf16.mxu0 %v5528_v4  ;;  %v5647_v35 = vcombine.low %v235_v7, %v239_v9  ;;  %v323_v12 = vld [vmem:[#allocation2 + $0x790] sm:$0xff]  ;;  %v5608_v15 = vcombine.high %v195_v60, %v199_v61 }
  0xad   :  { %2389 = vmatpush1.bf16.msra.mxu1 %v5663_v3  ;;  %2210 = vmatprep.mubr.bf16.mxu1 %v6642_v43  ;;  %v5639_v43 = vcombine.low %v227_v18, %v231_v19  ;;  %v187_v4 = vld [vmem:[#allocation2 + $0x350] sm:$0xff] }
  0xae   :  { %2390 = vmatprep.subr.bf16.mxu1 %v5656_v6  ;;  %v191_v6 = vld [vmem:[#allocation2 + $0x370] sm:$0xff] }
  0xaf   :  { %2278 = vmatpush1.bf16.msra.mxu0 %v5527_v20  ;;  %v319_v7 = vld [vmem:[#allocation2 + $0x770] sm:$0xff]  ;;  %v5600_v20 = vcombine.high %v187_v4, %v191_v6 }
  0xb0   :  { %2279 = vmatprep.subr.bf16.mxu0 %v5520_v16  ;;  %v179_v11 = vld [vmem:[#allocation2 + $0x310] sm:$0xff] }
  0xb1   :  { %2391 = vmatpush1.bf16.msra.mxu1 %v5655_v13  ;;  %v183_v13 = vld [vmem:[#allocation2 + $0x330] sm:$0xff] }
  0xb2   :  { %2392 = vmatprep.subr.bf16.mxu1 %v5648_v17  ;;  %2098 = vmatmul.mubr.bf16.gmra.mxu0 %v6650_v52  ;;  %v215_v52 = vld [vmem:[#allocation2 + $0x430] sm:$0xff]  ;;  %v5599_v17 = vcombine.low %v187_v4, %v191_v6  ;;  %v5592_v18 = vcombine.high %v179_v11, %v183_v13  ;;  %v128_v4 = vld [vmem:[#allocation2 + $0x178] sm:$0xff] }
  0xb3   :  { %2280 = vmatpush1.bf16.msra.mxu0 %v5519_v32  ;;  %2107 = vmatprep.mubr.bf16.mxu0 %v6660_v62  ;;  %v5624_v49 = vcombine.high %v211_v45, %v215_v52  ;;  %v331_v62 = vld [vmem:[#allocation2 + $0x7d0] sm:$0xff]  ;;  %v5623_v51 = vcombine.low %v211_v45, %v215_v52 }
  0xb4   :  { %2211 = vmatmul.mubr.bf16.gmra.mxu1 %v6655_v55  ;;  %2281 = vmatprep.subr.bf16.mxu0 %v5512_v24  ;;  %v5631_v55 = vcombine.low %v219_v30, %v223_v33  ;;  %v5744_v58 = vcombine.high %v331_v62, %v335_v59  ;;  %v307_v16 = vld [vmem:[#allocation2 + $0x710] sm:$0xff] }
  0xb5   :  { %2393 = vmatpush1.bf16.msra.mxu1 %v5647_v35  ;;  %2220 = vmatprep.mubr.bf16.mxu1 %v6666_v1  ;;  %v5495_v1 = vcombine.low %v83_v39, %v87_v44  ;;  %v171_v32 = vld [vmem:[#allocation2 + $0x2d0] sm:$0xff] }
  0xb6   :  { %2394 = vmatprep.subr.bf16.mxu1 %v5640_v26  ;;  %v175_v35 = vld [vmem:[#allocation2 + $0x2f0] sm:$0xff] }
  0xb7   :  { %2282 = vmatpush1.bf16.msra.mxu0 %v5511_v40  ;;  %v303_v24 = vld [vmem:[#allocation2 + $0x6f0] sm:$0xff]  ;;  %v5584_v27 = vcombine.high %v171_v32, %v175_v35 }
  0xb8   :  { %2283 = vmatprep.subr.bf16.mxu0 %v5504_v34  ;;  %v163_v30 = vld [vmem:[#allocation2 + $0x290] sm:$0xff] }
  0xb9   :  { %2395 = vmatpush1.bf16.msra.mxu1 %v5639_v43  ;;  %v167_v33 = vld [vmem:[#allocation2 + $0x2b0] sm:$0xff]  ;;  %v5583_v43 = vcombine.low %v171_v32, %v175_v35  ;;  %v6844_v32 = vld [vmem:[%s8279_s0 + $0x2c] ss:$16 sps:$4 sm:$0xff]  }
  0xba   :  { %2396 = vmatprep.subr.bf16.mxu1 %v5632_v38  ;;  %2108 = vmatmul.mubr.bf16.gmra.mxu0 %v6674_v10  ;;  %v327_v10 = vld [vmem:[#allocation2 + $0x7b0] sm:$0xff]  ;;  %v5576_v34 = vcombine.high %v163_v30, %v167_v33  ;;  %v248_v35 = vld [vmem:[#allocation2 + $0x538] sm:$0xff] }
  0xbb   :  { %2284 = vmatpush1.bf16.msra.mxu0 %v5503_v47  ;;  %2117 = vmatprep.mubr.bf16.mxu0 %v6684_v21  ;;  %v5736_v3 = vcombine.high %v323_v12, %v327_v10  ;;  %v315_v21 = vld [vmem:[#allocation2 + $0x750] sm:$0xff]  ;;  %v5735_v9 = vcombine.low %v323_v12, %v327_v10  ;;  %v136_v10 = vld [vmem:[#allocation2 + $0x1b8] sm:$0xff] }
  0xbc   :  { %2221 = vmatmul.mubr.bf16.gmra.mxu1 %v6679_v14  ;;  %2285 = vmatprep.subr.bf16.mxu0 %v5496_v48  ;;  %v5743_v14 = vcombine.low %v331_v62, %v335_v59  ;;  %v5728_v23 = vcombine.high %v315_v21, %v319_v7  ;;  %v291_v40 = vld [vmem:[#allocation2 + $0x690] sm:$0xff] }
  0xbd   :  { %2397 = vmatpush1.bf16.msra.mxu1 %v5631_v55  ;;  %2230 = vmatprep.mubr.bf16.mxu1 %v6690_v25  ;;  %v5607_v25 = vcombine.low %v195_v60, %v199_v61  ;;  %v155_v39 = vld [vmem:[#allocation2 + $0x250] sm:$0xff] }
  0xbe   :  { %2398 = vmatprep.subr.bf16.mxu1 %v5624_v49  ;;  %v159_v44 = vld [vmem:[#allocation2 + $0x270] sm:$0xff] }
  0xbf   :  { %2286 = vmatpush1.bf16.msra.mxu0 %v5495_v1  ;;  %v287_v45 = vld [vmem:[#allocation2 + $0x670] sm:$0xff]  ;;  %v5568_v47 = vcombine.high %v155_v39, %v159_v44  ;;  %v5567_v50 = vcombine.low %v155_v39, %v159_v44  ;;  %v140_v1 = vld [vmem:[#allocation2 + $0x1d8] sm:$0xff] }
  0xc0   :  { %2287 = vmatprep.subr.bf16.mxu0 %v5616_v54  ;;  %v147_v48 = vld [vmem:[#allocation2 + $0x210] sm:$0xff]  ;;  %v272_v54 = vld [vmem:[#allocation2 + $0x5f8] sm:$0xff] }
  0xc1   :  { %2399 = vmatpush1.bf16.msra.mxu1 %v5623_v51  ;;  %v151_v49 = vld [vmem:[#allocation2 + $0x230] sm:$0xff]  ;;  %v144_v51 = vld [vmem:[#allocation2 + $0x1f8] sm:$0xff] }
  0xc2   :  { %2400 = vmatprep.subr.bf16.mxu1 %v5744_v58  ;;  %2118 = vmatmul.mubr.bf16.gmra.mxu0 %v6697_v31  ;;  %v311_v31 = vld [vmem:[#allocation2 + $0x730] sm:$0xff]  ;;  %v5560_v62 = vcombine.high %v147_v48, %v151_v49  ;;  %v5554_v60 = vcombine.high %v140_v1, %v144_v51 }
  0xc3   :  { %2288 = vmatpush2.bf16.msra.mxu0 %v5615_v2  ;;  %2127 = vmatprep.mubr.bf16.mxu0 %v6708_v42  ;;  %v5720_v19 = vcombine.high %v307_v16, %v311_v31  ;;  %v299_v42 = vld [vmem:[#allocation2 + $0x6d0] sm:$0xff]  ;;  %v5719_v26 = vcombine.low %v307_v16, %v311_v31  ;;  %v260_v2 = vld [vmem:[#allocation2 + $0x598] sm:$0xff] }
  0xc4   :  { %2231 = vmatmul.mubr.bf16.gmra.mxu1 %v6703_v37  ;;  %2289 = vmatprep.subr.bf16.mxu0 %v5608_v15  ;;  %v5727_v37 = vcombine.low %v315_v21, %v319_v7  ;;  %v5712_v28 = vcombine.high %v299_v42, %v303_v24  ;;  %v275_v56 = vld [vmem:[#allocation2 + $0x610] sm:$0xff]  ;;  %v5553_v15 = vcombine.low %v140_v1, %v144_v51  ;;  %v120_v16 = vld [vmem:[#allocation2 + $0x138] sm:$0xff] }
  0xc5   :  { %2401 = vmatpush2.bf16.msra.mxu1 %v5743_v14  ;;  %2240 = vmatprep.mubr.bf16.mxu1 %v6713_v46  ;;  %v5591_v46 = vcombine.low %v179_v11, %v183_v13  ;;  %v6814_v61 = vld [vmem:[%s8279_s0 + $0x4] ss:$16 sps:$4 sm:$0xff]   ;;  %v264_v14 = vld [vmem:[#allocation2 + $0x5b8] sm:$0xff] }
  0xc6   :  { %2402 = vmatprep.subr.bf16.mxu1 %v5736_v3  ;;  %v124_v3 = vld [vmem:[#allocation2 + $0x158] sm:$0xff]  ;;  %v5674_v7 = vcombine.high %v260_v2, %v264_v14  ;;  %v5673_v31 = vcombine.low %v260_v2, %v264_v14  ;;  %v6862_v44 = vld [vmem:[%s8279_s0 + $0x44] ss:$16 sps:$4 sm:$0xff]  }
  0xc7   :  { %2290 = vmatpush2.bf16.msra.mxu0 %v5607_v25  ;;  %v252_v25 = vld [vmem:[#allocation2 + $0x558] sm:$0xff] }
  0xc8   :  { %2291 = vmatprep.subr.bf16.mxu0 %v5600_v20  ;;  %v256_v20 = vld [vmem:[#allocation2 + $0x578] sm:$0xff] }
  0xc9   :  { %2403 = vmatpush2.bf16.msra.mxu1 %v5735_v9  ;;  %v6826_v9 = vld [vmem:[%s8279_s0] ss:$16 sps:$4 sm:$0xff]   ;;  %v116_v13 = vld [vmem:[#allocation2 + $0x118] sm:$0xff] }
  0xca   :  { %2404 = vmatprep.subr.bf16.mxu1 %v5728_v23  ;;  %2128 = vmatmul.mubr.bf16.gmra.mxu0 %v6720_v57  ;;  %v295_v57 = vld [vmem:[#allocation2 + $0x6b0] sm:$0xff]  ;;  %v6832_v23 = vld [vmem:[%s8279_s0 + $0x8] ss:$16 sps:$4 sm:$0xff]  }
  0xcb   :  { %2292 = vmatpush2.bf16.msra.mxu0 %v5599_v17  ;;  %2137 = vmatprep.mubr.bf16.mxu0 %v6732_v5  ;;  %v5704_v38 = vcombine.high %v291_v40, %v295_v57  ;;  %v283_v5 = vld [vmem:[#allocation2 + $0x650] sm:$0xff]  ;;  %v5703_v52 = vcombine.low %v291_v40, %v295_v57  ;;  %v5538_v17 = vcombine.high %v124_v3, %v128_v4  ;;  %v240_v40 = vld [vmem:[#allocation2 + $0x4f8] sm:$0xff] }
  0xcc   :  { %2241 = vmatmul.mubr.bf16.gmra.mxu1 %v6726_v0  ;;  %2293 = vmatprep.subr.bf16.mxu0 %v5592_v18  ;;  %v5711_v0 = vcombine.low %v299_v42, %v303_v24  ;;  %v5696_v55 = vcombine.high %v283_v5, %v287_v45  ;;  %v5666_v18 = vcombine.high %v252_v25, %v256_v20  ;;  %v108_v24 = vld [vmem:[#allocation2 + $0xd8] sm:$0xff] }
  0xcd   :  { %2405 = vmatpush2.bf16.msra.mxu1 %v5727_v37  ;;  %2250 = vmatprep.mubr.bf16.mxu1 %v6737_v8  ;;  %v5575_v8 = vcombine.low %v163_v30, %v167_v33  ;;  %v6838_v37 = vld [vmem:[%s8279_s0 + $0x24] ss:$16 sps:$4 sm:$0xff]   ;;  %v5537_v42 = vcombine.low %v124_v3, %v128_v4  ;;  %v236_v30 = vld [vmem:[#allocation2 + $0x4d8] sm:$0xff]  ;;  %v6850_v33 = vld [vmem:[%s8279_s0 + $0x20] ss:$16 sps:$4 sm:$0xff]  }
  0xce   :  { %2406 = vmatprep.subr.bf16.mxu1 %v5720_v19  ;;  %v244_v19 = vld [vmem:[#allocation2 + $0x518] sm:$0xff] }
  0xcf   :  { %2294 = vmatpush2.bf16.msra.mxu0 %v5591_v46  ;;  %v112_v46 = vld [vmem:[#allocation2 + $0xf8] sm:$0xff] }
  0xd0   :  { %2295 = vmatprep.subr.bf16.mxu0 %v5584_v27  ;;  %v5530_v27 = vcombine.high %v116_v13, %v120_v16  ;;  %v6856_v57 = vld [vmem:[%s8279_s0 + $0x28] ss:$16 sps:$4 sm:$0xff]   ;;  %v5522_v39 = vcombine.high %v108_v24, %v112_v46 }
  0xd1   :  { %2407 = vmatpush2.bf16.msra.mxu1 %v5719_v26  ;;  %v5665_v26 = vcombine.low %v252_v25, %v256_v20  ;;  %v204_v4 = vld [vmem:[#allocation2 + $0x3d8] sm:$0xff] }
  0xd2   :  { %2408 = vmatprep.subr.bf16.mxu1 %v5712_v28  ;;  %2138 = vmatmul.mubr.bf16.gmra.mxu0 %v6744_v22  ;;  %v279_v22 = vld [vmem:[#allocation2 + $0x630] sm:$0xff]  ;;  %v5658_v28 = vcombine.high %v244_v19, %v248_v35  ;;  %v336_v25 = vld [vmem:[#allocation2 + $0x7f8] sm:$0xff] }
  0xd3   :  { %2296 = vmatpush2.bf16.msra.mxu0 %v5583_v43  ;;  %2147 = vmatprep.mubr.bf16.mxu0 %v6756_v36  ;;  %v5688_v59 = vcombine.high %v275_v56, %v279_v22  ;;  %v268_v36 = vld [vmem:[#allocation2 + $0x5d8] sm:$0xff]  ;;  %v5687_v58 = vcombine.low %v275_v56, %v279_v22  ;;  %v5529_v43 = vcombine.low %v116_v13, %v120_v16 }
  0xd4   :  { %2251 = vmatmul.mubr.bf16.gmra.mxu1 %v6750_v29  ;;  %2297 = vmatprep.subr.bf16.mxu0 %v5576_v34  ;;  %v5695_v29 = vcombine.low %v283_v5, %v287_v45  ;;  %v5682_v12 = vcombine.high %v268_v36, %v272_v54  ;;  %v5681_v6 = vcombine.low %v268_v36, %v272_v54  ;;  %v104_v34 = vld [vmem:[#allocation2 + $0xb8] sm:$0xff]  ;;  %v6886_v54 = vld [vmem:[%s8279_s0 + $0x64] ss:$16 sps:$4 sm:$0xff]  }
  0xd5   :  { %2409 = vmatpush2.bf16.msra.mxu1 %v5711_v0  ;;  %2260 = vmatprep.mubr.bf16.mxu1 %v6761_v41  ;;  %v5559_v41 = vcombine.low %v147_v48, %v151_v49  ;;  %v100_v0 = vld [vmem:[#allocation2 + $0x98] sm:$0xff]  ;;  %v5650_v5 = vcombine.high %v236_v30, %v240_v40  ;;  %v5649_v49 = vcombine.low %v236_v30, %v240_v40 }
  0xd6   :  { %2410 = vmatprep.subr.bf16.mxu1 %v5704_v38  ;;  %v5657_v38 = vcombine.low %v244_v19, %v248_v35  ;;  %v228_v45 = vld [vmem:[#allocation2 + $0x498] sm:$0xff]  ;;  %v5514_v56 = vcombine.high %v100_v0, %v104_v34  ;;  %v5513_v1 = vcombine.low %v100_v0, %v104_v34 }
  0xd7   :  { %2298 = vmatpush2.bf16.msra.mxu0 %v5575_v8  ;;  %v6868_v8 = vld [vmem:[%s8279_s0 + $0x4c] ss:$16 sps:$4 sm:$0xff]   ;;  %v6904_v20 = vld [vmem:[%s8279_s0 + $0x68] ss:$16 sps:$4 sm:$0xff]  }
  0xd8   :  { %2299 = vmatprep.subr.bf16.mxu0 %v5568_v47  ;;  %v5521_v47 = vcombine.low %v108_v24, %v112_v46  ;;  %v96_v48 = vld [vmem:[#allocation2 + $0x78] sm:$0xff] }
  0xd9   :  { %2411 = vmatpush2.bf16.msra.mxu1 %v5703_v52  ;;  %v232_v52 = vld [vmem:[#allocation2 + $0x4b8] sm:$0xff] }
  0xda   :  { %2412 = vmatprep.subr.bf16.mxu1 %v5696_v55  ;;  %2148 = vmatmul.mubr.bf16.gmra.mxu0 %v6768_v53  ;;  %v132_v53 = vld [vmem:[#allocation2 + $0x198] sm:$0xff]  ;;  %v5642_v22 = vcombine.high %v228_v45, %v232_v52  ;;  %v5641_v51 = vcombine.low %v228_v45, %v232_v52  ;;  %v6934_v52 = vld [vmem:[%s8279_s0 + $0xa4] ss:$16 sps:$4 sm:$0xff]  }
  0xdb   :  { %2300 = vmatpush2.bf16.msra.mxu0 %v5567_v50  ;;  %2303 = vmatprep.mubr.bf16.mxu0 %v6814_v61  ;;  %v5546_v21 = vcombine.high %v132_v53, %v136_v10  ;;  %v5545_v11 = vcombine.low %v132_v53, %v136_v10  ;;  %v92_v55 = vld [vmem:[#allocation2 + $0x58] sm:$0xff] }
  0xdc   :  { %2261 = vmatmul.mubr.bf16.gmra.mxu1 %v6774_v63  ;;  %2301 = vmatprep.subr.bf16.mxu0 %v5560_v62  ;;  %v6820_v63 = vld [vmem:[%s8279_s0 + $0xc] ss:$16 sps:$4 sm:$0xff]   ;;  %v5506_v36 = vcombine.high %v92_v55, %v96_v48  ;;  %v5505_v2 = vcombine.low %v92_v55, %v96_v48 }
  0xdd   :  { %2413 = vmatpush2.bf16.msra.mxu1 %v5695_v29  ;;  %2416 = vmatprep.mubr.bf16.mxu1 %v6820_v63  ;;  %v220_v50 = vld [vmem:[#allocation2 + $0x458] sm:$0xff]  ;;  %v6874_v29 = vld [vmem:[%s8279_s0 + $0x40] ss:$16 sps:$4 sm:$0xff]  }
  0xde   :  { %2414 = vmatprep.subr.bf16.mxu1 %v5688_v59  ;;  %v224_v62 = vld [vmem:[#allocation2 + $0x478] sm:$0xff] }
  0xdf   :  { %2302 = vmatpush2.bf16.msra.mxu0 %v5559_v41  ;;  %v6880_v59 = vld [vmem:[%s8279_s0 + $0x48] ss:$16 sps:$4 sm:$0xff]   ;;  %v5634_v41 = vcombine.high %v220_v50, %v224_v62  ;;  %v5633_v14 = vcombine.low %v220_v50, %v224_v62  ;;  %v6916_v35 = vld [vmem:[%s8279_s0 + $0x8c] ss:$16 sps:$4 sm:$0xff]  }
  0xe0   :  { %2497 = vmatprep.subr.bf16.mxu0 %v5554_v60  ;;  %v88_v60 = vld [vmem:[#allocation2 + $0x38] sm:$0xff] }
  0xe1   :  { %2415 = vmatpush2.bf16.msra.mxu1 %v5687_v58  ;;  %v84_v58 = vld [vmem:[#allocation2 + $0x18] sm:$0xff] }
  0xe2   :  { %2610 = vmatprep.subr.bf16.mxu1 %v5682_v12  ;;  %2304 = vmatmul.mubr.bf16.vlgmr.msra.gmra.mxu0 %v6826_v9  ;;  %v6892_v12 = vld [vmem:[%s8279_s0 + $0x6c] ss:$16 sps:$4 sm:$0xff]  }
  0xe3   :  { %2498 = vmatpush1.bf16.msra.mxu0 %v5553_v15  ;;  %2313 = vmatprep.mubr.bf16.mxu0 %v6838_v37  ;;  %v212_v53 = vld [vmem:[#allocation2 + $0x418] sm:$0xff]  ;;  %v5498_v15 = vcombine.high %v84_v58, %v88_v60 }
  0xe4   :  { %2417 = vmatmul.mubr.bf16.vlgmr.msra.gmra.mxu1 %v6832_v23  ;;  %2499 = vmatprep.subr.bf16.mxu0 %v5546_v21  ;;  %v216_v10 = vld [vmem:[#allocation2 + $0x438] sm:$0xff]  ;;  %v6898_v21 = vld [vmem:[%s8279_s0 + $0x60] ss:$16 sps:$4 sm:$0xff]  }
  0xe5   :  { %2611 = vmatpush1.bf16.msra.mxu1 %v5681_v6  ;;  %2426 = vmatprep.mubr.bf16.mxu1 %v6844_v32  ;;  %v5626_v3 = vcombine.high %v212_v53, %v216_v10  ;;  %v208_v6 = vld [vmem:[#allocation2 + $0x3f8] sm:$0xff]  ;;  %v5625_v13 = vcombine.low %v212_v53, %v216_v10 }
  0xe6   :  { %2612 = vmatprep.subr.bf16.mxu1 %v5674_v7  ;;  %v332_v7 = vld [vmem:[#allocation2 + $0x7d8] sm:$0xff]  ;;  %v5618_v16 = vcombine.high %v204_v4, %v208_v6  ;;  %v5617_v46 = vcombine.low %v204_v4, %v208_v6 }
  0xe7   :  { %2500 = vmatpush1.bf16.msra.mxu0 %v5545_v11  ;;  %v5497_v11 = vcombine.low %v84_v58, %v88_v60  ;;  %v200_v19 = vld [vmem:[#allocation2 + $0x3b8] sm:$0xff]  ;;  %v6946_v58 = vld [vmem:[%s8279_s0 + $0xa0] ss:$16 sps:$4 sm:$0xff]  }
  0xe8   :  { %2501 = vmatprep.subr.bf16.mxu0 %v5538_v17  ;;  %v5746_v17 = vcombine.high %v332_v7, %v336_v25  ;;  %v328_v24 = vld [vmem:[#allocation2 + $0x7b8] sm:$0xff] }
  0xe9   :  { %2613 = vmatpush1.bf16.msra.mxu1 %v5673_v31  ;;  %v6910_v31 = vld [vmem:[%s8279_s0 + $0x84] ss:$16 sps:$4 sm:$0xff]   ;;  %v188_v30 = vld [vmem:[#allocation2 + $0x358] sm:$0xff] }
  0xea   :  { %2614 = vmatprep.subr.bf16.mxu1 %v5666_v18  ;;  %2314 = vmatmul.mubr.bf16.gmra.mxu0 %v6850_v33  ;;  %v196_v18 = vld [vmem:[#allocation2 + $0x398] sm:$0xff] }
  0xeb   :  { %2502 = vmatpush1.bf16.msra.mxu0 %v5537_v42  ;;  %2323 = vmatprep.mubr.bf16.mxu0 %v6862_v44  ;;  %v324_v42 = vld [vmem:[#allocation2 + $0x798] sm:$0xff] }
  0xec   :  { %2427 = vmatmul.mubr.bf16.gmra.mxu1 %v6856_v57  ;;  %2503 = vmatprep.subr.bf16.mxu0 %v5530_v27  ;;  %v5610_v27 = vcombine.high %v196_v18, %v200_v19  ;;  %v192_v40 = vld [vmem:[#allocation2 + $0x378] sm:$0xff] }
  0xed   :  { %2615 = vmatpush1.bf16.msra.mxu1 %v5665_v26  ;;  %2436 = vmatprep.mubr.bf16.mxu1 %v6868_v8  ;;  %v5745_v26 = vcombine.low %v332_v7, %v336_v25  ;;  %v316_v0 = vld [vmem:[#allocation2 + $0x758] sm:$0xff]  ;;  %v5602_v45 = vcombine.high %v188_v30, %v192_v40  ;;  %v5601_v50 = vcombine.low %v188_v30, %v192_v40 }
  0xee   :  { %2616 = vmatprep.subr.bf16.mxu1 %v5658_v28  ;;  %v5738_v28 = vcombine.high %v324_v42, %v328_v24  ;;  %v320_v34 = vld [vmem:[#allocation2 + $0x778] sm:$0xff] }
  0xef   :  { %2504 = vmatpush1.bf16.msra.mxu0 %v5529_v43  ;;  %v6922_v43 = vld [vmem:[%s8279_s0 + $0x80] ss:$16 sps:$4 sm:$0xff]   ;;  %v180_v55 = vld [vmem:[#allocation2 + $0x318] sm:$0xff]  ;;  %v5729_v62 = vcombine.low %v316_v0, %v320_v34 }
  0xf0   :  { %2505 = vmatprep.subr.bf16.mxu0 %v5522_v39  ;;  %v5609_v39 = vcombine.low %v196_v18, %v200_v19  ;;  %v184_v48 = vld [vmem:[#allocation2 + $0x338] sm:$0xff] }
  0xf1   :  { %2617 = vmatpush1.bf16.msra.mxu1 %v5657_v38  ;;  %v6928_v38 = vld [vmem:[%s8279_s0 + $0x88] ss:$16 sps:$4 sm:$0xff]   ;;  %v6964_v25 = vld [vmem:[%s8279_s0 + $0xcc] ss:$16 sps:$4 sm:$0xff]  }
  0xf2   :  { %2618 = vmatprep.subr.bf16.mxu1 %v5650_v5  ;;  %2324 = vmatmul.mubr.bf16.gmra.mxu0 %v6874_v29  ;;  %v5737_v5 = vcombine.low %v324_v42, %v328_v24  ;;  %v300_v60 = vld [vmem:[#allocation2 + $0x6d8] sm:$0xff] }
  0xf3   :  { %2506 = vmatpush1.bf16.msra.mxu0 %v5521_v47  ;;  %2333 = vmatprep.mubr.bf16.mxu0 %v6886_v54  ;;  %v5730_v47 = vcombine.high %v316_v0, %v320_v34  ;;  %v304_v53 = vld [vmem:[#allocation2 + $0x6f8] sm:$0xff]  ;;  %v6982_v34 = vld [vmem:[%s8279_s0 + $0xe4] ss:$16 sps:$4 sm:$0xff]  }
  0xf4   :  { %2437 = vmatmul.mubr.bf16.gmra.mxu1 %v6880_v59  ;;  %2507 = vmatprep.subr.bf16.mxu0 %v5514_v56  ;;  %v308_v56 = vld [vmem:[#allocation2 + $0x718] sm:$0xff]  ;;  %v5714_v4 = vcombine.high %v300_v60, %v304_v53 }
  0xf5   :  { %2619 = vmatpush1.bf16.msra.mxu1 %v5649_v49  ;;  %2446 = vmatprep.mubr.bf16.mxu1 %v6892_v12  ;;  %v6940_v49 = vld [vmem:[%s8279_s0 + $0xac] ss:$16 sps:$4 sm:$0xff]   ;;  %v6952_v10 = vld [vmem:[%s8279_s0 + $0xa8] ss:$16 sps:$4 sm:$0xff]  }
  0xf6   :  { %2620 = vmatprep.subr.bf16.mxu1 %v5642_v22  ;;  %v312_v22 = vld [vmem:[#allocation2 + $0x738] sm:$0xff] }
  0xf7   :  { %2508 = vmatpush1.bf16.msra.mxu0 %v5513_v1  ;;  %v5594_v1 = vcombine.high %v180_v55, %v184_v48  ;;  %v164_v6 = vld [vmem:[#allocation2 + $0x298] sm:$0xff] }
  0xf8   :  { %2509 = vmatprep.subr.bf16.mxu0 %v5506_v36  ;;  %v172_v36 = vld [vmem:[#allocation2 + $0x2d8] sm:$0xff] }
  0xf9   :  { %2621 = vmatpush1.bf16.msra.mxu1 %v5641_v51  ;;  %v5722_v51 = vcombine.high %v308_v56, %v312_v22  ;;  %v168_v7 = vld [vmem:[#allocation2 + $0x2b8] sm:$0xff] }
  0xfa   :  { %2622 = vmatprep.subr.bf16.mxu1 %v5634_v41  ;;  %2334 = vmatmul.mubr.bf16.gmra.mxu0 %v6898_v21  ;;  %v176_v41 = vld [vmem:[#allocation2 + $0x2f8] sm:$0xff]  ;;  %v5578_v18 = vcombine.high %v164_v6, %v168_v7  ;;  %v5577_v30 = vcombine.low %v164_v6, %v168_v7  ;;  %v6081_v6 = vld [vmem:[#allocation5 + $0x2c4] ss:$16 sps:$4 sm:$0xff]  }
  0xfb   :  { %2510 = vmatpush1.bf16.msra.mxu0 %v5505_v2  ;;  %2343 = vmatprep.mubr.bf16.mxu0 %v6910_v31  ;;  %v5593_v2 = vcombine.low %v180_v55, %v184_v48  ;;  %v156_v42 = vld [vmem:[#allocation2 + $0x258] sm:$0xff] }
  0xfc   :  { %2447 = vmatmul.mubr.bf16.gmra.mxu1 %v6904_v20  ;;  %2511 = vmatprep.subr.bf16.mxu0 %v5498_v15  ;;  %v5586_v15 = vcombine.high %v172_v36, %v176_v41  ;;  %v160_v24 = vld [vmem:[#allocation2 + $0x278] sm:$0xff] }
  0xfd   :  { %2623 = vmatpush1.bf16.msra.mxu1 %v5633_v14  ;;  %2456 = vmatprep.mubr.bf16.mxu1 %v6916_v35  ;;  %v5721_v14 = vcombine.low %v308_v56, %v312_v22  ;;  %v5570_v0 = vcombine.high %v156_v42, %v160_v24  ;;  %v276_v55 = vld [vmem:[#allocation2 + $0x618] sm:$0xff]  ;;  %v5569_v56 = vcombine.low %v156_v42, %v160_v24  ;;  %v6069_v42 = vld [vmem:[#allocation5 + $0x84] ss:$16 sps:$4 sm:$0xff]   ;;  %v6085_v24 = vld [vmem:[#allocation5 + $0x2a0] ss:$16 sps:$4 sm:$0xff]  }
  0xfe   :  { %2624 = vmatprep.subr.bf16.mxu1 %v5626_v3  ;;  %v6958_v3 = vld [vmem:[%s8279_s0 + $0xc4] ss:$16 sps:$4 sm:$0xff]   ;;  %v280_v48 = vld [vmem:[#allocation2 + $0x638] sm:$0xff] }
  0xff   :  { %2512 = vmatpush1.bf16.msra.mxu0 %v5497_v11  ;;  %v292_v11 = vld [vmem:[#allocation2 + $0x698] sm:$0xff] }
 0x100   :  { %2513 = vmatprep.subr.bf16.mxu0 %v5618_v16  ;;  %v5585_v16 = vcombine.low %v172_v36, %v176_v41  ;;  %v5689_v41 = vcombine.low %v276_v55, %v280_v48 }
 0x101   :  { %2625 = vmatpush1.bf16.msra.mxu1 %v5625_v13  ;;  %v296_v13 = vld [vmem:[#allocation2 + $0x6b8] sm:$0xff] }
 0x102   :  { %2626 = vmatprep.subr.bf16.mxu1 %v5746_v17  ;;  %2344 = vmatmul.mubr.bf16.gmra.mxu0 %v6922_v43  ;;  %v5713_v17 = vcombine.low %v300_v60, %v304_v53  ;;  %v5706_v19 = vcombine.high %v292_v11, %v296_v13  ;;  %v5705_v40 = vcombine.low %v292_v11, %v296_v13  ;;  %v6060_v60 = vld [vmem:[#allocation5 + $0xe4] ss:$16 sps:$4 sm:$0xff]  }
 0x103   :  { %2514 = vmatpush2.bf16.msra.mxu0 %v5617_v46  ;;  %2353 = vmatprep.mubr.bf16.mxu0 %v6934_v52  ;;  %v6970_v46 = vld [vmem:[%s8279_s0 + $0xc0] ss:$16 sps:$4 sm:$0xff]   ;;  %v6075_v53 = vld [vmem:[#allocation5 + $0x2e4] ss:$16 sps:$4 sm:$0xff]  }
 0x104   :  { %2457 = vmatmul.mubr.bf16.gmra.mxu1 %v6928_v38  ;;  %2515 = vmatprep.subr.bf16.mxu0 %v5610_v27  ;;  %v288_v27 = vld [vmem:[#allocation2 + $0x678] sm:$0xff] }
 0x105   :  { %2627 = vmatpush2.bf16.msra.mxu1 %v5745_v26  ;;  %2466 = vmatprep.mubr.bf16.mxu1 %v6940_v49  ;;  %v284_v26 = vld [vmem:[#allocation2 + $0x658] sm:$0xff] }
 0x106   :  { %2628 = vmatprep.subr.bf16.mxu1 %v5738_v28  ;;  %v6976_v28 = vld [vmem:[%s8279_s0 + $0xc8] ss:$16 sps:$4 sm:$0xff]   ;;  %v5697_v22 = vcombine.low %v284_v26, %v288_v27 }
 0x107   :  { %2516 = vmatpush2.bf16.msra.mxu0 %v5609_v39  ;;  %v5698_v39 = vcombine.high %v284_v26, %v288_v27 }
 0x108   :  { %2517 = vmatprep.subr.bf16.mxu0 %v5602_v45  ;;  %v152_v45 = vld [vmem:[#allocation2 + $0x238] sm:$0xff] }
 0x109   :  { %2629 = vmatpush2.bf16.msra.mxu1 %v5737_v5  ;;  %v148_v5 = vld [vmem:[#allocation2 + $0x218] sm:$0xff] }
 0x10a   :  { %2630 = vmatprep.subr.bf16.mxu1 %v5730_v47  ;;  %2354 = vmatmul.mubr.bf16.gmra.mxu0 %v6946_v58  ;;  %v6988_v47 = vld [vmem:[%s8279_s0 + $0xec] ss:$16 sps:$4 sm:$0xff]   ;;  %v5561_v36 = vcombine.low %v148_v5, %v152_v45 }
 0x10b   :  { %2518 = vmatpush2.bf16.msra.mxu0 %v5601_v50  ;;  %2363 = vmatprep.mubr.bf16.mxu0 %v6958_v3  ;;  %v5562_v50 = vcombine.high %v148_v5, %v152_v45  ;;  %v6099_v45 = vld [vmem:[#allocation5 + $0x264] ss:$16 sps:$4 sm:$0xff]  }
 0x10c   :  { %2467 = vmatmul.mubr.bf16.gmra.mxu1 %v6952_v10  ;;  %2519 = vmatprep.subr.bf16.mxu0 %v5594_v1  ;;  %v6994_v1 = vld [vmem:[%s8279_s0 + $0xe0] ss:$16 sps:$4 sm:$0xff]  }
 0x10d   :  { %2631 = vmatpush2.bf16.msra.mxu1 %v5729_v62  ;;  %2476 = vmatprep.mubr.bf16.mxu1 %v6964_v25  ;;  %v5690_v62 = vcombine.high %v276_v55, %v280_v48 }
 0x10e   :  { %2632 = vmatprep.subr.bf16.mxu1 %v5722_v51  ;;  %v7000_v51 = vld [vmem:[%s8279_s0 + $0xe8] ss:$16 sps:$4 sm:$0xff]  }
 0x10f   :  { %2520 = vmatpush2.bf16.msra.mxu0 %v5593_v2  ;;  %v6058_v2 = vld [vmem:[#allocation5 + $0xe0] ss:$16 sps:$4 sm:$0xff]  }
 0x110   :  { %2521 = vmatprep.subr.bf16.mxu0 %v5586_v15  ;;  %v6073_v15 = vld [vmem:[#allocation5 + $0x2e0] ss:$16 sps:$4 sm:$0xff]  }
 0x111   :  { %2633 = vmatpush2.bf16.msra.mxu1 %v5721_v14  ;;  %v6063_v14 = vld [vmem:[#allocation5 + $0xc4] ss:$16 sps:$4 sm:$0xff]  }
 0x112   :  { %2634 = vmatprep.subr.bf16.mxu1 %v5714_v4  ;;  %2364 = vmatmul.mubr.bf16.gmra.mxu0 %v6970_v46 }
 0x113   :  { %2522 = vmatpush2.bf16.msra.mxu0 %v5585_v16  ;;  %2373 = vmatprep.mubr.bf16.mxu0 %v6982_v34  ;;  %v6079_v16 = vld [vmem:[#allocation5 + $0x2c0] ss:$16 sps:$4 sm:$0xff]  }
 0x114   :  { %2477 = vmatmul.mubr.bf16.gmra.mxu1 %v6976_v28  ;;  %2523 = vmatprep.subr.bf16.mxu0 %v5578_v18 }
 0x115   :  { %2635 = vmatpush2.bf16.msra.mxu1 %v5713_v17  ;;  %2486 = vmatprep.mubr.bf16.mxu1 %v6988_v47  ;;  %v6087_v17 = vld [vmem:[#allocation5 + $0x2a4] ss:$16 sps:$4 sm:$0xff]  }
 0x116   :  { %2636 = vmatprep.subr.bf16.mxu1 %v5706_v19 }
 0x117   :  { %2524 = vmatpush2.bf16.msra.mxu0 %v5577_v30  ;;  %v6067_v30 = vld [vmem:[#allocation5 + $0x80] ss:$16 sps:$4 sm:$0xff]  }
 0x118   :  { %2525 = vmatprep.subr.bf16.mxu0 %v5570_v0  ;;  %v6072_v0 = vld [vmem:[#allocation5 + $0x64] ss:$16 sps:$4 sm:$0xff]  }
 0x119   :  { %2637 = vmatpush2.bf16.msra.mxu1 %v5705_v40 }
 0x11a   :  { %2638 = vmatprep.subr.bf16.mxu1 %v5698_v39  ;;  %2374 = vmatmul.mubr.bf16.gmra.mxu0 %v6994_v1 }
 0x11b   :  { %2526 = vmatpush2.bf16.msra.mxu0 %v5569_v56  ;;  %2529 = vmatprep.mubr.bf16.mxu0 %v6814_v61  ;;  %v6061_v61 = vld [vmem:[#allocation5 + $0xc0] ss:$16 sps:$4 sm:$0xff]   ;;  %v6078_v56 = vld [vmem:[#allocation5 + $0x44] ss:$16 sps:$4 sm:$0xff]  }
 0x11c   :  { %2487 = vmatmul.mubr.bf16.gmra.mxu1 %v7000_v51  ;;  %2527 = vmatprep.subr.bf16.mxu0 %v5562_v50 }
 0x11d   :  { %2639 = vmatpush2.bf16.msra.mxu1 %v5697_v22  ;;  %2642 = vmatprep.mubr.bf16.mxu1 %v6820_v63  ;;  %v6066_v63 = vld [vmem:[#allocation5 + $0xa4] ss:$16 sps:$4 sm:$0xff]   ;;  %v6097_v22 = vld [vmem:[#allocation5 + $0x260] ss:$16 sps:$4 sm:$0xff]  }
 0x11e   :  { %2640 = vmatprep.subr.bf16.mxu1 %v5690_v62 }
 0x11f   :  { %2528 = vmatpush2.bf16.msra.mxu0 %v5561_v36  ;;  %v6076_v36 = vld [vmem:[#allocation5 + $0x40] ss:$16 sps:$4 sm:$0xff]  }
 0x120   :  { %4473 = vmatprep.subr.bf16.mxu0 %v6060_v60  ;;  %v6084_v60 = vld [vmem:[#allocation5 + $0x24] ss:$16 sps:$4 sm:$0xff]  }
 0x121   :  { %2641 = vmatpush2.bf16.msra.mxu1 %v5689_v41 }
 0x122   :  { %4586 = vmatprep.subr.bf16.mxu1 %v6075_v53  ;;  %v7005_v4 = vpop.f32.mrf.mxu0  ;;  %2530 = vmatmul.mubr.bf16.vlgmr.msra.gmra.mxu0 %v6826_v9 }
 0x123   :  { %4474 = vmatpush1.bf16.msra.mxu0 %v6058_v2  ;;  %2539 = vmatprep.mubr.bf16.mxu0 %v6838_v37 }
 0x124   :  { %v7008_v7 = vpop.f32.mrf.mxu1  ;;  %2643 = vmatmul.mubr.bf16.vlgmr.msra.gmra.mxu1 %v6832_v23  ;;  %v7011_v11 = vpop.f32.mrf.mxu0  ;;  %4475 = vmatprep.subr.bf16.mxu0 %v6063_v14  ;;  %v6064_v23 = vld [vmem:[#allocation5 + $0xa0] ss:$16 sps:$4 sm:$0xff]   ;;  %v6111_v14 = vld [vmem:[#allocation5 + $0x224] ss:$16 sps:$4 sm:$0xff]  }
 0x125   :  { %2652 = vmatprep.mubr.bf16.mxu1 %v6844_v32  ;;  %4587 = vmatpush1.bf16.msra.mxu1 %v6073_v15  ;;  %v6093_v32 = vld [vmem:[#allocation5 + $0x284] ss:$16 sps:$4 sm:$0xff]  }
 0x126   :  { %v7014_v13 = vpop.f32.mrf.mxu1  ;;  %v7017_v9 = vpop.f32.mrf.mxu0  ;;  %4588 = vmatprep.subr.bf16.mxu1 %v6081_v6 }
 0x127   :  { %4476 = vmatpush1.bf16.msra.mxu0 %v6061_v61  ;;  %v6090_v61 = vld [vmem:[#allocation5 + $0x4] ss:$16 sps:$4 sm:$0xff]  }
 0x128   :  { %v7019_v18 = vpop.f32.mrf.mxu1  ;;  %v7021_v19 = vpop.f32.mrf.mxu0  ;;  %4477 = vmatprep.subr.bf16.mxu0 %v6066_v63  ;;  %v6109_v63 = vld [vmem:[#allocation5 + $0x220] ss:$16 sps:$4 sm:$0xff]  }
 0x129   :  { %4589 = vmatpush1.bf16.msra.mxu1 %v6079_v16 }
 0x12a   :  { %v7023_v37 = vpop.f32.mrf.mxu1  ;;  %v7025_v26 = vpop.f32.mrf.mxu0  ;;  %2540 = vmatmul.mubr.bf16.gmra.mxu0 %v6850_v33  ;;  %4590 = vmatprep.subr.bf16.mxu1 %v6087_v17  ;;  %v6091_v33 = vld [vmem:[#allocation5 + $0x280] ss:$16 sps:$4 sm:$0xff]  }
 0x12b   :  { %4478 = vmatpush1.bf16.msra.mxu0 %v6064_v23  ;;  %2549 = vmatprep.mubr.bf16.mxu0 %v6862_v44  ;;  %v6088_v23 = vld [vmem:[#allocation5] ss:$16 sps:$4 sm:$0xff]  }
 0x12c   :  { %v7028_v27 = vpop.f32.mrf.mxu1  ;;  %2653 = vmatmul.mubr.bf16.gmra.mxu1 %v6856_v57  ;;  %v7031_v40 = vpop.f32.mrf.mxu0  ;;  %4479 = vmatprep.subr.bf16.mxu0 %v6069_v42  ;;  %v6070_v57 = vld [vmem:[#allocation5 + $0x60] ss:$16 sps:$4 sm:$0xff]  }
 0x12d   :  { %2662 = vmatprep.mubr.bf16.mxu1 %v6868_v8  ;;  %4591 = vmatpush1.bf16.msra.mxu1 %v6085_v24  ;;  %v6105_v8 = vld [vmem:[#allocation5 + $0x244] ss:$16 sps:$4 sm:$0xff]  }
 0x12e   :  { %v7034_v39 = vpop.f32.mrf.mxu1  ;;  %v7037_v5 = vpop.f32.mrf.mxu0  ;;  %4592 = vmatprep.subr.bf16.mxu1 %v6093_v32  ;;  %v6096_v24 = vld [vmem:[#allocation5 + $0x1e4] ss:$16 sps:$4 sm:$0xff]  }
 0x12f   :  { %4480 = vmatpush1.bf16.msra.mxu0 %v6067_v30 }
 0x130   :  { %v7039_v55 = vpop.f32.mrf.mxu1  ;;  %v7041_v48 = vpop.f32.mrf.mxu0  ;;  %4481 = vmatprep.subr.bf16.mxu0 %v6072_v0  ;;  %v6123_v0 = vld [vmem:[#allocation5 + $0x3e4] ss:$16 sps:$4 sm:$0xff]  }
 0x131   :  { %4593 = vmatpush1.bf16.msra.mxu1 %v6091_v33 }
 0x132   :  { %v7043_v44 = vpop.f32.mrf.mxu1  ;;  %v7045_v50 = vpop.f32.mrf.mxu0  ;;  %2550 = vmatmul.mubr.bf16.gmra.mxu0 %v6874_v29  ;;  %4594 = vmatprep.subr.bf16.mxu1 %v6099_v45  ;;  %v6103_v29 = vld [vmem:[#allocation5 + $0x240] ss:$16 sps:$4 sm:$0xff]  }
 0x133   :  { %4482 = vmatpush1.bf16.msra.mxu0 %v6070_v57  ;;  %2559 = vmatprep.mubr.bf16.mxu0 %v6886_v54  ;;  %v6102_v57 = vld [vmem:[#allocation5 + $0x1c4] ss:$16 sps:$4 sm:$0xff]  }
 0x134   :  { %v7048_v62 = vpop.f32.mrf.mxu1  ;;  %2663 = vmatmul.mubr.bf16.gmra.mxu1 %v6880_v59  ;;  %v7051_v41 = vpop.f32.mrf.mxu0  ;;  %4483 = vmatprep.subr.bf16.mxu0 %v6078_v56  ;;  %v6082_v59 = vld [vmem:[#allocation5 + $0x20] ss:$16 sps:$4 sm:$0xff]  }
 0x135   :  { %2672 = vmatprep.mubr.bf16.mxu1 %v6892_v12  ;;  %4595 = vmatpush1.bf16.msra.mxu1 %v6097_v22  ;;  %v6117_v12 = vld [vmem:[#allocation5 + $0x204] ss:$16 sps:$4 sm:$0xff]   ;;  %v6121_v56 = vld [vmem:[#allocation5 + $0x3e0] ss:$16 sps:$4 sm:$0xff]   ;;  %v339_v22 = vlaneseq }
 0x136   :  { %v7054_v53 = vpop.f32.mrf.mxu1  ;;  %v7057_v2 = vpop.f32.mrf.mxu0  ;;  %4596 = vmatprep.subr.bf16.mxu1 %v6105_v8  ;;  %v6129_v8 = vld [vmem:[#allocation5 + $0x3c4] ss:$16 sps:$4 sm:$0xff]  }
 0x137   :  { %4484 = vmatpush1.bf16.msra.mxu0 %v6076_v36 }
 0x138   :  { %v7059_v15 = vpop.f32.mrf.mxu1  ;;  %v7061_v6 = vpop.f32.mrf.mxu0  ;;  %4485 = vmatprep.subr.bf16.mxu0 %v6084_v60  ;;  %v6100_v60 = vld [vmem:[#allocation5 + $0x1c0] ss:$16 sps:$4 sm:$0xff]  }
 0x139   :  { %4597 = vmatpush1.bf16.msra.mxu1 %v6103_v29 }
 0x13a   :  { %v7063_v54 = vpop.f32.mrf.mxu1  ;;  %v7065_v16 = vpop.f32.mrf.mxu0  ;;  %2560 = vmatmul.mubr.bf16.gmra.mxu0 %v6898_v21  ;;  %4598 = vmatprep.subr.bf16.mxu1 %v6111_v14  ;;  %v6115_v21 = vld [vmem:[#allocation5 + $0x200] ss:$16 sps:$4 sm:$0xff]   ;;  %v6108_v14 = vld [vmem:[#allocation5 + $0x1a4] ss:$16 sps:$4 sm:$0xff]  }
 0x13b   :  { %4486 = vmatpush1.bf16.msra.mxu0 %v6082_v59  ;;  %2569 = vmatprep.mubr.bf16.mxu0 %v6910_v31 }
 0x13c   :  { %v7068_v17 = vpop.f32.mrf.mxu1  ;;  %2673 = vmatmul.mubr.bf16.gmra.mxu1 %v6904_v20  ;;  %v7071_v42 = vpop.f32.mrf.mxu0  ;;  %4487 = vmatprep.subr.bf16.mxu0 %v6090_v61  ;;  %v6094_v20 = vld [vmem:[#allocation5 + $0x1e0] ss:$16 sps:$4 sm:$0xff]   ;;  %v7097_v61 = vshrl.u32 %v339_v22, 7 }
 0x13d   :  { %2682 = vmatprep.mubr.bf16.mxu1 %v6916_v35  ;;  %4599 = vmatpush1.bf16.msra.mxu1 %v6109_v63 }
 0x13e   :  { %v7074_v32 = vpop.f32.mrf.mxu1  ;;  %v7077_v30 = vpop.f32.mrf.mxu0  ;;  %4600 = vmatprep.subr.bf16.mxu1 %v6117_v12  ;;  %8304 = vst [vmem:[#allocation11_spill] sm:$0xff] %v7097_v61 }
 0x13f   :  { %4488 = vmatpush1.bf16.msra.mxu0 %v6088_v23  ;;  %v6106_v23 = vld [vmem:[#allocation5 + $0x1a0] ss:$16 sps:$4 sm:$0xff]  }
 0x140   :  { %v7079_v33 = vpop.f32.mrf.mxu1  ;;  %v7081_v45 = vpop.f32.mrf.mxu0  ;;  %4489 = vmatprep.subr.bf16.mxu0 %v6096_v24  ;;  %v8285_v24 = vsub.s32 1, %v7097_v61 }
 0x141   :  { %4601 = vmatpush1.bf16.msra.mxu1 %v6115_v21  ;;  %v6114_v21 = vld [vmem:[#allocation5 + $0x184] ss:$16 sps:$4 sm:$0xff]  }
 0x142   :  { %v7083_v31 = vpop.f32.mrf.mxu1  ;;  %v7085_v35 = vpop.f32.mrf.mxu0  ;;  %2570 = vmatmul.mubr.bf16.gmra.mxu0 %v6922_v43  ;;  %4602 = vmatprep.subr.bf16.mxu1 %v6123_v0  ;;  %v6127_v43 = vld [vmem:[#allocation5 + $0x3c0] ss:$16 sps:$4 sm:$0xff]  }
 0x143   :  { %4490 = vmatpush2.bf16.msra.mxu0 %v6094_v20  ;;  %2579 = vmatprep.mubr.bf16.mxu0 %v6934_v52 }
 0x144   :  { %v7088_v36 = vpop.f32.mrf.mxu1  ;;  %2683 = vmatmul.mubr.bf16.gmra.mxu1 %v6928_v38  ;;  %v7091_v29 = vpop.f32.mrf.mxu0  ;;  %4491 = vmatprep.subr.bf16.mxu0 %v6102_v57  ;;  %v6135_v38 = vld [vmem:[#allocation5 + $0x3a4] ss:$16 sps:$4 sm:$0xff]  }
 0x145   :  { %2692 = vmatprep.mubr.bf16.mxu1 %v6940_v49  ;;  %4603 = vmatpush2.bf16.msra.mxu1 %v6121_v56  ;;  %v6133_v49 = vld [vmem:[#allocation5 + $0x3a0] ss:$16 sps:$4 sm:$0xff]   ;;  %v6141_v57 = vld [vmem:[#allocation5 + $0x384] ss:$16 sps:$4 sm:$0xff]  }
 0x146   :  { %v7094_v59 = vpop.f32.mrf.mxu1  ;;  %v7099_v63 = vpop.f32.mrf.mxu0  ;;  %4604 = vmatprep.subr.bf16.mxu1 %v6129_v8  ;;  %v7114_v56 = vld [vmem:[%s8281_s2] sm:$0xff] }
 0x147   :  { %4492 = vmatpush2.bf16.msra.mxu0 %v6100_v60  ;;  %v6112_v8 = vld [vmem:[#allocation5 + $0x180] ss:$16 sps:$4 sm:$0xff]   ;;  %v7122_v60 = vrot.slane %v7114_v56, %v8285_v24  ;;  %v6144_v24 = vld [vmem:[#allocation5 + $0x364] ss:$16 sps:$4 sm:$0xff]  }
 0x148   :  { %v7101_v12 = vpop.f32.mrf.mxu1  ;;  %v7104_v52 = vpop.f32.mrf.mxu0  ;;  %4493 = vmatprep.subr.bf16.mxu0 %v6108_v14 }
 0x149   :  { %4605 = vmatpush2.bf16.msra.mxu1 %v6127_v43 }
 0x14a   :  { %v7106_v0 = vpop.f32.mrf.mxu1  ;;  %v7108_v20 = vpop.f32.mrf.mxu0  ;;  %2580 = vmatmul.mubr.bf16.gmra.mxu0 %v6946_v58  ;;  %4606 = vmatprep.subr.bf16.mxu1 %v6135_v38  ;;  %v6120_v58 = vld [vmem:[#allocation5 + $0x164] ss:$16 sps:$4 sm:$0xff]   ;;  %v6139_v38 = vld [vmem:[#allocation5 + $0x380] ss:$16 sps:$4 sm:$0xff]  }
 0x14b   :  { %8305 = vst [vmem:[#allocation12_spill] sm:$0xff] %v7108_v20  ;;  %4494 = vmatpush2.bf16.msra.mxu0 %v6106_v23  ;;  %2589 = vmatprep.mubr.bf16.mxu0 %v6958_v3  ;;  %v1860_v23 = vadd.f32 %v7021_v19, %v7122_v60  ;;  %v6118_v3 = vld [vmem:[#allocation5 + $0x160] ss:$16 sps:$4 sm:$0xff]   ;;  %v8311_v19 = vsub.s32 0, %v7097_v61 }
 0x14c   :  { %v7116_v22 = vpop.f32.mrf.mxu1  ;;  %2693 = vmatmul.mubr.bf16.gmra.mxu1 %v6952_v10  ;;  %v7124_v14 = vpop.f32.mrf.mxu0  ;;  %4495 = vmatprep.subr.bf16.mxu0 %v6114_v21  ;;  %v1856_v21 = vadd.f32 %v7011_v11, %v7122_v60  ;;  %v6142_v10 = vld [vmem:[#allocation5 + $0x360] ss:$16 sps:$4 sm:$0xff]   ;;  %v6147_v11 = vld [vmem:[#allocation5 + $0x344] ss:$16 sps:$4 sm:$0xff]  }
 0x14d   :  { %8306 = vst [vmem:[#allocation13_spill] sm:$0xff] %v7116_v22  ;;  %2702 = vmatprep.mubr.bf16.mxu1 %v6964_v25  ;;  %4607 = vmatpush2.bf16.msra.mxu1 %v6133_v49  ;;  %v6126_v25 = vld [vmem:[#allocation5 + $0x144] ss:$16 sps:$4 sm:$0xff]  }
 0x14e   :  { %v7127_v43 = vpop.f32.mrf.mxu1  ;;  %v7133_v22 = vpop.f32.mrf.mxu0  ;;  %4608 = vmatprep.subr.bf16.mxu1 %v6141_v57  ;;  %v7146_v57 = vrot.slane %v7114_v56, %v8311_v19 }
 0x14f   :  { %8307 = vst [vmem:[#allocation14_spill] sm:$0xff] %v7127_v43  ;;  %8308 = vst [vmem:[#allocation15_spill] sm:$0xff] %v7133_v22  ;;  %4496 = vmatpush2.bf16.msra.mxu0 %v6112_v8 }
 0x150   :  { %v7135_v20 = vpop.f32.mrf.mxu1  ;;  %v7139_v43 = vpop.f32.mrf.mxu0  ;;  %4497 = vmatprep.subr.bf16.mxu0 %v6120_v58  ;;  %v6124_v58 = vld [vmem:[#allocation5 + $0x140] ss:$16 sps:$4 sm:$0xff]   ;;  %v1858_v19 = vadd.f32 %v7017_v9, %v7146_v57 }
 0x151   :  { %8309 = vst [vmem:[#allocation16_spill] sm:$0xff] %v7135_v20  ;;  %4609 = vmatpush2.bf16.msra.mxu1 %v6139_v38  ;;  %v1973_v20 = vadd.f32 %v7023_v37, %v1860_v23  ;;  %v1969_v38 = vadd.f32 %v7014_v13, %v1856_v21  ;;  %v6132_v37 = vld [vmem:[#allocation5 + $0x124] ss:$16 sps:$4 sm:$0xff]   ;;  %v1854_v13 = vadd.f32 %v7005_v4, %v7146_v57 }
 0x152   :  { %v7141_v49 = vpop.f32.mrf.mxu1  ;;  %v7149_v8 = vpop.f32.mrf.mxu0  ;;  %2590 = vmatmul.mubr.bf16.gmra.mxu0 %v6970_v46  ;;  %4610 = vmatprep.subr.bf16.mxu1 %v6144_v24  ;;  %v1870_v46 = vadd.f32 %v7041_v48, %v7122_v60  ;;  %v6130_v48 = vld [vmem:[#allocation5 + $0x120] ss:$16 sps:$4 sm:$0xff]  }
 0x153   :  { %8310 = vst [vmem:[#allocation17_spill] sm:$0xff] %v7141_v49  ;;  %4498 = vmatpush2.bf16.msra.mxu0 %v6118_v3  ;;  %2599 = vmatprep.mubr.bf16.mxu0 %v6982_v34  ;;  %v2732_v23 = vmax.f32 %v1973_v20, 0.0  ;;  %v6150_v3 = vld [vmem:[#allocation5 + $0x324] ss:$16 sps:$4 sm:$0xff]   ;;  %v1866_v34 = vadd.f32 %v7031_v40, %v7122_v60 }
 0x154   :  { %v7152_v22 = vpop.f32.mrf.mxu1  ;;  %2703 = vmatmul.mubr.bf16.gmra.mxu1 %v6976_v28  ;;  %v7158_v49 = vpop.f32.mrf.mxu0  ;;  %4499 = vmatprep.subr.bf16.mxu0 %v6126_v25  ;;  %v6145_v28 = vld [vmem:[#allocation5 + $0x340] ss:$16 sps:$4 sm:$0xff]   ;;  %v2724_v25 = vmax.f32 %v1969_v38, 0.0  ;;  %v1983_v4 = vadd.f32 %v7043_v44, %v1870_v46  ;;  %v1880_v46 = vadd.f32 %v7061_v6, %v7122_v60  ;;  %v1876_v6 = vadd.f32 %v7051_v41, %v7122_v60  ;;  %v6159_v41 = vld [vmem:[#allocation5 + $0x4c4] ss:$16 sps:$4 sm:$0xff]  }
 0x155   :  { %8312 = vst [vmem:[#allocation18_spill] sm:$0xff] %v7152_v22  ;;  %2712 = vmatprep.mubr.bf16.mxu1 %v6988_v47  ;;  %4611 = vmatpush2.bf16.msra.mxu1 %v6142_v10  ;;  %v1971_v47 = vadd.f32 %v7019_v18, %v1858_v19  ;;  %v6138_v22 = vld [vmem:[#allocation5 + $0x104] ss:$16 sps:$4 sm:$0xff]   ;;  %v1979_v38 = vadd.f32 %v7034_v39, %v1866_v34  ;;  %v6136_v44 = vld [vmem:[#allocation5 + $0x100] ss:$16 sps:$4 sm:$0xff]  }
 0x156   :  { %v7163_v24 = vpop.f32.mrf.mxu1  ;;  %v7168_v9 = vpop.f32.mrf.mxu0  ;;  %4612 = vmatprep.subr.bf16.mxu1 %v6147_v11  ;;  %v6148_v11 = vld [vmem:[#allocation5 + $0x320] ss:$16 sps:$4 sm:$0xff]   ;;  %v6153_v18 = vld [vmem:[#allocation5 + $0x304] ss:$16 sps:$4 sm:$0xff]   ;;  %v2748_v39 = vmax.f32 %v1983_v4, 0.0 }
 0x157   :  { %8313 = vst [vmem:[#allocation19_spill] sm:$0xff] %v7168_v9  ;;  %4500 = vmatpush2.bf16.msra.mxu0 %v6124_v58  ;;  %v1967_v9 = vadd.f32 %v7008_v7, %v1854_v13  ;;  %v7184_v58 = vpack.c.bf16 %v2732_v23, %v2724_v25  ;;  %v1868_v7 = vadd.f32 %v7037_v5, %v7146_v57  ;;  %v6151_v23 = vld [vmem:[#allocation5 + $0x300] ss:$16 sps:$4 sm:$0xff]   ;;  %v2740_v25 = vmax.f32 %v1979_v38, 0.0 }
 0x158   :  { %v7172_v21 = vpop.f32.mrf.mxu1  ;;  %v7175_v10 = vpop.f32.mrf.mxu0  ;;  %4501 = vmatprep.subr.bf16.mxu0 %v6132_v37  ;;  %v2731_v37 = vmax.f32 %v1971_v47, 0.0  ;;  %v1864_v5 = vadd.f32 %v7025_v26, %v7146_v57  ;;  %v6154_v4 = vld [vmem:[#allocation5 + $0x4e0] ss:$16 sps:$4 sm:$0xff]   ;;  %v1993_v26 = vadd.f32 %v7063_v54, %v1880_v46  ;;  %v8318_v54 = vsub.s32 2, %v7097_v61 }
 0x159   :  { %4613 = vmatpush2.bf16.msra.mxu1 %v6145_v28  ;;  %8314 = vst [vmem:[#allocation20_spill] sm:$0xff] %v7184_v58  ;;  %v6156_v28 = vld [vmem:[#allocation5 + $0x4e4] ss:$16 sps:$4 sm:$0xff]   ;;  %v1878_v46 = vadd.f32 %v7057_v2, %v7146_v57 }
 0x15a   :  { %v7178_v20 = vpop.f32.mrf.mxu1  ;;  %v7181_v40 = vpop.f32.mrf.mxu0  ;;  %2600 = vmatmul.mubr.bf16.gmra.mxu0 %v6994_v1  ;;  %4614 = vmatprep.subr.bf16.mxu1 %v6150_v3  ;;  %v2723_v3 = vmax.f32 %v1967_v9, 0.0  ;;  %v1981_v9 = vadd.f32 %v7039_v55, %v1868_v7  ;;  %v1989_v55 = vadd.f32 %v7054_v53, %v1876_v6  ;;  %v1874_v53 = vadd.f32 %v7045_v50, %v7146_v57 }
 0x15b   :  { %4502 = vmatpush2.bf16.msra.mxu0 %v6130_v48  ;;  %4505 = vmatprep.mubr.bf16.mxu0 %v7184_v58  ;;  %v7217_v48 = vpack.c.bf16 %v2748_v39, %v2740_v25  ;;  %v6157_v39 = vld [vmem:[#allocation5 + $0x4c0] ss:$16 sps:$4 sm:$0xff]   ;;  %v1890_v6 = vadd.f32 %v7081_v45, %v7122_v60  ;;  %v1886_v50 = vadd.f32 %v7071_v42, %v7122_v60 }
 0x15c   :  { %v7187_v19 = vpop.f32.mrf.mxu1  ;;  %2713 = vmatmul.mubr.bf16.gmra.mxu1 %v7000_v51  ;;  %v7195_v1 = vpop.f32.mrf.mxu0  ;;  %4503 = vmatprep.subr.bf16.mxu0 %v6138_v22  ;;  %v6204_v22 = vld [vmem:[#allocation5 + $0x6e4] ss:$16 sps:$4 sm:$0xff]   ;;  %v1987_v45 = vadd.f32 %v7048_v62, %v1874_v53 }
 0x15d   :  { %4615 = vmatpush2.bf16.msra.mxu1 %v6148_v11  ;;  %v7209_v11 = vpack.c.bf16 %v2731_v37, %v2723_v3  ;;  %8316 = vst [vmem:[#allocation22_spill] sm:$0xff] %v7217_v48  ;;  %v7229_v37 = vrot.slane %v7114_v56, %v8318_v54  ;;  %v1999_v53 = vadd.f32 %v7074_v32, %v1886_v50 }
 0x15e   :  { %v7197_v13 = vpop.f32.mrf.mxu1  ;;  %v7204_v34 = vpop.f32.mrf.mxu0  ;;  %4616 = vmatprep.subr.bf16.mxu1 %v6153_v18  ;;  %v8317_v18 = vsub.s32 3, %v7097_v61 }
 0x15f   :  { %4504 = vmatpush2.bf16.msra.mxu0 %v6136_v44  ;;  %8315 = vst [vmem:[#allocation21_spill] sm:$0xff] %v7209_v11  ;;  %v1977_v44 = vadd.f32 %v7028_v27, %v1864_v5  ;;  %v2747_v27 = vmax.f32 %v1981_v9, 0.0  ;;  %v6162_v5 = vld [vmem:[#allocation5 + $0x4a4] ss:$16 sps:$4 sm:$0xff]   ;;  %v1991_v9 = vadd.f32 %v7059_v15, %v1878_v46  ;;  %v2003_v46 = vadd.f32 %v7083_v31, %v1890_v6  ;;  %v6163_v31 = vld [vmem:[#allocation5 + $0x480] ss:$16 sps:$4 sm:$0xff]  }
 0x160   :  { %v7207_v47 = vpop.f32.mrf.mxu1  ;;  %v7213_v51 = vpop.f32.mrf.mxu0  ;;  %4699 = vmatprep.subr.bf16.mxu0 %v6156_v28  ;;  %v7222_v38 = vrot.slane %v7114_v56, %v8317_v18  ;;  %v2756_v18 = vmax.f32 %v1989_v55, 0.0  ;;  %v6165_v15 = vld [vmem:[#allocation5 + $0x484] ss:$16 sps:$4 sm:$0xff]   ;;  %v2755_v6 = vmax.f32 %v1987_v45, 0.0 }
 0x161   :  { %4617 = vmatpush2.bf16.msra.mxu1 %v6151_v23  ;;  %v2764_v23 = vmax.f32 %v1993_v26, 0.0  ;;  %v2739_v2 = vmax.f32 %v1977_v44, 0.0  ;;  %v1888_v44 = vadd.f32 %v7077_v30, %v7146_v57  ;;  %v2763_v30 = vmax.f32 %v1991_v9, 0.0 }
 0x162   :  { %v7215_v58 = vpop.f32.mrf.mxu1  ;;  %v2079_v7 = vpop.f32.mrf.mxu0  ;;  %4506 = vmatmul.mubr.bf16.vlgmr.msra.gmra.mxu0 %v7209_v11  ;;  %4812 = vmatprep.subr.bf16.mxu1 %v6204_v22 }
 0x163   :  { %4515 = vmatprep.mubr.bf16.mxu0 %v7217_v48  ;;  %4700 = vmatpush1.bf16.msra.mxu0 %v6154_v4  ;;  %v2080_v54 = vadd.f32 %v2079_v7, %v7229_v37  ;;  %v6160_v48 = vld [vmem:[#allocation5 + $0x4a0] ss:$16 sps:$4 sm:$0xff]   ;;  %v7245_v11 = vpack.c.bf16 %v2747_v27, %v2739_v2  ;;  %v7250_v7 = vpack.c.bf16 %v2764_v23, %v2756_v18  ;;  %v6168_v18 = vld [vmem:[#allocation5 + $0x464] ss:$16 sps:$4 sm:$0xff]  }
 0x164   :  { %v2192_v28 = vpop.f32.mrf.mxu1  ;;  %v2081_v3 = vpop.f32.mrf.mxu0  ;;  %4701 = vmatprep.subr.bf16.mxu0 %v6159_v41  ;;  %v1884_v27 = vadd.f32 %v7065_v16, %v7146_v57 }
 0x165   :  { %v2082_v22 = vadd.f32 %v2081_v3, %v7222_v38  ;;  %v2193_v2 = vadd.f32 %v2192_v28, %v2080_v54  ;;  %v2780_v54 = vmax.f32 %v2003_v46, 0.0 }
 0x166   :  { %v2194_v25 = vpop.f32.mrf.mxu1  ;;  %v2083_v4 = vpop.f32.mrf.mxu0 }
 0x167   :  { %v2084_v26 = vadd.f32 %v2083_v4, %v7229_v37  ;;  %4702 = vmatpush1.bf16.msra.mxu0 %v6157_v39  ;;  %v2195_v42 = vadd.f32 %v2194_v25, %v2082_v22  ;;  %v2001_v22 = vadd.f32 %v7079_v33, %v1888_v44  ;;  %v1900_v25 = vadd.f32 %v7104_v52, %v7122_v60 }
 0x168   :  { %v2196_v41 = vpop.f32.mrf.mxu1  ;;  %v2085_v55 = vpop.f32.mrf.mxu0  ;;  %4703 = vmatprep.subr.bf16.mxu0 %v6162_v5  ;;  %v2725_v45 = vmax.f32 %v2193_v2, 0.0  ;;  %v7267_v52 = vpack.c.bf16 %v2763_v30, %v2755_v6  ;;  %v6171_v2 = vld [vmem:[#allocation5 + $0x444] ss:$16 sps:$4 sm:$0xff]  }
 0x169   :  { %v2197_v3 = vadd.f32 %v2196_v41, %v2084_v26  ;;  %v2086_v4 = vadd.f32 %v2085_v55, %v7222_v38  ;;  %v2726_v9 = vmax.f32 %v2195_v42, 0.0  ;;  %v1997_v41 = vadd.f32 %v7068_v17, %v1884_v27 }
 0x16a   :  { %v2198_v39 = vpop.f32.mrf.mxu1  ;;  %v2089_v62 = vpop.f32.mrf.mxu0  ;;  %4516 = vmatmul.mubr.bf16.gmra.mxu0 %v7245_v11  ;;  %v2772_v55 = vmax.f32 %v1999_v53, 0.0  ;;  %v1894_v17 = vadd.f32 %v7085_v35, %v7146_v57 }
 0x16b   :  { %v2199_v23 = vadd.f32 %v2198_v39, %v2086_v4  ;;  %4525 = vmatprep.mubr.bf16.mxu0 %v7250_v7  ;;  %4704 = vmatpush1.bf16.msra.mxu0 %v6160_v48  ;;  %v2733_v16 = vmax.f32 %v2197_v3, 0.0  ;;  %v1896_v48 = vadd.f32 %v7091_v29, %v7122_v60  ;;  %v2090_v33 = vadd.f32 %v2089_v62, %v7229_v37  ;;  %v6166_v3 = vld [vmem:[#allocation5 + $0x460] ss:$16 sps:$4 sm:$0xff]  }
 0x16c   :  { %v2202_v5 = vpop.f32.mrf.mxu1  ;;  %v2091_v28 = vpop.f32.mrf.mxu0  ;;  %4705 = vmatprep.subr.bf16.mxu0 %v6165_v15  ;;  %v2779_v4 = vmax.f32 %v2001_v22, 0.0  ;;  %v2013_v29 = vadd.f32 %v7106_v0, %v1900_v25  ;;  %v6202_v62 = vld [vmem:[#allocation5 + $0x6e0] ss:$16 sps:$4 sm:$0xff]   ;;  %v6210_v22 = vld [vmem:[#allocation5 + $0x6c4] ss:$16 sps:$4 sm:$0xff]  }
 0x16d   :  { %v2734_v26 = vmax.f32 %v2199_v23, 0.0  ;;  %v2092_v32 = vadd.f32 %v2091_v28, %v7222_v38  ;;  %v7275_v39 = vpack.c.bf16 %v2733_v16, %v2725_v45  ;;  %v2771_v28 = vmax.f32 %v1997_v41, 0.0  ;;  %v6174_v41 = vld [vmem:[#allocation5 + $0x424] ss:$16 sps:$4 sm:$0xff]  }
 0x16e   :  { %v2204_v50 = vpop.f32.mrf.mxu1  ;;  %v2093_v44 = vpop.f32.mrf.mxu0  ;;  %v2009_v35 = vadd.f32 %v7094_v59, %v1896_v48  ;;  %v2203_v0 = vadd.f32 %v2202_v5, %v2090_v33  ;;  %v1898_v16 = vadd.f32 %v7099_v63, %v7146_v57  ;;  %v1910_v59 = vadd.f32 %v7139_v43, %v7122_v60  ;;  %v6208_v48 = vld [vmem:[#allocation5 + $0x6c0] ss:$16 sps:$4 sm:$0xff]  }
 0x16f   :  { %v2094_v15 = vadd.f32 %v2093_v44, %v7229_v37  ;;  %v7270_v42 = vpack.c.bf16 %v2734_v26, %v2726_v9  ;;  %4706 = vmatpush1.bf16.msra.mxu0 %v6163_v31  ;;  %v2205_v30 = vadd.f32 %v2204_v50, %v2092_v32  ;;  %v7279_v31 = vpack.c.bf16 %v2780_v54, %v2772_v55  ;;  %v6169_v54 = vld [vmem:[#allocation5 + $0x440] ss:$16 sps:$4 sm:$0xff]  }
 0x170   :  { %v2206_v46 = vpop.f32.mrf.mxu1  ;;  %v2095_v27 = vpop.f32.mrf.mxu0  ;;  %4707 = vmatprep.subr.bf16.mxu0 %v6168_v18  ;;  %v7287_v26 = vpack.c.bf16 %v2779_v4, %v2771_v28  ;;  %v2796_v32 = vmax.f32 %v2013_v29, 0.0  ;;  %v7292_v63 = vadd.f32 %v7088_v36, %v1894_v17  ;;  %v1906_v43 = vadd.f32 %v7124_v14, %v7122_v60  ;;  %v8319_v36 = vld [vmem:[#allocation15_spill] sm:$0xff] }
 0x171   :  { %v2207_v53 = vadd.f32 %v2206_v46, %v2094_v15  ;;  %v2096_v23 = vadd.f32 %v2095_v27, %v7222_v38  ;;  %4618 = vmatprep.mubr.bf16.mxu1 %v7270_v42  ;;  %v2742_v45 = vmax.f32 %v2205_v30, 0.0  ;;  %v6216_v15 = vld [vmem:[#allocation5 + $0x6a4] ss:$16 sps:$4 sm:$0xff]   ;;  %v2788_v46 = vmax.f32 %v2009_v35, 0.0 }
 0x172   :  { %v2208_v6 = vpop.f32.mrf.mxu1  ;;  %v2099_v25 = vpop.f32.mrf.mxu0  ;;  %4526 = vmatmul.mubr.bf16.gmra.mxu0 %v7267_v52  ;;  %4619 = vmatmul.mubr.bf16.vlgmr.msra.gmra.mxu1 %v7275_v39  ;;  %v2011_v27 = vadd.f32 %v7101_v12, %v1898_v16  ;;  %v1908_v17 = vadd.f32 %v8319_v36, %v7146_v57  ;;  %v6177_v35 = vld [vmem:[#allocation5 + $0x404] ss:$16 sps:$4 sm:$0xff]   ;;  %v6214_v12 = vld [vmem:[#allocation5 + $0x6a0] ss:$16 sps:$4 sm:$0xff]  }
 0x173   :  { %v2209_v18 = vadd.f32 %v2208_v6, %v2096_v23  ;;  %4535 = vmatprep.mubr.bf16.mxu0 %v7279_v31  ;;  %4708 = vmatpush1.bf16.msra.mxu0 %v6166_v3  ;;  %v2749_v5 = vmax.f32 %v2207_v53, 0.0  ;;  %v2741_v3 = vmax.f32 %v2203_v0, 0.0  ;;  %v2100_v4 = vadd.f32 %v2099_v25, %v7229_v37  ;;  %v6172_v53 = vld [vmem:[#allocation5 + $0x420] ss:$16 sps:$4 sm:$0xff]  }
 0x174   :  { %v2212_v9 = vpop.f32.mrf.mxu1  ;;  %v2101_v50 = vpop.f32.mrf.mxu0  ;;  %4709 = vmatprep.subr.bf16.mxu0 %v6171_v2  ;;  %4813 = vmatpush1.bf16.msra.mxu1 %v6202_v62  ;;  %v8320_v23 = vld [vmem:[#allocation17_spill] sm:$0xff]  ;;  %v7307_v28 = vpack.c.bf16 %v2796_v32, %v2788_v46  ;;  %v2795_v32 = vmax.f32 %v2011_v27, 0.0  ;;  %v2787_v46 = vmax.f32 %v7292_v63, 0.0  ;;  %v8323_v27 = vld [vmem:[#allocation16_spill] sm:$0xff]  ;;  %v1916_v63 = vadd.f32 %v7158_v49, %v7122_v60 }
 0x175   :  { %v2750_v33 = vmax.f32 %v2209_v18, 0.0  ;;  %v2102_v44 = vadd.f32 %v2101_v50, %v7222_v38  ;;  %4814 = vmatprep.subr.bf16.mxu1 %v6210_v22  ;;  %v2023_v6 = vadd.f32 %v8320_v23, %v1910_v59  ;;  %v7305_v22 = vpack.c.bf16 %v2749_v5, %v2741_v3  ;;  %v8321_v50 = vld [vmem:[#allocation14_spill] sm:$0xff] }
 0x176   :  { %v2214_v55 = vpop.f32.mrf.mxu1  ;;  %v2103_v29 = vpop.f32.mrf.mxu0  ;;  %v2019_v59 = vadd.f32 %v8321_v50, %v1906_v43  ;;  %v2213_v5 = vadd.f32 %v2212_v9, %v2100_v4  ;;  %v1920_v9 = vadd.f32 %v7175_v10, %v7122_v60  ;;  %v2021_v36 = vadd.f32 %v8323_v27, %v1908_v17 }
 0x177   :  { %v2104_v2 = vadd.f32 %v2103_v29, %v7229_v37  ;;  %v7302_v30 = vpack.c.bf16 %v2750_v33, %v2742_v45  ;;  %4710 = vmatpush1.bf16.msra.mxu0 %v6169_v54  ;;  %v2215_v0 = vadd.f32 %v2214_v55, %v2102_v44  ;;  %v6222_v54 = vld [vmem:[#allocation5 + $0x684] ss:$16 sps:$4 sm:$0xff]   ;;  %v6175_v55 = vld [vmem:[#allocation5 + $0x400] ss:$16 sps:$4 sm:$0xff]   ;;  %v2812_v43 = vmax.f32 %v2023_v6, 0.0 }
 0x178   :  { %v2216_v62 = vpop.f32.mrf.mxu1  ;;  %v2105_v14 = vpop.f32.mrf.mxu0  ;;  %4711 = vmatprep.subr.bf16.mxu0 %v6174_v41  ;;  %4815 = vmatpush1.bf16.msra.mxu1 %v6208_v48  ;;  %v8322_v41 = vld [vmem:[#allocation12_spill] sm:$0xff]  ;;  %v6220_v29 = vld [vmem:[#allocation5 + $0x680] ss:$16 sps:$4 sm:$0xff]   ;;  %v2757_v6 = vmax.f32 %v2213_v5, 0.0 }
 0x179   :  { %v2217_v25 = vadd.f32 %v2216_v62, %v2104_v2  ;;  %v2106_v16 = vadd.f32 %v2105_v14, %v7222_v38  ;;  %4628 = vmatprep.mubr.bf16.mxu1 %v7302_v30  ;;  %4816 = vmatprep.subr.bf16.mxu1 %v6216_v15  ;;  %v1904_v48 = vadd.f32 %v8322_v41, %v7146_v57  ;;  %v6180_v15 = vld [vmem:[#allocation5 + $0x5e4] ss:$16 sps:$4 sm:$0xff]   ;;  %v2758_v2 = vmax.f32 %v2215_v0, 0.0 }
 0x17a   :  { %v2218_v18 = vpop.f32.mrf.mxu1  ;;  %v2109_v45 = vpop.f32.mrf.mxu0  ;;  %4536 = vmatmul.mubr.bf16.gmra.mxu0 %v7287_v26  ;;  %4629 = vmatmul.mubr.bf16.gmra.mxu1 %v7305_v22  ;;  %v6228_v14 = vld [vmem:[#allocation5 + $0x664] ss:$16 sps:$4 sm:$0xff]  }
 0x17b   :  { %v2219_v33 = vadd.f32 %v2218_v18, %v2106_v16  ;;  %4545 = vmatprep.mubr.bf16.mxu0 %v7307_v28  ;;  %4712 = vmatpush1.bf16.msra.mxu0 %v6172_v53  ;;  %v2765_v3 = vmax.f32 %v2217_v25, 0.0  ;;  %v2804_v16 = vmax.f32 %v2019_v59, 0.0  ;;  %v2110_v10 = vadd.f32 %v2109_v45, %v7229_v37  ;;  %v6183_v45 = vld [vmem:[#allocation5 + $0x5c4] ss:$16 sps:$4 sm:$0xff]  }
 0x17c   :  { %v2222_v44 = vpop.f32.mrf.mxu1  ;;  %v2111_v4 = vpop.f32.mrf.mxu0  ;;  %4713 = vmatprep.subr.bf16.mxu0 %v6177_v35  ;;  %4817 = vmatpush1.bf16.msra.mxu1 %v6214_v12  ;;  %v7325_v35 = vpack.c.bf16 %v2795_v32, %v2787_v46  ;;  %v8324_v12 = vld [vmem:[#allocation13_spill] sm:$0xff]  ;;  %v2033_v59 = vadd.f32 %v7178_v20, %v1920_v9  ;;  %v2029_v20 = vadd.f32 %v7163_v24, %v1916_v63 }
 0x17d   :  { %v2766_v62 = vmax.f32 %v2219_v33, 0.0  ;;  %v2112_v23 = vadd.f32 %v2111_v4, %v7222_v38  ;;  %4818 = vmatprep.subr.bf16.mxu1 %v6222_v54  ;;  %v2017_v18 = vadd.f32 %v8324_v12, %v1904_v48  ;;  %v6178_v54 = vld [vmem:[#allocation5 + $0x5e0] ss:$16 sps:$4 sm:$0xff]   ;;  %v7332_v41 = vpack.c.bf16 %v2765_v3, %v2757_v6 }
 0x17e   :  { %v2224_v53 = vpop.f32.mrf.mxu1  ;;  %v2113_v25 = vpop.f32.mrf.mxu0  ;;  %v7334_v5 = vpack.c.bf16 %v2812_v43, %v2804_v16  ;;  %v6226_v32 = vld [vmem:[#allocation5 + $0x660] ss:$16 sps:$4 sm:$0xff]   ;;  %v2811_v33 = vmax.f32 %v2021_v36, 0.0  ;;  %v2223_v9 = vadd.f32 %v2222_v44, %v2110_v10  ;;  %v1914_v43 = vadd.f32 %v7149_v8, %v7146_v57  ;;  %v6186_v16 = vld [vmem:[#allocation5 + $0x5a4] ss:$16 sps:$4 sm:$0xff]  }
 0x17f   :  { %v2114_v17 = vadd.f32 %v2113_v25, %v7229_v37  ;;  %v7329_v50 = vpack.c.bf16 %v2766_v62, %v2758_v2  ;;  %4714 = vmatpush1.bf16.msra.mxu0 %v6175_v55  ;;  %v2225_v48 = vadd.f32 %v2224_v53, %v2112_v23  ;;  %v6234_v55 = vld [vmem:[#allocation5 + $0x644] ss:$16 sps:$4 sm:$0xff]   ;;  %v6181_v23 = vld [vmem:[#allocation5 + $0x5c0] ss:$16 sps:$4 sm:$0xff]   ;;  %v2828_v24 = vmax.f32 %v2033_v59, 0.0 }
 0x180   :  { %v2226_v0 = vpop.f32.mrf.mxu1  ;;  %v2115_v49 = vpop.f32.mrf.mxu0  ;;  %4715 = vmatprep.subr.bf16.mxu0 %v6180_v15  ;;  %4819 = vmatpush1.bf16.msra.mxu1 %v6220_v29  ;;  %v2803_v15 = vmax.f32 %v2017_v18, 0.0  ;;  %v8325_v29 = vld [vmem:[#allocation19_spill] sm:$0xff]  ;;  %v1930_v44 = vadd.f32 %v7213_v51, %v7122_v60  ;;  %v2773_v51 = vmax.f32 %v2223_v9, 0.0 }
 0x181   :  { %v2227_v46 = vadd.f32 %v2226_v0, %v2114_v17  ;;  %v2116_v4 = vadd.f32 %v2115_v49, %v7222_v38  ;;  %4638 = vmatprep.mubr.bf16.mxu1 %v7329_v50  ;;  %4820 = vmatprep.subr.bf16.mxu1 %v6228_v14  ;;  %v1918_v36 = vadd.f32 %v8325_v29, %v7146_v57  ;;  %v6232_v63 = vld [vmem:[#allocation5 + $0x640] ss:$16 sps:$4 sm:$0xff]   ;;  %v2774_v6 = vmax.f32 %v2225_v48, 0.0  ;;  %v6240_v18 = vld [vmem:[#allocation5 + $0x624] ss:$16 sps:$4 sm:$0xff]   ;;  %v8326_v49 = vld [vmem:[#allocation18_spill] sm:$0xff] }
 0x182   :  { %v2228_v27 = vpop.f32.mrf.mxu1  ;;  %v2119_v3 = vpop.f32.mrf.mxu0  ;;  %4546 = vmatmul.mubr.bf16.gmra.mxu0 %v7325_v35  ;;  %4639 = vmatmul.mubr.bf16.gmra.mxu1 %v7332_v41  ;;  %v7348_v8 = vpack.c.bf16 %v2811_v33, %v2803_v15  ;;  %v2820_v17 = vmax.f32 %v2029_v20, 0.0  ;;  %v1926_v0 = vadd.f32 %v7195_v1, %v7122_v60  ;;  %v6189_v20 = vld [vmem:[#allocation5 + $0x584] ss:$16 sps:$4 sm:$0xff]   ;;  %v6238_v9 = vld [vmem:[#allocation5 + $0x620] ss:$16 sps:$4 sm:$0xff]  }
 0x183   :  { %v2229_v2 = vadd.f32 %v2228_v27, %v2116_v4  ;;  %4555 = vmatprep.mubr.bf16.mxu0 %v7334_v5  ;;  %4716 = vmatpush2.bf16.msra.mxu0 %v6178_v54  ;;  %v2781_v53 = vmax.f32 %v2227_v46, 0.0  ;;  %v2120_v54 = vadd.f32 %v2119_v3, %v7229_v37  ;;  %v6184_v4 = vld [vmem:[#allocation5 + $0x5a0] ss:$16 sps:$4 sm:$0xff]   ;;  %v2043_v27 = vadd.f32 %v7215_v58, %v1930_v44  ;;  %v6246_v29 = vld [vmem:[#allocation5 + $0x604] ss:$16 sps:$4 sm:$0xff]  }
 0x184   :  { %v2232_v62 = vpop.f32.mrf.mxu1  ;;  %v2121_v14 = vpop.f32.mrf.mxu0  ;;  %4717 = vmatprep.subr.bf16.mxu0 %v6183_v45  ;;  %4821 = vmatpush1.bf16.msra.mxu1 %v6226_v32  ;;  %v2027_v45 = vadd.f32 %v8326_v49, %v1914_v43  ;;  %v2031_v32 = vadd.f32 %v7172_v21, %v1918_v36  ;;  %v7362_v1 = vpack.c.bf16 %v2828_v24, %v2820_v17 }
 0x185   :  { %v2782_v10 = vmax.f32 %v2229_v2, 0.0  ;;  %v2122_v25 = vadd.f32 %v2121_v14, %v7222_v38  ;;  %4822 = vmatprep.subr.bf16.mxu1 %v6234_v55  ;;  %v7360_v55 = vpack.c.bf16 %v2781_v53, %v2773_v51  ;;  %v2039_v58 = vadd.f32 %v7197_v13, %v1926_v0  ;;  %v6187_v53 = vld [vmem:[#allocation5 + $0x580] ss:$16 sps:$4 sm:$0xff]   ;;  %v6192_v13 = vld [vmem:[#allocation5 + $0x564] ss:$16 sps:$4 sm:$0xff]  }
 0x186   :  { %v2234_v12 = vpop.f32.mrf.mxu1  ;;  %v2123_v59 = vpop.f32.mrf.mxu0  ;;  %v2233_v36 = vadd.f32 %v2232_v62, %v2120_v54  ;;  %v1928_v14 = vadd.f32 %v7204_v34, %v7146_v57  ;;  %v6244_v62 = vld [vmem:[#allocation5 + $0x600] ss:$16 sps:$4 sm:$0xff]   ;;  %v6252_v0 = vld [vmem:[#allocation5 + $0x7e4] ss:$16 sps:$4 sm:$0xff]   ;;  %v1924_v51 = vadd.f32 %v7181_v40, %v7146_v57 }
 0x187   :  { %v2124_v33 = vadd.f32 %v2123_v59, %v7229_v37  ;;  %v7357_v46 = vpack.c.bf16 %v2782_v10, %v2774_v6  ;;  %4718 = vmatpush2.bf16.msra.mxu0 %v6181_v23  ;;  %v2235_v3 = vadd.f32 %v2234_v12, %v2122_v25  ;;  %v2827_v23 = vmax.f32 %v2031_v32, 0.0  ;;  %v6195_v40 = vld [vmem:[#allocation5 + $0x544] ss:$16 sps:$4 sm:$0xff]  }
 0x188   :  { %v2236_v48 = vpop.f32.mrf.mxu1  ;;  %v2125_v60 = vpop.f32.mrf.mxu0  ;;  %4719 = vmatprep.subr.bf16.mxu0 %v6186_v16  ;;  %4823 = vmatpush1.bf16.msra.mxu1 %v6232_v63  ;;  %v2844_v16 = vmax.f32 %v2043_v27, 0.0  ;;  %v2819_v10 = vmax.f32 %v2027_v45, 0.0  ;;  %v2836_v54 = vmax.f32 %v2039_v58, 0.0  ;;  %v2789_v34 = vmax.f32 %v2233_v36, 0.0 }
 0x189   :  { %v2237_v21 = vadd.f32 %v2236_v48, %v2124_v33  ;;  %v2126_v15 = vadd.f32 %v2125_v60, %v7222_v38  ;;  %4648 = vmatprep.mubr.bf16.mxu1 %v7357_v46  ;;  %4824 = vmatprep.subr.bf16.mxu1 %v6240_v18  ;;  %v2790_v25 = vmax.f32 %v2235_v3, 0.0  ;;  %v2041_v27 = vadd.f32 %v7207_v47, %v1928_v14 }
 0x18a   :  { %v2238_v43 = vpop.f32.mrf.mxu1  ;;  %v2129_v2 = vpop.f32.mrf.mxu0  ;;  %4556 = vmatmul.mubr.bf16.gmra.mxu0 %v7348_v8  ;;  %4649 = vmatmul.mubr.bf16.gmra.mxu1 %v7360_v55  ;;  %v7376_v32 = vpack.c.bf16 %v2827_v23, %v2819_v10  ;;  %v7384_v57 = vpack.c.bf16 %v2844_v16, %v2836_v54  ;;  %v2037_v47 = vadd.f32 %v7187_v19, %v1924_v51  ;;  %v6264_v10 = vld [vmem:[#allocation5 + $0x7a4] ss:$16 sps:$4 sm:$0xff]  }
 0x18b   :  { %v2239_v24 = vadd.f32 %v2238_v43, %v2126_v15  ;;  %4565 = vmatprep.mubr.bf16.mxu0 %v7362_v1  ;;  %4720 = vmatpush2.bf16.msra.mxu0 %v6184_v4  ;;  %v2797_v63 = vmax.f32 %v2237_v21, 0.0  ;;  %v2130_v59 = vadd.f32 %v2129_v2, %v7229_v37  ;;  %v6190_v4 = vld [vmem:[#allocation5 + $0x560] ss:$16 sps:$4 sm:$0xff]  }
 0x18c   :  { %v2242_v44 = vpop.f32.mrf.mxu1  ;;  %v2131_v6 = vpop.f32.mrf.mxu0  ;;  %4721 = vmatprep.subr.bf16.mxu0 %v6189_v20  ;;  %4825 = vmatpush1.bf16.msra.mxu1 %v6238_v9  ;;  %v6250_v9 = vld [vmem:[#allocation5 + $0x7e0] ss:$16 sps:$4 sm:$0xff]  }
 0x18d   :  { %v2798_v12 = vmax.f32 %v2239_v24, 0.0  ;;  %v2132_v18 = vadd.f32 %v2131_v6, %v7222_v38  ;;  %4826 = vmatprep.subr.bf16.mxu1 %v6246_v29  ;;  %v7382_v60 = vpack.c.bf16 %v2797_v63, %v2789_v34  ;;  %v6258_v29 = vld [vmem:[#allocation5 + $0x7c4] ss:$16 sps:$4 sm:$0xff]   ;;  %v2243_v58 = vadd.f32 %v2242_v44, %v2130_v59  ;;  %v6193_v24 = vld [vmem:[#allocation5 + $0x540] ss:$16 sps:$4 sm:$0xff]  }
 0x18e   :  { %v2244_v17 = vpop.f32.mrf.mxu1  ;;  %v2133_v49 = vpop.f32.mrf.mxu0  ;;  %v6198_v63 = vld [vmem:[#allocation5 + $0x524] ss:$16 sps:$4 sm:$0xff]   ;;  %v6256_v6 = vld [vmem:[#allocation5 + $0x7c0] ss:$16 sps:$4 sm:$0xff]  }
 0x18f   :  { %v2134_v33 = vadd.f32 %v2133_v49, %v7229_v37  ;;  %v7379_v48 = vpack.c.bf16 %v2798_v12, %v2790_v25  ;;  %4722 = vmatpush2.bf16.msra.mxu0 %v6187_v53  ;;  %v2245_v3 = vadd.f32 %v2244_v17, %v2132_v18  ;;  %v2843_v53 = vmax.f32 %v2041_v27, 0.0  ;;  %v6196_v34 = vld [vmem:[#allocation5 + $0x520] ss:$16 sps:$4 sm:$0xff]  }
 0x190   :  { %v2246_v45 = vpop.f32.mrf.mxu1  ;;  %v2135_v20 = vpop.f32.mrf.mxu0  ;;  %4723 = vmatprep.subr.bf16.mxu0 %v6192_v13  ;;  %4827 = vmatpush1.bf16.msra.mxu1 %v6244_v62  ;;  %v2835_v25 = vmax.f32 %v2037_v47, 0.0  ;;  %v2805_v12 = vmax.f32 %v2243_v58, 0.0  ;;  %v6199_v47 = vld [vmem:[#allocation5 + $0x500] ss:$16 sps:$4 sm:$0xff]  }
 0x191   :  { %v2247_v21 = vadd.f32 %v2246_v45, %v2134_v33  ;;  %v2136_v15 = vadd.f32 %v2135_v20, %v7222_v38  ;;  %4658 = vmatprep.mubr.bf16.mxu1 %v7379_v48  ;;  %4828 = vmatprep.subr.bf16.mxu1 %v6252_v0  ;;  %v2806_v19 = vmax.f32 %v2245_v3, 0.0  ;;  %v6201_v45 = vld [vmem:[#allocation5 + $0x504] ss:$16 sps:$4 sm:$0xff]  }
 0x192   :  { %v2248_v43 = vpop.f32.mrf.mxu1  ;;  %v2139_v36 = vpop.f32.mrf.mxu0  ;;  %4566 = vmatmul.mubr.bf16.gmra.mxu0 %v7376_v32  ;;  %4659 = vmatmul.mubr.bf16.gmra.mxu1 %v7382_v60  ;;  %v7397_v59 = vpack.c.bf16 %v2843_v53, %v2835_v25  ;;  %v6270_v3 = vld [vmem:[#allocation5 + $0x784] ss:$16 sps:$4 sm:$0xff]   ;;  %v6268_v53 = vld [vmem:[#allocation5 + $0x780] ss:$16 sps:$4 sm:$0xff]  }
 0x193   :  { %v2249_v2 = vadd.f32 %v2248_v43, %v2136_v15  ;;  %4575 = vmatprep.mubr.bf16.mxu0 %v7384_v57  ;;  %4724 = vmatpush2.bf16.msra.mxu0 %v6190_v4  ;;  %v2813_v14 = vmax.f32 %v2247_v21, 0.0  ;;  %v2140_v18 = vadd.f32 %v2139_v36, %v7229_v37  ;;  %v6262_v4 = vld [vmem:[#allocation5 + $0x7a0] ss:$16 sps:$4 sm:$0xff]  }
 0x194   :  { %v2252_v23 = vpop.f32.mrf.mxu1  ;;  %v2141_v16 = vpop.f32.mrf.mxu0  ;;  %4725 = vmatprep.subr.bf16.mxu0 %v6195_v40  ;;  %4829 = vmatpush2.bf16.msra.mxu1 %v6250_v9 }
 0x195   :  { %v2814_v44 = vmax.f32 %v2249_v2, 0.0  ;;  %v2142_v13 = vadd.f32 %v2141_v16, %v7222_v38  ;;  %4830 = vmatprep.subr.bf16.mxu1 %v6258_v29  ;;  %v7399_v49 = vpack.c.bf16 %v2813_v14, %v2805_v12  ;;  %v2253_v21 = vadd.f32 %v2252_v23, %v2140_v18 }
 0x196   :  { %v2254_v62 = vpop.f32.mrf.mxu1  ;;  %v2143_v17 = vpop.f32.mrf.mxu0  ;;  %v361_v2 = vsub.s32 5, %v7097_v61 }
 0x197   :  { %v2144_v0 = vadd.f32 %v2143_v17, %v7229_v37  ;;  %v7395_v54 = vpack.c.bf16 %v2814_v44, %v2806_v19  ;;  %4726 = vmatpush2.bf16.msra.mxu0 %v6193_v24  ;;  %v2255_v27 = vadd.f32 %v2254_v62, %v2142_v13  ;;  %v6207_v24 = vld [vmem:[#allocation5 + $0xec] ss:$16 sps:$4 sm:$0xff]   ;;  %v2821_v19 = vmax.f32 %v2253_v21, 0.0 }
 0x198   :  { %v2256_v51 = vpop.f32.mrf.mxu1  ;;  %v2145_v33 = vpop.f32.mrf.mxu0  ;;  %4727 = vmatprep.subr.bf16.mxu0 %v6198_v63  ;;  %4831 = vmatpush2.bf16.msra.mxu1 %v6256_v6  ;;  %v6276_v6 = vld [vmem:[#allocation5 + $0x764] ss:$16 sps:$4 sm:$0xff]   ;;  %v357_v62 = vsub.s32 4, %v7097_v61 }
 0x199   :  { %v2257_v20 = vadd.f32 %v2256_v51, %v2144_v0  ;;  %v2146_v40 = vadd.f32 %v2145_v33, %v7222_v38  ;;  %4668 = vmatprep.mubr.bf16.mxu1 %v7395_v54  ;;  %4832 = vmatprep.subr.bf16.mxu1 %v6264_v10  ;;  %v2822_v14 = vmax.f32 %v2255_v27, 0.0  ;;  %v7415_v0 = vrot.slane %v7114_v56, %v361_v2  ;;  %v6274_v51 = vld [vmem:[#allocation5 + $0x760] ss:$16 sps:$4 sm:$0xff]   ;;  %v6288_v2 = vld [vmem:[#allocation5 + $0x724] ss:$16 sps:$4 sm:$0xff]  }
 0x19a   :  { %v2258_v9 = vpop.f32.mrf.mxu1  ;;  %v2149_v15 = vpop.f32.mrf.mxu0  ;;  %4576 = vmatmul.mubr.bf16.gmra.mxu0 %v7397_v59  ;;  %4669 = vmatmul.mubr.bf16.gmra.mxu1 %v7399_v49 }
 0x19b   :  { %v2259_v43 = vadd.f32 %v2258_v9, %v2146_v40  ;;  %4728 = vmatpush2.bf16.msra.mxu0 %v6196_v34  ;;  %v2829_v58 = vmax.f32 %v2257_v20, 0.0  ;;  %v2150_v44 = vadd.f32 %v2149_v15, %v7229_v37  ;;  %v7420_v20 = vrot.slane %v7114_v56, %v357_v62 }
 0x19c   :  { %v2262_v29 = vpop.f32.mrf.mxu1  ;;  %v2151_v36 = vpop.f32.mrf.mxu0  ;;  %4729 = vmatprep.subr.bf16.mxu0 %v6201_v45  ;;  %4833 = vmatpush2.bf16.msra.mxu1 %v6262_v4 }
 0x19d   :  { %v2830_v16 = vmax.f32 %v2259_v43, 0.0  ;;  %v2152_v23 = vadd.f32 %v2151_v36, %v7222_v38  ;;  %4834 = vmatprep.subr.bf16.mxu1 %v6270_v3  ;;  %v7412_v18 = vpack.c.bf16 %v2829_v58, %v2821_v19  ;;  %v2263_v27 = vadd.f32 %v2262_v29, %v2150_v44  ;;  %v6280_v43 = vld [vmem:[#allocation5 + $0x740] ss:$16 sps:$4 sm:$0xff]  }
 0x19e   :  { %v2264_v63 = vpop.f32.mrf.mxu1  ;;  %v2153_v13 = vpop.f32.mrf.mxu0 }
 0x19f   :  { %v2154_v10 = vadd.f32 %v2153_v13, %v7229_v37  ;;  %v7410_v12 = vpack.c.bf16 %v2830_v16, %v2822_v14  ;;  %4730 = vmatpush2.bf16.msra.mxu0 %v6199_v47  ;;  %8328 = vst [vmem:[#allocation17_spill] sm:$0xff] %v7412_v18  ;;  %v2265_v34 = vadd.f32 %v2264_v63, %v2152_v23  ;;  %v6282_v37 = vld [vmem:[#allocation5 + $0x744] ss:$16 sps:$4 sm:$0xff]   ;;  %v2837_v29 = vmax.f32 %v2263_v27, 0.0 }
 0x1a0   :  { %v2266_v25 = vpop.f32.mrf.mxu1  ;;  %v2155_v17 = vpop.f32.mrf.mxu0  ;;  %4925 = vmatprep.subr.bf16.mxu0 %v6207_v24  ;;  %4835 = vmatpush2.bf16.msra.mxu1 %v6268_v53 }
 0x1a1   :  { %8327 = vst [vmem:[#allocation15_spill] sm:$0xff] %v7410_v12  ;;  %v2267_v33 = vadd.f32 %v2266_v25, %v2154_v10  ;;  %v2156_v45 = vadd.f32 %v2155_v17, %v7222_v38  ;;  %4678 = vmatprep.mubr.bf16.mxu1 %v7410_v12  ;;  %4836 = vmatprep.subr.bf16.mxu1 %v6276_v6  ;;  %v2838_v47 = vmax.f32 %v2265_v34, 0.0  ;;  %v6286_v6 = vld [vmem:[#allocation5 + $0x720] ss:$16 sps:$4 sm:$0xff]   ;;  %v6294_v10 = vld [vmem:[#allocation5 + $0x704] ss:$16 sps:$4 sm:$0xff]  }
 0x1a2   :  { %v2268_v4 = vpop.f32.mrf.mxu1  ;;  %v2305_v40 = vpop.f32.mrf.mxu0  ;;  %4679 = vmatmul.mubr.bf16.gmra.mxu1 %v7412_v18 }
 0x1a3   :  { %v2269_v9 = vadd.f32 %v2268_v4, %v2156_v45  ;;  %v2845_v21 = vmax.f32 %v2267_v33, 0.0  ;;  %v2306_v56 = vadd.f32 %v2305_v40, %v7420_v20  ;;  %v6292_v4 = vld [vmem:[#allocation5 + $0x700] ss:$16 sps:$4 sm:$0xff]  }
 0x1a4   :  { %v2418_v3 = vpop.f32.mrf.mxu1  ;;  %v2307_v15 = vpop.f32.mrf.mxu0  ;;  %4837 = vmatpush2.bf16.msra.mxu1 %v6274_v51 }
 0x1a5   :  { %v2846_v38 = vmax.f32 %v2269_v9, 0.0  ;;  %v2308_v58 = vadd.f32 %v2307_v15, %v7415_v0  ;;  %4838 = vmatprep.subr.bf16.mxu1 %v6282_v37  ;;  %v7428_v23 = vpack.c.bf16 %v2845_v21, %v2837_v29  ;;  %v2419_v25 = vadd.f32 %v2418_v3, %v2306_v56  ;;  %v6300_v21 = vld [vmem:[#allocation5 + $0x2ec] ss:$16 sps:$4 sm:$0xff]  }
 0x1a6   :  { %v2420_v36 = vpop.f32.mrf.mxu1  ;;  %v2309_v24 = vpop.f32.mrf.mxu0  ;;  %v6213_v56 = vld [vmem:[#allocation5 + $0xcc] ss:$16 sps:$4 sm:$0xff]  }
 0x1a7   :  { %v2310_v53 = vadd.f32 %v2309_v24, %v7420_v20  ;;  %v7426_v16 = vpack.c.bf16 %v2846_v38, %v2838_v47  ;;  %8330 = vst [vmem:[#allocation12_spill] sm:$0xff] %v7428_v23  ;;  %v2421_v19 = vadd.f32 %v2420_v36, %v2308_v58  ;;  %v2727_v15 = vmax.f32 %v2419_v25, 0.0  ;;  %v6205_v36 = vld [vmem:[#allocation5 + $0xe8] ss:$16 sps:$4 sm:$0xff]  }
 0x1a8   :  { %v2422_v14 = vpop.f32.mrf.mxu1  ;;  %v2311_v63 = vpop.f32.mrf.mxu0  ;;  %4839 = vmatpush2.bf16.msra.mxu1 %v6280_v43 }
 0x1a9   :  { %8329 = vst [vmem:[#allocation14_spill] sm:$0xff] %v7426_v16  ;;  %v2423_v44 = vadd.f32 %v2422_v14, %v2310_v53  ;;  %v2312_v13 = vadd.f32 %v2311_v63, %v7415_v0  ;;  %4688 = vmatprep.mubr.bf16.mxu1 %v7426_v16  ;;  %4840 = vmatprep.subr.bf16.mxu1 %v6288_v2  ;;  %v2728_v37 = vmax.f32 %v2421_v19, 0.0 }
 0x1aa   :  { %v2424_v62 = vpop.f32.mrf.mxu1  ;;  %v2315_v17 = vpop.f32.mrf.mxu0  ;;  %4689 = vmatmul.mubr.bf16.gmra.mxu1 %v7428_v23 }
 0x1ab   :  { %v2425_v51 = vadd.f32 %v2424_v62, %v2312_v13  ;;  %v2735_v33 = vmax.f32 %v2423_v44, 0.0  ;;  %v2316_v43 = vadd.f32 %v2315_v17, %v7420_v20  ;;  %v6211_v62 = vld [vmem:[#allocation5 + $0xc8] ss:$16 sps:$4 sm:$0xff]   ;;  %v6219_v17 = vld [vmem:[#allocation5 + $0xac] ss:$16 sps:$4 sm:$0xff]  }
 0x1ac   :  { %v2428_v34 = vpop.f32.mrf.mxu1  ;;  %v2317_v45 = vpop.f32.mrf.mxu0  ;;  %4841 = vmatpush2.bf16.msra.mxu1 %v6286_v6 }
 0x1ad   :  { %v2736_v27 = vmax.f32 %v2425_v51, 0.0  ;;  %v2318_v40 = vadd.f32 %v2317_v45, %v7415_v0  ;;  %4842 = vmatprep.subr.bf16.mxu1 %v6294_v10  ;;  %v7438_v2 = vpack.c.bf16 %v2735_v33, %v2727_v15  ;;  %v2429_v6 = vadd.f32 %v2428_v34, %v2316_v43  ;;  %v6217_v15 = vld [vmem:[#allocation5 + $0xa8] ss:$16 sps:$4 sm:$0xff]  }
 0x1ae   :  { %v2430_v9 = vpop.f32.mrf.mxu1  ;;  %v2319_v3 = vpop.f32.mrf.mxu0 }
 0x1af   :  { %v2320_v47 = vadd.f32 %v2319_v3, %v7420_v20  ;;  %v7436_v58 = vpack.c.bf16 %v2736_v27, %v2728_v37  ;;  %v2431_v24 = vadd.f32 %v2430_v9, %v2318_v40  ;;  %v2743_v37 = vmax.f32 %v2429_v6, 0.0  ;;  %v6223_v6 = vld [vmem:[#allocation5 + $0x88] ss:$16 sps:$4 sm:$0xff]  }
 0x1b0   :  { %v2432_v38 = vpop.f32.mrf.mxu1  ;;  %v2321_v29 = vpop.f32.mrf.mxu0  ;;  %4843 = vmatpush2.bf16.msra.mxu1 %v6292_v4 }
 0x1b1   :  { %v2433_v53 = vadd.f32 %v2432_v38, %v2320_v47  ;;  %v2322_v14 = vadd.f32 %v2321_v29, %v7415_v0  ;;  %4731 = vmatprep.mubr.bf16.mxu0 %v7436_v58  ;;  %5038 = vmatprep.subr.bf16.mxu1 %v6300_v21  ;;  %v2744_v51 = vmax.f32 %v2431_v24, 0.0  ;;  %v6225_v47 = vld [vmem:[#allocation5 + $0x8c] ss:$16 sps:$4 sm:$0xff]  }
 0x1b2   :  { %v2434_v63 = vpop.f32.mrf.mxu1  ;;  %v2325_v19 = vpop.f32.mrf.mxu0  ;;  %4732 = vmatmul.mubr.bf16.vlgmr.msra.gmra.mxu0 %v7438_v2 }
 0x1b3   :  { %v2435_v44 = vadd.f32 %v2434_v63, %v2322_v14  ;;  %4926 = vmatpush1.bf16.msra.mxu0 %v6205_v36  ;;  %v2751_v10 = vmax.f32 %v2433_v53, 0.0  ;;  %v2326_v27 = vadd.f32 %v2325_v19, %v7420_v20 }
 0x1b4   :  { %v2438_v13 = vpop.f32.mrf.mxu1  ;;  %v2327_v25 = vpop.f32.mrf.mxu0  ;;  %4927 = vmatprep.subr.bf16.mxu0 %v6213_v56 }
 0x1b5   :  { %v2752_v33 = vmax.f32 %v2435_v44, 0.0  ;;  %v2328_v45 = vadd.f32 %v2327_v25, %v7415_v0  ;;  %v7448_v43 = vpack.c.bf16 %v2751_v10, %v2743_v37  ;;  %v2439_v24 = vadd.f32 %v2438_v13, %v2326_v27 }
 0x1b6   :  { %v2440_v4 = vpop.f32.mrf.mxu1  ;;  %v2329_v34 = vpop.f32.mrf.mxu0 }
 0x1b7   :  { %v2330_v40 = vadd.f32 %v2329_v34, %v7420_v20  ;;  %4928 = vmatpush1.bf16.msra.mxu0 %v6211_v62  ;;  %v7446_v21 = vpack.c.bf16 %v2752_v33, %v2744_v51  ;;  %v2441_v38 = vadd.f32 %v2440_v4, %v2328_v45  ;;  %v6231_v62 = vld [vmem:[#allocation5 + $0x6c] ss:$16 sps:$4 sm:$0xff]   ;;  %v2759_v33 = vmax.f32 %v2439_v24, 0.0  ;;  %v6229_v34 = vld [vmem:[#allocation5 + $0x68] ss:$16 sps:$4 sm:$0xff]  }
 0x1b8   :  { %v2442_v9 = vpop.f32.mrf.mxu1  ;;  %v2331_v3 = vpop.f32.mrf.mxu0  ;;  %4929 = vmatprep.subr.bf16.mxu0 %v6219_v17 }
 0x1b9   :  { %v2443_v36 = vadd.f32 %v2442_v9, %v2330_v40  ;;  %v2332_v29 = vadd.f32 %v2331_v3, %v7415_v0  ;;  %4741 = vmatprep.mubr.bf16.mxu0 %v7446_v21  ;;  %v2760_v10 = vmax.f32 %v2441_v38, 0.0 }
 0x1ba   :  { %v2444_v56 = vpop.f32.mrf.mxu1  ;;  %v2335_v53 = vpop.f32.mrf.mxu0  ;;  %4742 = vmatmul.mubr.bf16.gmra.mxu0 %v7448_v43 }
 0x1bb   :  { %v2445_v14 = vadd.f32 %v2444_v56, %v2332_v29  ;;  %4930 = vmatpush1.bf16.msra.mxu0 %v6217_v15  ;;  %v2767_v19 = vmax.f32 %v2443_v36, 0.0  ;;  %v2336_v45 = vadd.f32 %v2335_v53, %v7420_v20  ;;  %v6237_v15 = vld [vmem:[#allocation5 + $0x4c] ss:$16 sps:$4 sm:$0xff]  }
 0x1bc   :  { %v2448_v63 = vpop.f32.mrf.mxu1  ;;  %v2337_v44 = vpop.f32.mrf.mxu0  ;;  %4931 = vmatprep.subr.bf16.mxu0 %v6225_v47 }
 0x1bd   :  { %v2768_v25 = vmax.f32 %v2445_v14, 0.0  ;;  %v2338_v17 = vadd.f32 %v2337_v44, %v7415_v0  ;;  %v7458_v40 = vpack.c.bf16 %v2767_v19, %v2759_v33  ;;  %v2449_v29 = vadd.f32 %v2448_v63, %v2336_v45  ;;  %v6235_v14 = vld [vmem:[#allocation5 + $0x48] ss:$16 sps:$4 sm:$0xff]   ;;  %v6243_v44 = vld [vmem:[#allocation5 + $0x2c] ss:$16 sps:$4 sm:$0xff]  }
 0x1be   :  { %v2450_v51 = vpop.f32.mrf.mxu1  ;;  %v2339_v13 = vpop.f32.mrf.mxu0 }
 0x1bf   :  { %v2340_v4 = vadd.f32 %v2339_v13, %v7420_v20  ;;  %4932 = vmatpush1.bf16.msra.mxu0 %v6223_v6  ;;  %v7456_v27 = vpack.c.bf16 %v2768_v25, %v2760_v10  ;;  %v2451_v3 = vadd.f32 %v2450_v51, %v2338_v17  ;;  %v2775_v51 = vmax.f32 %v2449_v29, 0.0 }
 0x1c0   :  { %v2452_v37 = vpop.f32.mrf.mxu1  ;;  %v2341_v9 = vpop.f32.mrf.mxu0  ;;  %4933 = vmatprep.subr.bf16.mxu0 %v6231_v62 }
 0x1c1   :  { %v2453_v47 = vadd.f32 %v2452_v37, %v2340_v4  ;;  %v2342_v38 = vadd.f32 %v2341_v9, %v7415_v0  ;;  %4751 = vmatprep.mubr.bf16.mxu0 %v7456_v27  ;;  %v2776_v62 = vmax.f32 %v2451_v3, 0.0  ;;  %v6241_v37 = vld [vmem:[#allocation5 + $0x28] ss:$16 sps:$4 sm:$0xff]  }
 0x1c2   :  { %v2454_v36 = vpop.f32.mrf.mxu1  ;;  %v2345_v56 = vpop.f32.mrf.mxu0  ;;  %4752 = vmatmul.mubr.bf16.gmra.mxu0 %v7458_v40 }
 0x1c3   :  { %v2455_v24 = vadd.f32 %v2454_v36, %v2342_v38  ;;  %4934 = vmatpush1.bf16.msra.mxu0 %v6229_v34  ;;  %v2783_v6 = vmax.f32 %v2453_v47, 0.0  ;;  %v2346_v33 = vadd.f32 %v2345_v56, %v7420_v20 }
 0x1c4   :  { %v2458_v53 = vpop.f32.mrf.mxu1  ;;  %v2347_v19 = vpop.f32.mrf.mxu0  ;;  %4935 = vmatprep.subr.bf16.mxu0 %v6237_v15  ;;  %v6249_v15 = vld [vmem:[#allocation5 + $0xc] ss:$16 sps:$4 sm:$0xff]  }
 0x1c5   :  { %v2784_v10 = vmax.f32 %v2455_v24, 0.0  ;;  %v2348_v25 = vadd.f32 %v2347_v19, %v7415_v0  ;;  %v7468_v34 = vpack.c.bf16 %v2783_v6, %v2775_v51  ;;  %v2459_v29 = vadd.f32 %v2458_v53, %v2346_v33  ;;  %v6247_v19 = vld [vmem:[#allocation5 + $0x8] ss:$16 sps:$4 sm:$0xff]  }
 0x1c6   :  { %v2460_v17 = vpop.f32.mrf.mxu1  ;;  %v2349_v63 = vpop.f32.mrf.mxu0 }
 0x1c7   :  { %v2350_v45 = vadd.f32 %v2349_v63, %v7420_v20  ;;  %4936 = vmatpush1.bf16.msra.mxu0 %v6235_v14  ;;  %v7466_v4 = vpack.c.bf16 %v2784_v10, %v2776_v62  ;;  %v2461_v3 = vadd.f32 %v2460_v17, %v2348_v25  ;;  %v2791_v63 = vmax.f32 %v2459_v29, 0.0 }
 0x1c8   :  { %v2462_v13 = vpop.f32.mrf.mxu1  ;;  %v2351_v9 = vpop.f32.mrf.mxu0  ;;  %4937 = vmatprep.subr.bf16.mxu0 %v6243_v44  ;;  %v6255_v44 = vld [vmem:[#allocation5 + $0x1ec] ss:$16 sps:$4 sm:$0xff]  }
 0x1c9   :  { %v2463_v47 = vadd.f32 %v2462_v13, %v2350_v45  ;;  %v2352_v38 = vadd.f32 %v2351_v9, %v7415_v0  ;;  %4761 = vmatprep.mubr.bf16.mxu0 %v7466_v4  ;;  %v2792_v10 = vmax.f32 %v2461_v3, 0.0  ;;  %v6261_v3 = vld [vmem:[#allocation5 + $0x1cc] ss:$16 sps:$4 sm:$0xff]  }
 0x1ca   :  { %v2464_v36 = vpop.f32.mrf.mxu1  ;;  %v2355_v56 = vpop.f32.mrf.mxu0  ;;  %4762 = vmatmul.mubr.bf16.gmra.mxu0 %v7468_v34 }
 0x1cb   :  { %v2465_v24 = vadd.f32 %v2464_v36, %v2352_v38  ;;  %4938 = vmatpush1.bf16.msra.mxu0 %v6241_v37  ;;  %v2799_v6 = vmax.f32 %v2463_v47, 0.0  ;;  %v2356_v45 = vadd.f32 %v2355_v56, %v7420_v20  ;;  %v6253_v37 = vld [vmem:[#allocation5 + $0x1e8] ss:$16 sps:$4 sm:$0xff]  }
 0x1cc   :  { %v2468_v14 = vpop.f32.mrf.mxu1  ;;  %v2357_v62 = vpop.f32.mrf.mxu0  ;;  %4939 = vmatprep.subr.bf16.mxu0 %v6249_v15 }
 0x1cd   :  { %v2800_v25 = vmax.f32 %v2465_v24, 0.0  ;;  %v2358_v17 = vadd.f32 %v2357_v62, %v7415_v0  ;;  %v7478_v47 = vpack.c.bf16 %v2799_v6, %v2791_v63  ;;  %v2469_v56 = vadd.f32 %v2468_v14, %v2356_v45 }
 0x1ce   :  { %v2470_v51 = vpop.f32.mrf.mxu1  ;;  %v2359_v53 = vpop.f32.mrf.mxu0 }
 0x1cf   :  { %v2360_v33 = vadd.f32 %v2359_v53, %v7420_v20  ;;  %4940 = vmatpush1.bf16.msra.mxu0 %v6247_v19  ;;  %v7476_v9 = vpack.c.bf16 %v2800_v25, %v2792_v10  ;;  %v2471_v38 = vadd.f32 %v2470_v51, %v2358_v17  ;;  %v6259_v25 = vld [vmem:[#allocation5 + $0x1c8] ss:$16 sps:$4 sm:$0xff]  }
 0x1d0   :  { %v2472_v13 = vpop.f32.mrf.mxu1  ;;  %v2361_v15 = vpop.f32.mrf.mxu0  ;;  %4941 = vmatprep.subr.bf16.mxu0 %v6255_v44  ;;  %v6267_v44 = vld [vmem:[#allocation5 + $0x1ac] ss:$16 sps:$4 sm:$0xff]  }
 0x1d1   :  { %v2473_v36 = vadd.f32 %v2472_v13, %v2360_v33  ;;  %v2362_v24 = vadd.f32 %v2361_v15, %v7415_v0  ;;  %4771 = vmatprep.mubr.bf16.mxu0 %v7476_v9  ;;  %v2808_v53 = vmax.f32 %v2471_v38, 0.0  ;;  %v2807_v13 = vmax.f32 %v2469_v56, 0.0  ;;  %v6273_v38 = vld [vmem:[#allocation5 + $0x18c] ss:$16 sps:$4 sm:$0xff]  }
 0x1d2   :  { %v2474_v29 = vpop.f32.mrf.mxu1  ;;  %v2365_v62 = vpop.f32.mrf.mxu0  ;;  %4772 = vmatmul.mubr.bf16.gmra.mxu0 %v7478_v47 }
 0x1d3   :  { %v2475_v19 = vadd.f32 %v2474_v29, %v2362_v24  ;;  %4942 = vmatpush2.bf16.msra.mxu0 %v6253_v37  ;;  %v2815_v6 = vmax.f32 %v2473_v36, 0.0  ;;  %v2366_v15 = vadd.f32 %v2365_v62, %v7420_v20  ;;  %v6265_v37 = vld [vmem:[#allocation5 + $0x1a8] ss:$16 sps:$4 sm:$0xff]  }
 0x1d4   :  { %v2478_v10 = vpop.f32.mrf.mxu1  ;;  %v2367_v63 = vpop.f32.mrf.mxu0  ;;  %4943 = vmatprep.subr.bf16.mxu0 %v6261_v3 }
 0x1d5   :  { %v2816_v17 = vmax.f32 %v2475_v19, 0.0  ;;  %v2368_v51 = vadd.f32 %v2367_v63, %v7415_v0  ;;  %v7488_v36 = vpack.c.bf16 %v2815_v6, %v2807_v13  ;;  %v2479_v62 = vadd.f32 %v2478_v10, %v2366_v15 }
 0x1d6   :  { %v2480_v33 = vpop.f32.mrf.mxu1  ;;  %v2369_v14 = vpop.f32.mrf.mxu0 }
 0x1d7   :  { %v2370_v45 = vadd.f32 %v2369_v14, %v7420_v20  ;;  %4944 = vmatpush2.bf16.msra.mxu0 %v6259_v25  ;;  %v7486_v24 = vpack.c.bf16 %v2816_v17, %v2808_v53  ;;  %v2481_v29 = vadd.f32 %v2480_v33, %v2368_v51  ;;  %v6271_v17 = vld [vmem:[#allocation5 + $0x188] ss:$16 sps:$4 sm:$0xff]  }
 0x1d8   :  { %v2482_v23 = vpop.f32.mrf.mxu1  ;;  %v2371_v3 = vpop.f32.mrf.mxu0  ;;  %4945 = vmatprep.subr.bf16.mxu0 %v6267_v44  ;;  %v6279_v44 = vld [vmem:[#allocation5 + $0x16c] ss:$16 sps:$4 sm:$0xff]  }
 0x1d9   :  { %v2483_v19 = vadd.f32 %v2482_v23, %v2370_v45  ;;  %v2372_v63 = vadd.f32 %v2371_v3, %v7415_v0  ;;  %4781 = vmatprep.mubr.bf16.mxu0 %v7486_v24  ;;  %v2824_v14 = vmax.f32 %v2481_v29, 0.0  ;;  %v369_v45 = vsub.s32 7, %v7097_v61 }
 0x1da   :  { %v2484_v56 = vpop.f32.mrf.mxu1  ;;  %v2375_v16 = vpop.f32.mrf.mxu0  ;;  %4782 = vmatmul.mubr.bf16.gmra.mxu0 %v7488_v36  ;;  %v2823_v3 = vmax.f32 %v2479_v62, 0.0 }
 0x1db   :  { %v2485_v25 = vadd.f32 %v2484_v56, %v2372_v63  ;;  %4946 = vmatpush2.bf16.msra.mxu0 %v6265_v37  ;;  %v2831_v6 = vmax.f32 %v2483_v19, 0.0  ;;  %v2376_v10 = vadd.f32 %v2375_v16, %v7420_v20  ;;  %v365_v63 = vsub.s32 6, %v7097_v61 }
 0x1dc   :  { %v2488_v53 = vpop.f32.mrf.mxu1  ;;  %v2377_v13 = vpop.f32.mrf.mxu0  ;;  %4947 = vmatprep.subr.bf16.mxu0 %v6273_v38  ;;  %v6277_v38 = vld [vmem:[#allocation5 + $0x168] ss:$16 sps:$4 sm:$0xff]  }
 0x1dd   :  { %v2832_v51 = vmax.f32 %v2485_v25, 0.0  ;;  %v2378_v23 = vadd.f32 %v2377_v13, %v7415_v0  ;;  %v7500_v29 = vpack.c.bf16 %v2831_v6, %v2823_v3  ;;  %v6285_v13 = vld [vmem:[#allocation5 + $0x14c] ss:$16 sps:$4 sm:$0xff]  }
 0x1de   :  { %v2490_v33 = vpop.f32.mrf.mxu1  ;;  %v2379_v15 = vpop.f32.mrf.mxu0 }
 0x1df   :  { %v2380_v37 = vadd.f32 %v2379_v15, %v7420_v20  ;;  %4948 = vmatpush2.bf16.msra.mxu0 %v6271_v17  ;;  %v7498_v19 = vpack.c.bf16 %v2832_v51, %v2824_v14  ;;  %8332 = vst [vmem:[#allocation13_spill] sm:$0xff] %v7500_v29  ;;  %v2491_v18 = vadd.f32 %v2490_v33, %v2378_v23  ;;  %v6474_v20 = vld [vmem:[%s8281_s2] sm:$0xff]  ;;  %v6283_v33 = vld [vmem:[#allocation5 + $0x148] ss:$16 sps:$4 sm:$0xff]   ;;  %v6291_v15 = vld [vmem:[#allocation5 + $0x12c] ss:$16 sps:$4 sm:$0xff]  }
 0x1e0   :  { %v2492_v56 = vpop.f32.mrf.mxu1  ;;  %v2381_v25 = vpop.f32.mrf.mxu0  ;;  %4949 = vmatprep.subr.bf16.mxu0 %v6279_v44  ;;  %v7507_v17 = vrot.slane %v6474_v20, %v369_v45  ;;  %v2489_v14 = vadd.f32 %v2488_v53, %v2376_v10  ;;  %v7509_v51 = vrot.slane %v6474_v20, %v365_v63 }
 0x1e1   :  { %8331 = vst [vmem:[#allocation16_spill] sm:$0xff] %v7498_v19  ;;  %v2493_v12 = vadd.f32 %v2492_v56, %v2380_v37  ;;  %v2382_v62 = vadd.f32 %v2381_v25, %v7415_v0  ;;  %4791 = vmatprep.mubr.bf16.mxu0 %v7498_v19  ;;  %v2840_v37 = vmax.f32 %v2491_v18, 0.0  ;;  %v6297_v18 = vld [vmem:[#allocation5 + $0x10c] ss:$16 sps:$4 sm:$0xff]  }
 0x1e2   :  { %v2494_v16 = vpop.f32.mrf.mxu1  ;;  %v2531_v6 = vpop.f32.mrf.mxu0  ;;  %4792 = vmatmul.mubr.bf16.gmra.mxu0 %v7500_v29  ;;  %v2839_v61 = vmax.f32 %v2489_v14, 0.0 }
 0x1e3   :  { %v2495_v44 = vadd.f32 %v2494_v16, %v2382_v62  ;;  %4950 = vmatpush2.bf16.msra.mxu0 %v6277_v38  ;;  %v2847_v0 = vmax.f32 %v2493_v12, 0.0  ;;  %v2532_v53 = vadd.f32 %v2531_v6, %v7509_v51  ;;  %v6289_v38 = vld [vmem:[#allocation5 + $0x128] ss:$16 sps:$4 sm:$0xff]  }
 0x1e4   :  { %v2644_v23 = vpop.f32.mrf.mxu1  ;;  %v2533_v3 = vpop.f32.mrf.mxu0  ;;  %4951 = vmatprep.subr.bf16.mxu0 %v6285_v13 }
 0x1e5   :  { %v2848_v56 = vmax.f32 %v2495_v44, 0.0  ;;  %v2534_v25 = vadd.f32 %v2533_v3, %v7507_v17  ;;  %v7517_v12 = vpack.c.bf16 %v2847_v0, %v2839_v61  ;;  %v2645_v6 = vadd.f32 %v2644_v23, %v2532_v53  ;;  %v6295_v61 = vld [vmem:[#allocation5 + $0x108] ss:$16 sps:$4 sm:$0xff]  }
 0x1e6   :  { %v2646_v45 = vpop.f32.mrf.mxu1  ;;  %v2535_v10 = vpop.f32.mrf.mxu0 }
 0x1e7   :  { %v2536_v63 = vadd.f32 %v2535_v10, %v7509_v51  ;;  %4952 = vmatpush2.bf16.msra.mxu0 %v6283_v33  ;;  %v7515_v62 = vpack.c.bf16 %v2848_v56, %v2840_v37  ;;  %8334 = vst [vmem:[#allocation18_spill] sm:$0xff] %v7517_v12  ;;  %v2647_v16 = vadd.f32 %v2646_v45, %v2534_v25  ;;  %v8335_v56 = vld [vmem:[#allocation20_spill] sm:$0xff] }
 0x1e8   :  { %v2648_v20 = vpop.f32.mrf.mxu1  ;;  %v2537_v13 = vpop.f32.mrf.mxu0  ;;  %4953 = vmatprep.subr.bf16.mxu0 %v6291_v15  ;;  %v6303_v25 = vld [vmem:[#allocation5 + $0x4ec] ss:$16 sps:$4 sm:$0xff]  }
 0x1e9   :  { %8333 = vst [vmem:[#allocation19_spill] sm:$0xff] %v7515_v62  ;;  %v2649_v44 = vadd.f32 %v2648_v20, %v2536_v63  ;;  %v2538_v3 = vadd.f32 %v2537_v13, %v7507_v17  ;;  %4801 = vmatprep.mubr.bf16.mxu0 %v7515_v62  ;;  %v2730_v45 = vmax.f32 %v2647_v16, 0.0  ;;  %v2729_v13 = vmax.f32 %v2645_v6, 0.0  ;;  %v6306_v16 = vld [vmem:[#allocation5 + $0x2cc] ss:$16 sps:$4 sm:$0xff]  }
 0x1ea   :  { %v2650_v14 = vpop.f32.mrf.mxu1  ;;  %v2541_v29 = vpop.f32.mrf.mxu0  ;;  %4802 = vmatmul.mubr.bf16.gmra.mxu0 %v7517_v12  ;;  %v6301_v12 = vld [vmem:[#allocation5 + $0x4e8] ss:$16 sps:$4 sm:$0xff]  }
 0x1eb   :  { %v2651_v33 = vadd.f32 %v2650_v14, %v2538_v3  ;;  %4954 = vmatpush2.bf16.msra.mxu0 %v6289_v38  ;;  %4957 = vmatprep.mubr.bf16.mxu0 %v8335_v56  ;;  %v2737_v0 = vmax.f32 %v2649_v44, 0.0  ;;  %v2542_v23 = vadd.f32 %v2541_v29, %v7509_v51  ;;  %v6298_v56 = vld [vmem:[#allocation5 + $0x2e8] ss:$16 sps:$4 sm:$0xff]   ;;  %v6309_v29 = vld [vmem:[#allocation5 + $0x4cc] ss:$16 sps:$4 sm:$0xff]  }
 0x1ec   :  { %v2654_v37 = vpop.f32.mrf.mxu1  ;;  %v2543_v15 = vpop.f32.mrf.mxu0  ;;  %4955 = vmatprep.subr.bf16.mxu0 %v6297_v18 }
 0x1ed   :  { %v2738_v10 = vmax.f32 %v2651_v33, 0.0  ;;  %v2544_v63 = vadd.f32 %v2543_v15, %v7507_v17  ;;  %v7528_v44 = vpack.c.bf16 %v2737_v0, %v2729_v13  ;;  %v6307_v13 = vld [vmem:[#allocation5 + $0x4c8] ss:$16 sps:$4 sm:$0xff]  }
 0x1ee   :  { %v2656_v20 = vpop.f32.mrf.mxu1  ;;  %v2545_v53 = vpop.f32.mrf.mxu0 }
 0x1ef   :  { %v2546_v3 = vadd.f32 %v2545_v53, %v7509_v51  ;;  %4956 = vmatpush2.bf16.msra.mxu0 %v6295_v61  ;;  %v7526_v38 = vpack.c.bf16 %v2738_v10, %v2730_v45  ;;  %8337 = vst [vmem:[#allocation23_spill] sm:$0xff] %v7528_v44  ;;  %v2657_v33 = vadd.f32 %v2656_v20, %v2544_v63  ;;  %v8338_v61 = vld [vmem:[#allocation21_spill] sm:$0xff]  ;;  %v8339_v10 = vld [vmem:[#allocation22_spill] sm:$0xff] }
 0x1f0   :  { %v2658_v14 = vpop.f32.mrf.mxu1  ;;  %v2547_v18 = vpop.f32.mrf.mxu0  ;;  %5151 = vmatprep.subr.bf16.mxu0 %v6303_v25  ;;  %v2655_v53 = vadd.f32 %v2654_v37, %v2542_v23  ;;  %v6304_v25 = vld [vmem:[#allocation5 + $0x2c8] ss:$16 sps:$4 sm:$0xff]  }
 0x1f1   :  { %8336 = vst [vmem:[#allocation20_spill] sm:$0xff] %v7526_v38  ;;  %v2659_v15 = vadd.f32 %v2658_v14, %v2546_v3  ;;  %v2548_v6 = vadd.f32 %v2547_v18, %v7507_v17  ;;  %4844 = vmatprep.mubr.bf16.mxu1 %v7526_v38  ;;  %v6312_v3 = vld [vmem:[#allocation5 + $0x2ac] ss:$16 sps:$4 sm:$0xff]   ;;  %v2746_v14 = vmax.f32 %v2657_v33, 0.0 }
 0x1f2   :  { %v2660_v62 = vpop.f32.mrf.mxu1  ;;  %v2551_v19 = vpop.f32.mrf.mxu0  ;;  %4845 = vmatmul.mubr.bf16.vlgmr.msra.gmra.mxu1 %v7528_v44  ;;  %4958 = vmatmul.mubr.bf16.vlgmr.msra.gmra.mxu0 %v8338_v61  ;;  %v6315_v44 = vld [vmem:[#allocation5 + $0x4ac] ss:$16 sps:$4 sm:$0xff]   ;;  %v2745_v61 = vmax.f32 %v2655_v53, 0.0 }
 0x1f3   :  { %v2661_v0 = vadd.f32 %v2660_v62, %v2548_v6  ;;  %4967 = vmatprep.mubr.bf16.mxu0 %v8339_v10  ;;  %5039 = vmatpush1.bf16.msra.mxu1 %v6298_v56  ;;  %v2753_v63 = vmax.f32 %v2659_v15, 0.0  ;;  %v2552_v62 = vadd.f32 %v2551_v19, %v7509_v51 }
 0x1f4   :  { %v2664_v45 = vpop.f32.mrf.mxu1  ;;  %5152 = vmatpush1.bf16.msra.mxu0 %v6301_v12  ;;  %v2553_v20 = vpop.f32.mrf.mxu0  ;;  %5040 = vmatprep.subr.bf16.mxu1 %v6306_v16  ;;  %v6310_v16 = vld [vmem:[#allocation5 + $0x2a8] ss:$16 sps:$4 sm:$0xff]  }
 0x1f5   :  { %v2754_v18 = vmax.f32 %v2661_v0, 0.0  ;;  %v2554_v37 = vadd.f32 %v2553_v20, %v7507_v17  ;;  %5153 = vmatprep.subr.bf16.mxu0 %v6309_v29  ;;  %v7540_v15 = vpack.c.bf16 %v2753_v63, %v2745_v61  ;;  %v6313_v0 = vld [vmem:[#allocation5 + $0x4a8] ss:$16 sps:$4 sm:$0xff]   ;;  %v6318_v20 = vld [vmem:[#allocation5 + $0x28c] ss:$16 sps:$4 sm:$0xff]  }
 0x1f6   :  { %v2666_v23 = vpop.f32.mrf.mxu1  ;;  %v2555_v6 = vpop.f32.mrf.mxu0  ;;  %v6324_v61 = vld [vmem:[#allocation5 + $0x26c] ss:$16 sps:$4 sm:$0xff]  }
 0x1f7   :  { %v2556_v56 = vadd.f32 %v2555_v6, %v7509_v51  ;;  %5041 = vmatpush1.bf16.msra.mxu1 %v6304_v25  ;;  %v7538_v12 = vpack.c.bf16 %v2754_v18, %v2746_v14  ;;  %v2667_v29 = vadd.f32 %v2666_v23, %v2554_v37  ;;  %v6321_v6 = vld [vmem:[#allocation5 + $0x48c] ss:$16 sps:$4 sm:$0xff]   ;;  %v2665_v25 = vadd.f32 %v2664_v45, %v2552_v62  ;;  %v6319_v23 = vld [vmem:[#allocation5 + $0x488] ss:$16 sps:$4 sm:$0xff]  }
 0x1f8   :  { %v2668_v10 = vpop.f32.mrf.mxu1  ;;  %5154 = vmatpush1.bf16.msra.mxu0 %v6307_v13  ;;  %v2557_v33 = vpop.f32.mrf.mxu0  ;;  %5042 = vmatprep.subr.bf16.mxu1 %v6312_v3  ;;  %v6316_v3 = vld [vmem:[#allocation5 + $0x288] ss:$16 sps:$4 sm:$0xff]  }
 0x1f9   :  { %v2669_v38 = vadd.f32 %v2668_v10, %v2556_v56  ;;  %v2558_v53 = vadd.f32 %v2557_v33, %v7507_v17  ;;  %4854 = vmatprep.mubr.bf16.mxu1 %v7538_v12  ;;  %5155 = vmatprep.subr.bf16.mxu0 %v6315_v44  ;;  %v2762_v44 = vmax.f32 %v2667_v29, 0.0  ;;  %v6327_v10 = vld [vmem:[#allocation5 + $0x46c] ss:$16 sps:$4 sm:$0xff]  }
 0x1fa   :  { %v2670_v19 = vpop.f32.mrf.mxu1  ;;  %v2561_v14 = vpop.f32.mrf.mxu0  ;;  %4855 = vmatmul.mubr.bf16.gmra.mxu1 %v7540_v15  ;;  %4968 = vmatmul.mubr.bf16.gmra.mxu0 %v7245_v11  ;;  %v2761_v11 = vmax.f32 %v2665_v25, 0.0 }
 0x1fb   :  { %v2671_v63 = vadd.f32 %v2670_v19, %v2558_v53  ;;  %4977 = vmatprep.mubr.bf16.mxu0 %v7250_v7  ;;  %5043 = vmatpush1.bf16.msra.mxu1 %v6310_v16  ;;  %v2769_v18 = vmax.f32 %v2669_v38, 0.0  ;;  %v2562_v33 = vadd.f32 %v2561_v14, %v7509_v51  ;;  %v6325_v19 = vld [vmem:[#allocation5 + $0x468] ss:$16 sps:$4 sm:$0xff]  }
 0x1fc   :  { %v2674_v13 = vpop.f32.mrf.mxu1  ;;  %5156 = vmatpush1.bf16.msra.mxu0 %v6313_v0  ;;  %v2563_v37 = vpop.f32.mrf.mxu0  ;;  %5044 = vmatprep.subr.bf16.mxu1 %v6318_v20  ;;  %v6322_v0 = vld [vmem:[#allocation5 + $0x268] ss:$16 sps:$4 sm:$0xff]  }
 0x1fd   :  { %v2770_v56 = vmax.f32 %v2671_v63, 0.0  ;;  %v2564_v45 = vadd.f32 %v2563_v37, %v7507_v17  ;;  %5157 = vmatprep.subr.bf16.mxu0 %v6321_v6  ;;  %v7552_v20 = vpack.c.bf16 %v2769_v18, %v2761_v11  ;;  %v6330_v63 = vld [vmem:[#allocation5 + $0x24c] ss:$16 sps:$4 sm:$0xff]  }
 0x1fe   :  { %v2676_v62 = vpop.f32.mrf.mxu1  ;;  %v2565_v53 = vpop.f32.mrf.mxu0  ;;  %v6336_v11 = vld [vmem:[#allocation5 + $0x22c] ss:$16 sps:$4 sm:$0xff]  }
 0x1ff   :  { %v2566_v7 = vadd.f32 %v2565_v53, %v7509_v51  ;;  %5045 = vmatpush1.bf16.msra.mxu1 %v6316_v3  ;;  %v7550_v38 = vpack.c.bf16 %v2770_v56, %v2762_v44  ;;  %v2677_v6 = vadd.f32 %v2676_v62, %v2564_v45  ;;  %v6333_v53 = vld [vmem:[#allocation5 + $0x44c] ss:$16 sps:$4 sm:$0xff]   ;;  %v2675_v3 = vadd.f32 %v2674_v13, %v2562_v33  ;;  %v6331_v62 = vld [vmem:[#allocation5 + $0x448] ss:$16 sps:$4 sm:$0xff]  }
 0x200   :  { %v2678_v16 = vpop.f32.mrf.mxu1  ;;  %5158 = vmatpush1.bf16.msra.mxu0 %v6319_v23  ;;  %v2567_v29 = vpop.f32.mrf.mxu0  ;;  %5046 = vmatprep.subr.bf16.mxu1 %v6324_v61  ;;  %v6328_v61 = vld [vmem:[#allocation5 + $0x248] ss:$16 sps:$4 sm:$0xff]  }
 0x201   :  { %v2679_v37 = vadd.f32 %v2678_v16, %v2566_v7  ;;  %v2568_v25 = vadd.f32 %v2567_v29, %v7507_v17  ;;  %4864 = vmatprep.mubr.bf16.mxu1 %v7550_v38  ;;  %5159 = vmatprep.subr.bf16.mxu0 %v6327_v10  ;;  %v2778_v10 = vmax.f32 %v2677_v6, 0.0  ;;  %v6339_v16 = vld [vmem:[#allocation5 + $0x42c] ss:$16 sps:$4 sm:$0xff]  }
 0x202   :  { %v2680_v14 = vpop.f32.mrf.mxu1  ;;  %v2571_v44 = vpop.f32.mrf.mxu0  ;;  %4865 = vmatmul.mubr.bf16.gmra.mxu1 %v7552_v20  ;;  %4978 = vmatmul.mubr.bf16.gmra.mxu0 %v7267_v52  ;;  %v2777_v52 = vmax.f32 %v2675_v3, 0.0 }
 0x203   :  { %v2681_v18 = vadd.f32 %v2680_v14, %v2568_v25  ;;  %4987 = vmatprep.mubr.bf16.mxu0 %v7279_v31  ;;  %5047 = vmatpush1.bf16.msra.mxu1 %v6322_v0  ;;  %v2785_v56 = vmax.f32 %v2679_v37, 0.0  ;;  %v2572_v29 = vadd.f32 %v2571_v44, %v7509_v51  ;;  %v6337_v14 = vld [vmem:[#allocation5 + $0x428] ss:$16 sps:$4 sm:$0xff]  }
 0x204   :  { %v2684_v23 = vpop.f32.mrf.mxu1  ;;  %5160 = vmatpush1.bf16.msra.mxu0 %v6325_v19  ;;  %v2573_v45 = vpop.f32.mrf.mxu0  ;;  %5048 = vmatprep.subr.bf16.mxu1 %v6330_v63  ;;  %v6334_v63 = vld [vmem:[#allocation5 + $0x228] ss:$16 sps:$4 sm:$0xff]  }
 0x205   :  { %v2786_v7 = vmax.f32 %v2681_v18, 0.0  ;;  %v2574_v13 = vadd.f32 %v2573_v45, %v7507_v17  ;;  %5161 = vmatprep.subr.bf16.mxu0 %v6333_v53  ;;  %v7564_v37 = vpack.c.bf16 %v2785_v56, %v2777_v52  ;;  %v6342_v18 = vld [vmem:[#allocation5 + $0x20c] ss:$16 sps:$4 sm:$0xff]  }
 0x206   :  { %v2686_v33 = vpop.f32.mrf.mxu1  ;;  %v2575_v25 = vpop.f32.mrf.mxu0  ;;  %v6348_v52 = vld [vmem:[#allocation5 + $0x3ec] ss:$16 sps:$4 sm:$0xff]  }
 0x207   :  { %v2576_v31 = vadd.f32 %v2575_v25, %v7509_v51  ;;  %5049 = vmatpush1.bf16.msra.mxu1 %v6328_v61  ;;  %v7562_v19 = vpack.c.bf16 %v2786_v7, %v2778_v10  ;;  %v2687_v53 = vadd.f32 %v2686_v33, %v2574_v13  ;;  %v6345_v25 = vld [vmem:[#allocation5 + $0x40c] ss:$16 sps:$4 sm:$0xff]   ;;  %v2685_v61 = vadd.f32 %v2684_v23, %v2572_v29  ;;  %v6343_v33 = vld [vmem:[#allocation5 + $0x408] ss:$16 sps:$4 sm:$0xff]  }
 0x208   :  { %v2688_v0 = vpop.f32.mrf.mxu1  ;;  %5162 = vmatpush1.bf16.msra.mxu0 %v6331_v62  ;;  %v2577_v6 = vpop.f32.mrf.mxu0  ;;  %5050 = vmatprep.subr.bf16.mxu1 %v6336_v11  ;;  %v6340_v11 = vld [vmem:[#allocation5 + $0x208] ss:$16 sps:$4 sm:$0xff]  }
 0x209   :  { %v2689_v45 = vadd.f32 %v2688_v0, %v2576_v31  ;;  %v2578_v3 = vadd.f32 %v2577_v6, %v7507_v17  ;;  %4874 = vmatprep.mubr.bf16.mxu1 %v7562_v19  ;;  %5163 = vmatprep.subr.bf16.mxu0 %v6339_v16  ;;  %v2794_v16 = vmax.f32 %v2687_v53, 0.0  ;;  %v6351_v0 = vld [vmem:[#allocation5 + $0x5ec] ss:$16 sps:$4 sm:$0xff]  }
 0x20a   :  { %v2690_v44 = vpop.f32.mrf.mxu1  ;;  %v2581_v10 = vpop.f32.mrf.mxu0  ;;  %4875 = vmatmul.mubr.bf16.gmra.mxu1 %v7564_v37  ;;  %4988 = vmatmul.mubr.bf16.gmra.mxu0 %v7287_v26  ;;  %v2793_v26 = vmax.f32 %v2685_v61, 0.0 }
 0x20b   :  { %v2691_v56 = vadd.f32 %v2690_v44, %v2578_v3  ;;  %4997 = vmatprep.mubr.bf16.mxu0 %v7307_v28  ;;  %5051 = vmatpush1.bf16.msra.mxu1 %v6334_v63  ;;  %v2801_v7 = vmax.f32 %v2689_v45, 0.0  ;;  %v2582_v6 = vadd.f32 %v2581_v10, %v7509_v51  ;;  %v6349_v44 = vld [vmem:[#allocation5 + $0x5e8] ss:$16 sps:$4 sm:$0xff]  }
 0x20c   :  { %v2694_v62 = vpop.f32.mrf.mxu1  ;;  %5164 = vmatpush1.bf16.msra.mxu0 %v6337_v14  ;;  %v2583_v13 = vpop.f32.mrf.mxu0  ;;  %5052 = vmatprep.subr.bf16.mxu1 %v6342_v18  ;;  %v6346_v18 = vld [vmem:[#allocation5 + $0x3e8] ss:$16 sps:$4 sm:$0xff]  }
 0x20d   :  { %v2802_v31 = vmax.f32 %v2691_v56, 0.0  ;;  %v2584_v23 = vadd.f32 %v2583_v13, %v7507_v17  ;;  %5165 = vmatprep.subr.bf16.mxu0 %v6345_v25  ;;  %v7576_v45 = vpack.c.bf16 %v2801_v7, %v2793_v26  ;;  %v6354_v56 = vld [vmem:[#allocation5 + $0x3cc] ss:$16 sps:$4 sm:$0xff]  }
 0x20e   :  { %v2696_v29 = vpop.f32.mrf.mxu1  ;;  %v2585_v3 = vpop.f32.mrf.mxu0  ;;  %v6360_v26 = vld [vmem:[#allocation5 + $0x3ac] ss:$16 sps:$4 sm:$0xff]  }
 0x20f   :  { %v2586_v28 = vadd.f32 %v2585_v3, %v7509_v51  ;;  %5053 = vmatpush1.bf16.msra.mxu1 %v6340_v11  ;;  %v7574_v14 = vpack.c.bf16 %v2802_v31, %v2794_v16  ;;  %v2697_v25 = vadd.f32 %v2696_v29, %v2584_v23  ;;  %v6357_v3 = vld [vmem:[#allocation5 + $0x5cc] ss:$16 sps:$4 sm:$0xff]   ;;  %v2695_v11 = vadd.f32 %v2694_v62, %v2582_v6  ;;  %v6355_v29 = vld [vmem:[#allocation5 + $0x5c8] ss:$16 sps:$4 sm:$0xff]  }
 0x210   :  { %v2698_v63 = vpop.f32.mrf.mxu1  ;;  %5166 = vmatpush1.bf16.msra.mxu0 %v6343_v33  ;;  %v2587_v53 = vpop.f32.mrf.mxu0  ;;  %5054 = vmatprep.subr.bf16.mxu1 %v6348_v52  ;;  %v6352_v52 = vld [vmem:[#allocation5 + $0x3c8] ss:$16 sps:$4 sm:$0xff]  }
 0x211   :  { %v2699_v13 = vadd.f32 %v2698_v63, %v2586_v28  ;;  %v2588_v61 = vadd.f32 %v2587_v53, %v7507_v17  ;;  %4884 = vmatprep.mubr.bf16.mxu1 %v7574_v14  ;;  %5167 = vmatprep.subr.bf16.mxu0 %v6351_v0  ;;  %v2810_v0 = vmax.f32 %v2697_v25, 0.0  ;;  %v6363_v63 = vld [vmem:[#allocation5 + $0x5ac] ss:$16 sps:$4 sm:$0xff]  }
 0x212   :  { %v2700_v10 = vpop.f32.mrf.mxu1  ;;  %v2591_v16 = vpop.f32.mrf.mxu0  ;;  %4885 = vmatmul.mubr.bf16.gmra.mxu1 %v7576_v45  ;;  %4998 = vmatmul.mubr.bf16.gmra.mxu0 %v7325_v35  ;;  %v2809_v35 = vmax.f32 %v2695_v11, 0.0 }
 0x213   :  { %v2701_v7 = vadd.f32 %v2700_v10, %v2588_v61  ;;  %5007 = vmatprep.mubr.bf16.mxu0 %v7334_v5  ;;  %5055 = vmatpush2.bf16.msra.mxu1 %v6346_v18  ;;  %v2817_v31 = vmax.f32 %v2699_v13, 0.0  ;;  %v2592_v53 = vadd.f32 %v2591_v16, %v7509_v51  ;;  %v6361_v10 = vld [vmem:[#allocation5 + $0x5a8] ss:$16 sps:$4 sm:$0xff]  }
 0x214   :  { %v2704_v33 = vpop.f32.mrf.mxu1  ;;  %5168 = vmatpush2.bf16.msra.mxu0 %v6349_v44  ;;  %v2593_v23 = vpop.f32.mrf.mxu0  ;;  %5056 = vmatprep.subr.bf16.mxu1 %v6354_v56  ;;  %v6358_v56 = vld [vmem:[#allocation5 + $0x3a8] ss:$16 sps:$4 sm:$0xff]  }
 0x215   :  { %v2818_v28 = vmax.f32 %v2701_v7, 0.0  ;;  %v2594_v62 = vadd.f32 %v2593_v23, %v7507_v17  ;;  %5169 = vmatprep.subr.bf16.mxu0 %v6357_v3  ;;  %v7588_v13 = vpack.c.bf16 %v2817_v31, %v2809_v35  ;;  %v6366_v7 = vld [vmem:[#allocation5 + $0x38c] ss:$16 sps:$4 sm:$0xff]  }
 0x216   :  { %v2706_v6 = vpop.f32.mrf.mxu1  ;;  %v2595_v61 = vpop.f32.mrf.mxu0  ;;  %v6372_v35 = vld [vmem:[#allocation5 + $0x36c] ss:$16 sps:$4 sm:$0xff]  }
 0x217   :  { %v2596_v5 = vadd.f32 %v2595_v61, %v7509_v51  ;;  %5057 = vmatpush2.bf16.msra.mxu1 %v6352_v52  ;;  %v7586_v44 = vpack.c.bf16 %v2818_v28, %v2810_v0  ;;  %v2707_v3 = vadd.f32 %v2706_v6, %v2594_v62  ;;  %v6369_v61 = vld [vmem:[#allocation5 + $0x58c] ss:$16 sps:$4 sm:$0xff]   ;;  %v2705_v52 = vadd.f32 %v2704_v33, %v2592_v53  ;;  %v6367_v6 = vld [vmem:[#allocation5 + $0x588] ss:$16 sps:$4 sm:$0xff]  }
 0x218   :  { %v2708_v18 = vpop.f32.mrf.mxu1  ;;  %5170 = vmatpush2.bf16.msra.mxu0 %v6355_v29  ;;  %v2597_v25 = vpop.f32.mrf.mxu0  ;;  %5058 = vmatprep.subr.bf16.mxu1 %v6360_v26  ;;  %v6364_v26 = vld [vmem:[#allocation5 + $0x388] ss:$16 sps:$4 sm:$0xff]  }
 0x219   :  { %v2709_v23 = vadd.f32 %v2708_v18, %v2596_v5  ;;  %v2598_v11 = vadd.f32 %v2597_v25, %v7507_v17  ;;  %4894 = vmatprep.mubr.bf16.mxu1 %v7586_v44  ;;  %5171 = vmatprep.subr.bf16.mxu0 %v6363_v63  ;;  %v2826_v63 = vmax.f32 %v2707_v3, 0.0  ;;  %v6375_v18 = vld [vmem:[#allocation5 + $0x56c] ss:$16 sps:$4 sm:$0xff]  }
 0x21a   :  { %v2710_v16 = vpop.f32.mrf.mxu1  ;;  %v2601_v0 = vpop.f32.mrf.mxu0  ;;  %4895 = vmatmul.mubr.bf16.gmra.mxu1 %v7588_v13  ;;  %5008 = vmatmul.mubr.bf16.gmra.mxu0 %v7348_v8  ;;  %v2825_v8 = vmax.f32 %v2705_v52, 0.0 }
 0x21b   :  { %v2711_v31 = vadd.f32 %v2710_v16, %v2598_v11  ;;  %5017 = vmatprep.mubr.bf16.mxu0 %v7362_v1  ;;  %5059 = vmatpush2.bf16.msra.mxu1 %v6358_v56  ;;  %v2833_v28 = vmax.f32 %v2709_v23, 0.0  ;;  %v2602_v25 = vadd.f32 %v2601_v0, %v7509_v51  ;;  %v6373_v16 = vld [vmem:[#allocation5 + $0x568] ss:$16 sps:$4 sm:$0xff]  }
 0x21c   :  { %v2714_v29 = vpop.f32.mrf.mxu1  ;;  %5172 = vmatpush2.bf16.msra.mxu0 %v6361_v10  ;;  %v2603_v62 = vpop.f32.mrf.mxu0  ;;  %5060 = vmatprep.subr.bf16.mxu1 %v6366_v7  ;;  %v6370_v7 = vld [vmem:[#allocation5 + $0x368] ss:$16 sps:$4 sm:$0xff]  }
 0x21d   :  { %v2834_v5 = vmax.f32 %v2711_v31, 0.0  ;;  %v2604_v33 = vadd.f32 %v2603_v62, %v7507_v17  ;;  %5173 = vmatprep.subr.bf16.mxu0 %v6369_v61  ;;  %v7600_v23 = vpack.c.bf16 %v2833_v28, %v2825_v8  ;;  %v6378_v31 = vld [vmem:[#allocation5 + $0x34c] ss:$16 sps:$4 sm:$0xff]   ;;  %v2715_v0 = vadd.f32 %v2714_v29, %v2602_v25 }
 0x21e   :  { %v2716_v53 = vpop.f32.mrf.mxu1  ;;  %v2605_v11 = vpop.f32.mrf.mxu0 }
 0x21f   :  { %v2606_v1 = vadd.f32 %v2605_v11, %v7509_v51  ;;  %5061 = vmatpush2.bf16.msra.mxu1 %v6364_v26  ;;  %v7598_v10 = vpack.c.bf16 %v2834_v5, %v2826_v63  ;;  %v2717_v61 = vadd.f32 %v2716_v53, %v2604_v33  ;;  %v6381_v51 = vld [vmem:[#allocation5 + $0x54c] ss:$16 sps:$4 sm:$0xff]   ;;  %v6379_v5 = vld [vmem:[#allocation5 + $0x548] ss:$16 sps:$4 sm:$0xff]   ;;  %v2841_v8 = vmax.f32 %v2715_v0, 0.0 }
 0x220   :  { %v2718_v56 = vpop.f32.mrf.mxu1  ;;  %5174 = vmatpush2.bf16.msra.mxu0 %v6367_v6  ;;  %v2607_v3 = vpop.f32.mrf.mxu0  ;;  %5062 = vmatprep.subr.bf16.mxu1 %v6372_v35  ;;  %v6376_v6 = vld [vmem:[#allocation5 + $0x348] ss:$16 sps:$4 sm:$0xff]   ;;  %v6384_v33 = vld [vmem:[#allocation5 + $0x32c] ss:$16 sps:$4 sm:$0xff]  }
 0x221   :  { %v2719_v62 = vadd.f32 %v2718_v56, %v2606_v1  ;;  %v2608_v52 = vadd.f32 %v2607_v3, %v7507_v17  ;;  %4904 = vmatprep.mubr.bf16.mxu1 %v7598_v10  ;;  %5175 = vmatprep.subr.bf16.mxu0 %v6375_v18  ;;  %v2842_v29 = vmax.f32 %v2717_v61, 0.0  ;;  %v6387_v18 = vld [vmem:[#allocation5 + $0x52c] ss:$16 sps:$4 sm:$0xff]   ;;  %v6385_v56 = vld [vmem:[#allocation5 + $0x528] ss:$16 sps:$4 sm:$0xff]  }
 0x222   :  { %v2720_v26 = vpop.f32.mrf.mxu1  ;;  %v7604_v63 = vpop.f32.mrf.mxu0  ;;  %4905 = vmatmul.mubr.bf16.gmra.mxu1 %v7600_v23  ;;  %5018 = vmatmul.mubr.bf16.gmra.mxu0 %v7376_v32  ;;  %v6393_v3 = vld [vmem:[#allocation5 + $0x50c] ss:$16 sps:$4 sm:$0xff]  }
 0x223   :  { %v2721_v28 = vadd.f32 %v2720_v26, %v2608_v52  ;;  %5027 = vmatprep.mubr.bf16.mxu0 %v7384_v57  ;;  %5063 = vmatpush2.bf16.msra.mxu1 %v6370_v7  ;;  %v2849_v35 = vmax.f32 %v2719_v62, 0.0  ;;  %v6382_v57 = vld [vmem:[#allocation5 + $0x328] ss:$16 sps:$4 sm:$0xff]   ;;  %v6390_v7 = vld [vmem:[#allocation5 + $0x30c] ss:$16 sps:$4 sm:$0xff]  }
 0x224   :  { %5176 = vmatpush2.bf16.msra.mxu0 %v6373_v16  ;;  %v7609_v17 = vpop.f32.mrf.mxu0  ;;  %5064 = vmatprep.subr.bf16.mxu1 %v6378_v31  ;;  %v6388_v31 = vld [vmem:[#allocation5 + $0x308] ss:$16 sps:$4 sm:$0xff]   ;;  %v6396_v52 = vld [vmem:[#allocation5 + $0x6ec] ss:$16 sps:$4 sm:$0xff]  }
 0x225   :  { %v2850_v53 = vmax.f32 %v2721_v28, 0.0  ;;  %5177 = vmatprep.subr.bf16.mxu0 %v6381_v51  ;;  %v7615_v11 = vpack.c.bf16 %v2849_v35, %v2841_v8  ;;  %v6391_v62 = vld [vmem:[#allocation5 + $0x508] ss:$16 sps:$4 sm:$0xff]   ;;  %v6399_v26 = vld [vmem:[#allocation5 + $0x6cc] ss:$16 sps:$4 sm:$0xff]  }
 0x226   :  { %v7611_v25 = vpop.f32.mrf.mxu0  ;;  %v6402_v35 = vld [vmem:[#allocation5 + $0x6ac] ss:$16 sps:$4 sm:$0xff]  }
 0x227   :  { %5065 = vmatpush2.bf16.msra.mxu1 %v6376_v6  ;;  %v7613_v32 = vpack.c.bf16 %v2850_v53, %v2842_v29  ;;  %v6397_v6 = vld [vmem:[#allocation5 + $0x6c8] ss:$16 sps:$4 sm:$0xff]   ;;  %v6408_v8 = vld [vmem:[#allocation5 + $0x66c] ss:$16 sps:$4 sm:$0xff]  }
 0x228   :  { %5178 = vmatpush2.bf16.msra.mxu0 %v6379_v5  ;;  %v7617_v1 = vpop.f32.mrf.mxu0  ;;  %5066 = vmatprep.subr.bf16.mxu1 %v6384_v33 }
 0x229   :  { %4914 = vmatprep.mubr.bf16.mxu1 %v7613_v32  ;;  %5179 = vmatprep.subr.bf16.mxu0 %v6387_v18  ;;  %v6403_v18 = vld [vmem:[#allocation5 + $0x688] ss:$16 sps:$4 sm:$0xff]  }
 0x22a   :  { %v7620_v16 = vpop.f32.mrf.mxu0  ;;  %4915 = vmatmul.mubr.bf16.gmra.mxu1 %v7615_v11  ;;  %5028 = vmatmul.mubr.bf16.gmra.mxu0 %v7397_v59  ;;  %v6394_v59 = vld [vmem:[#allocation5 + $0x6e8] ss:$16 sps:$4 sm:$0xff]  }
 0x22b   :  { %5067 = vmatpush2.bf16.msra.mxu1 %v6382_v57  ;;  %5070 = vmatprep.mubr.bf16.mxu1 %v7270_v42 }
 0x22c   :  { %5180 = vmatpush2.bf16.msra.mxu0 %v6385_v56  ;;  %5183 = vmatprep.mubr.bf16.mxu0 %v7436_v58  ;;  %v7626_v61 = vpop.f32.mrf.mxu0 }
 0x22d   :  { %5068 = vmatprep.subr.bf16.mxu1 %v6390_v7  ;;  %5181 = vmatprep.subr.bf16.mxu0 %v6393_v3 }
 0x22e   :  { %v7628_v51 = vpop.f32.mrf.mxu0 }
 0x22f   :  { %5069 = vmatpush2.bf16.msra.mxu1 %v6388_v31  ;;  %v6409_v31 = vld [vmem:[#allocation5 + $0x648] ss:$16 sps:$4 sm:$0xff]  }
 0x230   :  { %5182 = vmatpush2.bf16.msra.mxu0 %v6391_v62  ;;  %v7630_v0 = vpop.f32.mrf.mxu0  ;;  %5264 = vmatprep.subr.bf16.mxu1 %v6396_v52  ;;  %v6414_v62 = vld [vmem:[#allocation5 + $0x62c] ss:$16 sps:$4 sm:$0xff]  }
 0x232   :  { %v7632_v42 = vpop.f32.mrf.mxu0  ;;  %5071 = vmatmul.mubr.bf16.vlgmr.msra.gmra.mxu1 %v7275_v39  ;;  %v7637_v58 = vpop.f32.mrf.mxu1 }
 0x233   :  { %5184 = vmatmul.mubr.bf16.vlgmr.msra.gmra.mxu0 %v7438_v2  ;;  %5080 = vmatprep.mubr.bf16.mxu1 %v7302_v30  ;;  %v6400_v2 = vld [vmem:[#allocation5 + $0x6a8] ss:$16 sps:$4 sm:$0xff]   ;;  %v6405_v30 = vld [vmem:[#allocation5 + $0x68c] ss:$16 sps:$4 sm:$0xff]  }
 0x234   :  { %5193 = vmatprep.mubr.bf16.mxu0 %v7446_v21  ;;  %5265 = vmatpush1.bf16.msra.mxu1 %v6394_v59  ;;  %v7640_v28 = vpop.f32.mrf.mxu0  ;;  %v7644_v33 = vpop.f32.mrf.mxu1 }
 0x235   :  { %5266 = vmatprep.subr.bf16.mxu1 %v6399_v26 }
 0x236   :  { %v7642_v5 = vpop.f32.mrf.mxu0  ;;  %v7653_v21 = vpop.f32.mrf.mxu1 }
 0x238   :  { %5267 = vmatpush1.bf16.msra.mxu1 %v6397_v6  ;;  %v7646_v39 = vpop.f32.mrf.mxu0  ;;  %v7660_v56 = vpop.f32.mrf.mxu1 }
 0x239   :  { %5268 = vmatprep.subr.bf16.mxu1 %v6402_v35  ;;  %v6415_v35 = vld [vmem:[#allocation5 + $0x608] ss:$16 sps:$4 sm:$0xff]  }
 0x23a   :  { %v7648_v29 = vpop.f32.mrf.mxu0  ;;  %5081 = vmatmul.mubr.bf16.gmra.mxu1 %v7305_v22 }
 0x23b   :  { %5194 = vmatmul.mubr.bf16.gmra.mxu0 %v7448_v43  ;;  %5090 = vmatprep.mubr.bf16.mxu1 %v7329_v50  ;;  %v6406_v43 = vld [vmem:[#allocation5 + $0x668] ss:$16 sps:$4 sm:$0xff]   ;;  %v6411_v50 = vld [vmem:[#allocation5 + $0x64c] ss:$16 sps:$4 sm:$0xff]  }
 0x23c   :  { %5203 = vmatprep.mubr.bf16.mxu0 %v7456_v27  ;;  %5269 = vmatpush1.bf16.msra.mxu1 %v6400_v2  ;;  %v7656_v53 = vpop.f32.mrf.mxu0  ;;  %v7669_v27 = vpop.f32.mrf.mxu1  ;;  %v6420_v2 = vld [vmem:[#allocation5 + $0x7ec] ss:$16 sps:$4 sm:$0xff]  }
 0x23d   :  { %5270 = vmatprep.subr.bf16.mxu1 %v6405_v30 }
 0x23e   :  { %v7658_v57 = vpop.f32.mrf.mxu0  ;;  %v7676_v59 = vpop.f32.mrf.mxu1 }
 0x240   :  { %5271 = vmatpush1.bf16.msra.mxu1 %v6403_v18  ;;  %v7662_v22 = vpop.f32.mrf.mxu0 }
 0x241   :  { %5272 = vmatprep.subr.bf16.mxu1 %v6408_v8 }
 0x242   :  { %v7664_v7 = vpop.f32.mrf.mxu0  ;;  %5091 = vmatmul.mubr.bf16.gmra.mxu1 %v7332_v41 }
 0x243   :  { %5204 = vmatmul.mubr.bf16.gmra.mxu0 %v7458_v40  ;;  %5100 = vmatprep.mubr.bf16.mxu1 %v7357_v46  ;;  %v6412_v40 = vld [vmem:[#allocation5 + $0x628] ss:$16 sps:$4 sm:$0xff]   ;;  %v6417_v46 = vld [vmem:[#allocation5 + $0x60c] ss:$16 sps:$4 sm:$0xff]  }
 0x244   :  { %5213 = vmatprep.mubr.bf16.mxu0 %v7466_v4  ;;  %5273 = vmatpush1.bf16.msra.mxu1 %v6406_v43  ;;  %v7672_v3 = vpop.f32.mrf.mxu0  ;;  %v7685_v4 = vpop.f32.mrf.mxu1  ;;  %v6421_v43 = vld [vmem:[#allocation5 + $0x7c8] ss:$16 sps:$4 sm:$0xff]  }
 0x245   :  { %8340 = vst [vmem:[#allocation21_spill] sm:$0xff] %v7672_v3  ;;  %5274 = vmatprep.subr.bf16.mxu1 %v6411_v50  ;;  %v6426_v50 = vld [vmem:[#allocation5 + $0x7ac] ss:$16 sps:$4 sm:$0xff]  }
 0x246   :  { %v7674_v52 = vpop.f32.mrf.mxu0  ;;  %v7692_v18 = vpop.f32.mrf.mxu1 }
 0x247   :  { %8341 = vst [vmem:[#allocation22_spill] sm:$0xff] %v7674_v52 }
 0x248   :  { %5275 = vmatpush1.bf16.msra.mxu1 %v6409_v31  ;;  %v7678_v41 = vpop.f32.mrf.mxu0 }
 0x249   :  { %8342 = vst [vmem:[#allocation24_spill] sm:$0xff] %v7678_v41  ;;  %5276 = vmatprep.subr.bf16.mxu1 %v6414_v62 }
 0x24a   :  { %v7680_v26 = vpop.f32.mrf.mxu0  ;;  %5101 = vmatmul.mubr.bf16.gmra.mxu1 %v7360_v55 }
 0x24b   :  { %8343 = vst [vmem:[#allocation25_spill] sm:$0xff] %v7680_v26  ;;  %5214 = vmatmul.mubr.bf16.gmra.mxu0 %v7468_v34  ;;  %5110 = vmatprep.mubr.bf16.mxu1 %v7379_v48  ;;  %v6418_v34 = vld [vmem:[#allocation5 + $0x7e8] ss:$16 sps:$4 sm:$0xff]   ;;  %v6423_v48 = vld [vmem:[#allocation5 + $0x7cc] ss:$16 sps:$4 sm:$0xff]  }
 0x24c   :  { %5223 = vmatprep.mubr.bf16.mxu0 %v7476_v9  ;;  %5277 = vmatpush1.bf16.msra.mxu1 %v6412_v40  ;;  %v7688_v6 = vpop.f32.mrf.mxu0  ;;  %v7699_v9 = vpop.f32.mrf.mxu1 }
 0x24d   :  { %8344 = vst [vmem:[#allocation26_spill] sm:$0xff] %v7688_v6  ;;  %5278 = vmatprep.subr.bf16.mxu1 %v6417_v46  ;;  %v8351_v46 = vld [vmem:[#allocation16_spill] sm:$0xff] }
 0x24e   :  { %v7690_v30 = vpop.f32.mrf.mxu0  ;;  %v7704_v31 = vpop.f32.mrf.mxu1 }
 0x24f   :  { %8345 = vst [vmem:[#allocation27_spill] sm:$0xff] %v7690_v30 }
 0x250   :  { %5279 = vmatpush1.bf16.msra.mxu1 %v6415_v35  ;;  %v7694_v55 = vpop.f32.mrf.mxu0  ;;  %v7711_v40 = vpop.f32.mrf.mxu1  ;;  %v6427_v35 = vld [vmem:[#allocation5 + $0x788] ss:$16 sps:$4 sm:$0xff]  }
 0x251   :  { %8346 = vst [vmem:[#allocation28_spill] sm:$0xff] %v7694_v55  ;;  %5280 = vmatprep.subr.bf16.mxu1 %v6420_v2  ;;  %v6432_v2 = vld [vmem:[#allocation5 + $0x76c] ss:$16 sps:$4 sm:$0xff]  }
 0x252   :  { %5111 = vmatmul.mubr.bf16.gmra.mxu1 %v7382_v60  ;;  %v7701_v8 = vpop.f32.mrf.mxu0  ;;  %v6424_v60 = vld [vmem:[#allocation5 + $0x7a8] ss:$16 sps:$4 sm:$0xff]  }
 0x253   :  { %5224 = vmatmul.mubr.bf16.gmra.mxu0 %v7478_v47  ;;  %5120 = vmatprep.mubr.bf16.mxu1 %v7395_v54  ;;  %8347 = vst [vmem:[#allocation29_spill] sm:$0xff] %v7701_v8  ;;  %v6429_v47 = vld [vmem:[#allocation5 + $0x78c] ss:$16 sps:$4 sm:$0xff]   ;;  %v8349_v54 = vld [vmem:[#allocation15_spill] sm:$0xff] }
 0x254   :  { %5233 = vmatprep.mubr.bf16.mxu0 %v7486_v24  ;;  %5281 = vmatpush2.bf16.msra.mxu1 %v6418_v34  ;;  %v7706_v62 = vpop.f32.mrf.mxu0  ;;  %v7716_v34 = vpop.f32.mrf.mxu1  ;;  %v8361_v8 = vld [vmem:[#allocation20_spill] sm:$0xff] }
 0x255   :  { %5282 = vmatprep.subr.bf16.mxu1 %v6423_v48  ;;  %8348 = vst [vmem:[#allocation30_spill] sm:$0xff] %v7706_v62  ;;  %v8359_v62 = vld [vmem:[#allocation12_spill] sm:$0xff] }
 0x256   :  { %v7713_v24 = vpop.f32.mrf.mxu0 }
 0x257   :  { %8350 = vst [vmem:[#allocation15_spill] sm:$0xff] %v7713_v24  ;;  %v7723_v24 = vpop.f32.mrf.mxu1 }
 0x258   :  { %5283 = vmatpush2.bf16.msra.mxu1 %v6421_v43  ;;  %v7718_v48 = vpop.f32.mrf.mxu0  ;;  %v8353_v43 = vld [vmem:[#allocation17_spill] sm:$0xff] }
 0x259   :  { %5284 = vmatprep.subr.bf16.mxu1 %v6426_v50  ;;  %8352 = vst [vmem:[#allocation16_spill] sm:$0xff] %v7718_v48  ;;  %v8354_v50 = vld [vmem:[#allocation13_spill] sm:$0xff]  ;;  %v6438_v48 = vld [vmem:[#allocation5 + $0x72c] ss:$16 sps:$4 sm:$0xff]  }
 0x25a   :  { %5121 = vmatmul.mubr.bf16.gmra.mxu1 %v7399_v49  ;;  %v6430_v49 = vld [vmem:[#allocation5 + $0x768] ss:$16 sps:$4 sm:$0xff]  }
 0x25b   :  { %5234 = vmatmul.mubr.bf16.gmra.mxu0 %v7488_v36  ;;  %5130 = vmatprep.mubr.bf16.mxu1 %v8349_v54  ;;  %v6435_v36 = vld [vmem:[#allocation5 + $0x74c] ss:$16 sps:$4 sm:$0xff]  }
 0x25c   :  { %5243 = vmatprep.mubr.bf16.mxu0 %v8351_v46  ;;  %5285 = vmatpush2.bf16.msra.mxu1 %v6424_v60  ;;  %v8355_v54 = vld [vmem:[#allocation14_spill] sm:$0xff]  ;;  %v7725_v60 = vpop.f32.mrf.mxu0 }
 0x25d   :  { %5286 = vmatprep.subr.bf16.mxu1 %v6429_v47  ;;  %8356 = vst [vmem:[#allocation17_spill] sm:$0xff] %v7725_v60  ;;  %v8357_v47 = vld [vmem:[#allocation19_spill] sm:$0xff]  ;;  %v6433_v46 = vld [vmem:[#allocation5 + $0x748] ss:$16 sps:$4 sm:$0xff]  }
 0x260   :  { %5287 = vmatpush2.bf16.msra.mxu1 %v6427_v35  ;;  %v7728_v35 = vpop.f32.mrf.mxu1 }
 0x261   :  { %5288 = vmatprep.subr.bf16.mxu1 %v6432_v2  ;;  %v7730_v2 = vpop.f32.mrf.mxu0 }
 0x262   :  { %5131 = vmatmul.mubr.bf16.gmra.mxu1 %v8353_v43  ;;  %8358 = vst [vmem:[#allocation13_spill] sm:$0xff] %v7730_v2  ;;  %v6436_v43 = vld [vmem:[#allocation5 + $0x728] ss:$16 sps:$4 sm:$0xff]   ;;  %v7735_v60 = vpop.f32.mrf.mxu1 }
 0x263   :  { %5244 = vmatmul.mubr.bf16.gmra.mxu0 %v8354_v50  ;;  %5140 = vmatprep.mubr.bf16.mxu1 %v8355_v54  ;;  %v6441_v50 = vld [vmem:[#allocation5 + $0x70c] ss:$16 sps:$4 sm:$0xff]  }
 0x264   :  { %5253 = vmatprep.mubr.bf16.mxu0 %v8357_v47  ;;  %5289 = vmatpush2.bf16.msra.mxu1 %v6430_v49  ;;  %v8360_v54 = vld [vmem:[#allocation18_spill] sm:$0xff]  ;;  %v7737_v49 = vpop.f32.mrf.mxu0  ;;  %v7739_v47 = vpop.f32.mrf.mxu1 }
 0x265   :  { %5290 = vmatprep.subr.bf16.mxu1 %v6435_v36  ;;  %8362 = vst [vmem:[#allocation14_spill] sm:$0xff] %v7737_v49  ;;  %v6439_v36 = vld [vmem:[#allocation5 + $0x708] ss:$16 sps:$4 sm:$0xff]  }
 0x266   :  { %v7741_v2 = vpop.f32.mrf.mxu0 }
 0x267   :  { %8363 = vst [vmem:[#allocation19_spill] sm:$0xff] %v7741_v2 }
 0x268   :  { %5291 = vmatpush2.bf16.msra.mxu1 %v6433_v46  ;;  %v8364_v46 = vld [vmem:[#allocation23_spill] sm:$0xff] }
 0x269   :  { %5292 = vmatprep.subr.bf16.mxu1 %v6438_v48 }
 0x26a   :  { %5141 = vmatmul.mubr.bf16.gmra.mxu1 %v8359_v62  ;;  %v7746_v62 = vpop.f32.mrf.mxu1 }
 0x26b   :  { %5254 = vmatmul.mubr.bf16.gmra.mxu0 %v8360_v54  ;;  %5296 = vmatprep.mubr.bf16.mxu1 %v8361_v8  ;;  %8365 = vst [vmem:[#allocation12_spill] sm:$0xff] %v7746_v62 }
 0x26c   :  { %5293 = vmatpush2.bf16.msra.mxu1 %v6436_v43  ;;  %v7753_v43 = vpop.f32.mrf.mxu1 }
 0x26d   :  { %5294 = vmatprep.subr.bf16.mxu1 %v6441_v50  ;;  %8366 = vst [vmem:[#allocation18_spill] sm:$0xff] %v7753_v43 }
 0x270   :  { %5295 = vmatpush2.bf16.msra.mxu1 %v6439_v36  ;;  %v7760_v36 = vpop.f32.mrf.mxu1 }
 0x271   :  { %8367 = vst [vmem:[#allocation20_spill] sm:$0xff] %v7760_v36 }
 0x272   :  { %v7743_v48 = vpop.f32.mrf.mxu0 }
 0x273   :  { %5297 = vmatmul.mubr.bf16.vlgmr.msra.gmra.mxu1 %v8364_v46 }
 0x274   :  { %5306 = vmatprep.mubr.bf16.mxu1 %v7538_v12  ;;  %v7749_v8 = vpop.f32.mrf.mxu0  ;;  %v7767_v12 = vpop.f32.mrf.mxu1 }
 0x275   :  { %8368 = vst [vmem:[#allocation23_spill] sm:$0xff] %v7767_v12 }
 0x276   :  { %v7751_v54 = vpop.f32.mrf.mxu0  ;;  %v7774_v6 = vpop.f32.mrf.mxu1 }
 0x277   :  { %8369 = vst [vmem:[#allocation31_spill] sm:$0xff] %v7774_v6 }
 0x278   :  { %v7755_v50 = vpop.f32.mrf.mxu0 }
 0x27a   :  { %v7757_v49 = vpop.f32.mrf.mxu0 }
 0x27b   :  { %5307 = vmatmul.mubr.bf16.gmra.mxu1 %v7540_v15 }
 0x27c   :  { %5316 = vmatprep.mubr.bf16.mxu1 %v7550_v38  ;;  %v7763_v46 = vpop.f32.mrf.mxu0  ;;  %v7781_v38 = vpop.f32.mrf.mxu1 }
 0x27d   :  { %8370 = vst [vmem:[#allocation32_spill] sm:$0xff] %v7781_v38 }
 0x27e   :  { %v7765_v2 = vpop.f32.mrf.mxu0  ;;  %v7788_v12 = vpop.f32.mrf.mxu1 }
 0x27f   :  { %8371 = vst [vmem:[#allocation33_spill] sm:$0xff] %v7788_v12 }
 0x280   :  { %v7769_v55 = vpop.f32.mrf.mxu0 }
 0x282   :  { %v7771_v30 = vpop.f32.mrf.mxu0 }
 0x283   :  { %5317 = vmatmul.mubr.bf16.gmra.mxu1 %v7552_v20 }
 0x284   :  { %5326 = vmatprep.mubr.bf16.mxu1 %v7562_v19  ;;  %v7777_v15 = vpop.f32.mrf.mxu0  ;;  %v7795_v19 = vpop.f32.mrf.mxu1 }
 0x285   :  { %8372 = vst [vmem:[#allocation34_spill] sm:$0xff] %v7795_v19 }
 0x286   :  { %v7779_v26 = vpop.f32.mrf.mxu0  ;;  %v7802_v38 = vpop.f32.mrf.mxu1 }
 0x287   :  { %8373 = vst [vmem:[#allocation35_spill] sm:$0xff] %v7802_v38 }
 0x288   :  { %v7783_v36 = vpop.f32.mrf.mxu0 }
 0x28a   :  { %v7785_v41 = vpop.f32.mrf.mxu0 }
 0x28b   :  { %5327 = vmatmul.mubr.bf16.gmra.mxu1 %v7564_v37 }
 0x28c   :  { %5336 = vmatprep.mubr.bf16.mxu1 %v7574_v14  ;;  %v7791_v20 = vpop.f32.mrf.mxu0  ;;  %v7809_v14 = vpop.f32.mrf.mxu1 }
 0x28d   :  { %8376 = vst [vmem:[#allocation38_spill] sm:$0xff] %v7809_v14 }
 0x28e   :  { %v7793_v6 = vpop.f32.mrf.mxu0  ;;  %v7816_v19 = vpop.f32.mrf.mxu1 }
 0x28f   :  { %8377 = vst [vmem:[#allocation39_spill] sm:$0xff] %v7816_v19 }
 0x290   :  { %v7797_v43 = vpop.f32.mrf.mxu0 }
 0x292   :  { %v7799_v52 = vpop.f32.mrf.mxu0 }
 0x293   :  { %5337 = vmatmul.mubr.bf16.gmra.mxu1 %v7576_v45 }
 0x294   :  { %5346 = vmatprep.mubr.bf16.mxu1 %v7586_v44  ;;  %v7805_v37 = vpop.f32.mrf.mxu0  ;;  %v7823_v44 = vpop.f32.mrf.mxu1 }
 0x295   :  { %8374 = vst [vmem:[#allocation36_spill] sm:$0xff] %v7805_v37  ;;  %8380 = vst [vmem:[#allocation42_spill] sm:$0xff] %v7823_v44 }
 0x296   :  { %v7807_v12 = vpop.f32.mrf.mxu0  ;;  %v7830_v14 = vpop.f32.mrf.mxu1 }
 0x297   :  { %8375 = vst [vmem:[#allocation37_spill] sm:$0xff] %v7807_v12  ;;  %8383 = vst [vmem:[#allocation45_spill] sm:$0xff] %v7830_v14 }
 0x298   :  { %v7811_v62 = vpop.f32.mrf.mxu0  ;;  %v7842_v44 = vpop.f32.mrf.mxu1 }
 0x299   :  { %8387 = vst [vmem:[#allocation49_spill] sm:$0xff] %v7842_v44 }
 0x29a   :  { %v7813_v3 = vpop.f32.mrf.mxu0 }
 0x29b   :  { %5347 = vmatmul.mubr.bf16.gmra.mxu1 %v7588_v13 }
 0x29c   :  { %5356 = vmatprep.mubr.bf16.mxu1 %v7598_v10  ;;  %v7819_v45 = vpop.f32.mrf.mxu0  ;;  %v7838_v10 = vld [vmem:[%s8283_s4] sm:$0xf]  ;;  %s6547_s4 = smov [#allocation7]  }
 0x29d   :  { %8378 = vst [vmem:[#allocation40_spill] sm:$0xff] %v7819_v45  ;;  %8385 = vst [vmem:[#allocation47_spill] sm:$0xff] %v7838_v10  ;;  %v7859_v45 = vpop.f32.mrf.mxu1  ;;  %s5446_s12 = sshll.u32 %s6547_s4, 4  ;;  %s5447_s12 = int_to_ptr.vmem [resolvable:$true] %s5446_s12 }
 0x29e   :  { %v7821_v38 = vpop.f32.mrf.mxu0  ;;  %8393 = vst [vmem:[#allocation52_spill] sm:$0xff] %v7859_v45  ;;  %s6515_s13 = scalar_lea.vmem %s5447_s12, 8192  ;;  %p6520_p11 = scmp.lt.s32.totalorder %s5447_s12, %s5447_s12 }
 0x29f   :  { %8379 = vst [vmem:[#allocation41_spill] sm:$0xff] %v7821_v38  ;;  %p6516_p10 = scmp.ne.s32.totalorder %s5447_s12, %s6515_s13  ;;  %p6521_p12 = scmp.lt.s32.totalorder %s6515_s13, %s6515_s13 }
 0x2a0   :  { %v7825_v37 = vpop.f32.mrf.mxu0 }
 0x2a1   :  { %8381 = vst [vmem:[#allocation43_spill] sm:$0xff] %v7825_v37  ;;  %p6522_p13 = por %p6521_p12, %p6520_p11 }
 0x2a2   :  { %v7827_v12 = vpop.f32.mrf.mxu0 }
 0x2a3   :  { %8382 = vst [vmem:[#allocation44_spill] sm:$0xff] %v7827_v12  ;;  %5357 = vmatmul.mubr.bf16.gmra.mxu1 %v7600_v23  ;;  %v8389_v12 = vld [vmem:[#allocation11_spill] sm:$0xff]  ;;  %p6523_p0 = pnand %p6522_p13, %p6516_p10 }
 0x2a4   :  { %5366 = vmatprep.mubr.bf16.mxu1 %v7613_v32  ;;  %v7833_v13 = vpop.f32.mrf.mxu0  ;;  %v8390_v38 = vsub.s32 0, %v8389_v12  ;;  %v8392_v32 = vsub.s32 1, %v8389_v12  ;;  %v7870_v12 = vpop.f32.mrf.mxu1 }
 0x2a5   :  { %8384 = vst [vmem:[#allocation46_spill] sm:$0xff] %v7833_v13  ;;  %8396 = vst [vmem:[#allocation55_spill] sm:$0xff] %v7870_v12 }
 0x2a6   :  { %v7840_v19 = vpop.f32.mrf.mxu0  ;;  %v7849_v23 = vrot.slane %v7838_v10, %v8390_v38  ;;  %v7856_v13 = vrot.slane %v7838_v10, %v8392_v32 }
 0x2a7   :  { %8386 = vst [vmem:[#allocation48_spill] sm:$0xff] %v7840_v19 }
 0x2a8   :  { %v7844_v37 = vpop.f32.mrf.mxu0  ;;  %v4508_v44 = vadd.f32 %v7604_v63, %v7849_v23  ;;  %v4510_v38 = vadd.f32 %v7609_v17, %v7856_v13 }
 0x2a9   :  { %8388 = vst [vmem:[#allocation50_spill] sm:$0xff] %v7844_v37 }
 0x2aa   :  { %v7851_v14 = vpop.f32.mrf.mxu0  ;;  %v4623_v10 = vadd.f32 %v7644_v33, %v4510_v38 }
 0x2ab   :  { %8391 = vst [vmem:[#allocation51_spill] sm:$0xff] %v7851_v14  ;;  %5367 = vmatmul.mubr.bf16.gmra.mxu1 %v7615_v11  ;;  %v4621_v14 = vadd.f32 %v7637_v58, %v4508_v44  ;;  %v4512_v11 = vadd.f32 %v7611_v25, %v7849_v23  ;;  %v4518_v25 = vadd.f32 %v7620_v16, %v7849_v23 }
 0x2ac   :  { %v7861_v19 = vpop.f32.mrf.mxu0  ;;  %v4736_v58 = vadd.f32 %v7749_v8, %v4623_v10 }
 0x2ad   :  { %8394 = vst [vmem:[#allocation53_spill] sm:$0xff] %v7861_v19  ;;  %v4734_v19 = vadd.f32 %v7743_v48, %v4621_v14  ;;  %v4625_v17 = vadd.f32 %v7653_v21, %v4512_v11  ;;  %v4631_v21 = vadd.f32 %v7669_v27, %v4518_v25  ;;  %v4524_v27 = vadd.f32 %v7630_v0, %v7856_v13 }
 0x2ae   :  { %v7865_v37 = vpop.f32.mrf.mxu0 }
 0x2af   :  { %8395 = vst [vmem:[#allocation54_spill] sm:$0xff] %v7865_v37  ;;  %v4514_v37 = vadd.f32 %v7617_v1, %v7856_v13  ;;  %v4738_v48 = vadd.f32 %v7751_v54, %v4625_v17  ;;  %v4520_v1 = vadd.f32 %v7626_v61, %v7856_v13 }
 0x2b0   :  { %v7872_v32 = vpop.f32.mrf.mxu0 }
 0x2b1   :  { %8397 = vst [vmem:[#allocation56_spill] sm:$0xff] %v7872_v32  ;;  %v4627_v33 = vadd.f32 %v7660_v56, %v4514_v37  ;;  %v4522_v56 = vadd.f32 %v7628_v51, %v7849_v23  ;;  %v4633_v54 = vadd.f32 %v7676_v59, %v4520_v1  ;;  %v4528_v59 = vadd.f32 %v7632_v42, %v7849_v23 }
 0x2b2   :  { %v4846_v45 = vpop.f32.mrf.mxu1  ;;  %v7878_v63 = vpop.f32.mrf.mxu0 }
 0x2b3   :  { %8398 = vst [vmem:[#allocation57_spill] sm:$0xff] %v7878_v63  ;;  %v4847_v44 = vadd.f32 %v4846_v45, %v4734_v19  ;;  %v4740_v8 = vadd.f32 %v7755_v50, %v4627_v33  ;;  %v4635_v50 = vadd.f32 %v7685_v4, %v4522_v56  ;;  %v4746_v11 = vadd.f32 %v7763_v46, %v4633_v54 }
 0x2b4   :  { %v4848_v12 = vpop.f32.mrf.mxu1  ;;  %v7884_v32 = vpop.f32.mrf.mxu0  ;;  %v4530_v4 = vadd.f32 %v7640_v28, %v7856_v13  ;;  %v4641_v46 = vadd.f32 %v7699_v9, %v4528_v59 }
 0x2b5   :  { %5377 = vst [vmem:[#allocation7] sm:$0xff] %v4847_v44  ;;  %v4849_v14 = vadd.f32 %v4848_v12, %v4736_v58  ;;  %v4744_v12 = vadd.f32 %v7757_v49, %v4631_v21  ;;  %v4637_v49 = vadd.f32 %v7692_v18, %v4524_v27  ;;  %v4748_v44 = vadd.f32 %v7765_v2, %v4635_v50 }
 0x2b6   :  { %v4850_v38 = vpop.f32.mrf.mxu1  ;;  %v7890_v63 = vpop.f32.mrf.mxu0  ;;  %v4532_v18 = vadd.f32 %v7642_v5, %v7849_v23  ;;  %v4643_v2 = vadd.f32 %v7704_v31, %v4530_v4  ;;  %v4754_v1 = vadd.f32 %v7771_v30, %v4641_v46  ;;  %v4538_v30 = vadd.f32 %v7648_v29, %v7849_v23  ;;  %v8400_v46 = vld [vmem:[#allocation12_spill] sm:$0xff] }
 0x2b7   :  { %5378 = vst [vmem:[#allocation7 + $0x8] sm:$0xff] %v4849_v14  ;;  %v4851_v19 = vadd.f32 %v4850_v38, %v4738_v48  ;;  %v4750_v48 = vadd.f32 %v7769_v55, %v4637_v49  ;;  %v4534_v55 = vadd.f32 %v7646_v39, %v7856_v13 }
 0x2b8   :  { %v4852_v45 = vpop.f32.mrf.mxu1  ;;  %v7896_v16 = vpop.f32.mrf.mxu0  ;;  %v4645_v9 = vadd.f32 %v7711_v40, %v4532_v18  ;;  %v4540_v40 = vadd.f32 %v7656_v53, %v7856_v13 }
 0x2b9   :  { %5381 = vst [vmem:[#allocation7 + $0x20] sm:$0xff] %v4851_v19  ;;  %v4853_v37 = vadd.f32 %v4852_v45, %v4740_v8  ;;  %v4756_v19 = vadd.f32 %v7777_v15, %v4643_v2  ;;  %v4647_v31 = vadd.f32 %v7716_v34, %v4534_v55  ;;  %v4651_v15 = vadd.f32 %v7723_v24, %v4538_v30  ;;  %v8402_v2 = vld [vmem:[#allocation18_spill] sm:$0xff]  ;;  %v8405_v30 = vld [vmem:[#allocation36_spill] sm:$0xff] }
 0x2ba   :  { %v4856_v10 = vpop.f32.mrf.mxu1  ;;  %v7902_v61 = vpop.f32.mrf.mxu0  ;;  %v4758_v54 = vadd.f32 %v7779_v26, %v4645_v9  ;;  %v4542_v26 = vadd.f32 %v7658_v57, %v7849_v23  ;;  %v4653_v34 = vadd.f32 %v7728_v35, %v4540_v40  ;;  %v4544_v24 = vadd.f32 %v7662_v22, %v7856_v13  ;;  %v8406_v40 = vld [vmem:[#allocation25_spill] sm:$0xff] }
 0x2bb   :  { %5382 = vst [vmem:[#allocation7 + $0x28] sm:$0xff] %v4853_v37  ;;  %v4857_v17 = vadd.f32 %v4856_v10, %v4744_v12  ;;  %v4760_v10 = vadd.f32 %v7783_v36, %v4647_v31 }
 0x2bc   :  { %v4858_v58 = vpop.f32.mrf.mxu1  ;;  %v7908_v51 = vpop.f32.mrf.mxu0  ;;  %v4655_v36 = vadd.f32 %v7735_v60, %v4542_v26  ;;  %v4766_v59 = vadd.f32 %v7791_v20, %v4653_v34  ;;  %v4657_v35 = vadd.f32 %v7739_v47, %v4544_v24  ;;  %v8399_v60 = vld [vmem:[#allocation21_spill] sm:$0xff]  ;;  %v8401_v47 = vld [vmem:[#allocation22_spill] sm:$0xff]  ;;  %v8411_v24 = vld [vmem:[#allocation31_spill] sm:$0xff] }
 0x2bd   :  { %5385 = vst [vmem:[#allocation7 + $0x40] sm:$0xff] %v4857_v17  ;;  %v4859_v25 = vadd.f32 %v4858_v58, %v4746_v11  ;;  %v4764_v11 = vadd.f32 %v7785_v41, %v4651_v15  ;;  %v4548_v41 = vadd.f32 %v7664_v7, %v7849_v23  ;;  %v4550_v20 = vadd.f32 %v8399_v60, %v7856_v13  ;;  %v8407_v15 = vld [vmem:[#allocation23_spill] sm:$0xff] }
 0x2be   :  { %v4860_v33 = vpop.f32.mrf.mxu1  ;;  %v7914_v0 = vpop.f32.mrf.mxu0 }
 0x2bf   :  { %5386 = vst [vmem:[#allocation7 + $0x48] sm:$0xff] %v4859_v25  ;;  %v4861_v14 = vadd.f32 %v4860_v33, %v4748_v44  ;;  %v4768_v25 = vadd.f32 %v7793_v6, %v4655_v36  ;;  %v4552_v6 = vadd.f32 %v8401_v47, %v7849_v23  ;;  %v8418_v47 = vld [vmem:[#allocation40_spill] sm:$0xff] }
 0x2c0   :  { %v4862_v38 = vpop.f32.mrf.mxu1  ;;  %v7920_v42 = vpop.f32.mrf.mxu0 }
 0x2c1   :  { %5389 = vst [vmem:[#allocation7 + $0x60] sm:$0xff] %v4861_v14  ;;  %v4863_v21 = vadd.f32 %v4862_v38, %v4750_v48  ;;  %v4661_v48 = vadd.f32 %v8400_v46, %v4548_v41  ;;  %v4770_v14 = vadd.f32 %v7797_v43, %v4657_v35  ;;  %v8413_v35 = vld [vmem:[#allocation27_spill] sm:$0xff] }
 0x2c2   :  { %v4866_v8 = vpop.f32.mrf.mxu1  ;;  %v7926_v28 = vpop.f32.mrf.mxu0 }
 0x2c3   :  { %5390 = vst [vmem:[#allocation7 + $0x68] sm:$0xff] %v4863_v21  ;;  %v4867_v45 = vadd.f32 %v4866_v8, %v4754_v1  ;;  %v4663_v1 = vadd.f32 %v8402_v2, %v4550_v20  ;;  %v4774_v21 = vadd.f32 %v7799_v52, %v4661_v48  ;;  %v4558_v52 = vadd.f32 %v8406_v40, %v7849_v23  ;;  %v8425_v40 = vld [vmem:[#allocation35_spill] sm:$0xff] }
 0x2c4   :  { %v4868_v56 = vpop.f32.mrf.mxu1  ;;  %v7932_v5 = vpop.f32.mrf.mxu0 }
 0x2c5   :  { %5393 = vst [vmem:[#allocation7 + $0x80] sm:$0xff] %v4867_v45  ;;  %v4869_v12 = vadd.f32 %v4868_v56, %v4756_v19  ;;  %v8403_v19 = vld [vmem:[#allocation24_spill] sm:$0xff]  ;;  %v4776_v31 = vadd.f32 %v8405_v30, %v4663_v1  ;;  %v4671_v36 = vadd.f32 %v8411_v24, %v4558_v52 }
 0x2c6   :  { %v4870_v37 = vpop.f32.mrf.mxu1  ;;  %v7938_v39 = vpop.f32.mrf.mxu0  ;;  %v4554_v43 = vadd.f32 %v8403_v19, %v7856_v13  ;;  %v8404_v45 = vld [vmem:[#allocation20_spill] sm:$0xff] }
 0x2c7   :  { %5394 = vst [vmem:[#allocation7 + $0x88] sm:$0xff] %v4869_v12  ;;  %v4871_v27 = vadd.f32 %v4870_v37, %v4758_v54  ;;  %v4665_v56 = vadd.f32 %v8404_v45, %v4552_v6  ;;  %v4784_v60 = vadd.f32 %v7813_v3, %v4671_v36  ;;  %v8430_v36 = vld [vmem:[#allocation44_spill] sm:$0xff] }
 0x2c8   :  { %v4872_v50 = vpop.f32.mrf.mxu1  ;;  %v7944_v29 = vpop.f32.mrf.mxu0 }
 0x2c9   :  { %5397 = vst [vmem:[#allocation7 + $0xa0] sm:$0xff] %v4871_v27  ;;  %v4873_v17 = vadd.f32 %v4872_v50, %v4760_v10  ;;  %v4667_v10 = vadd.f32 %v8407_v15, %v4554_v43  ;;  %v8408_v27 = vld [vmem:[#allocation37_spill] sm:$0xff]  ;;  %v8426_v15 = vld [vmem:[#allocation43_spill] sm:$0xff] }
 0x2ca   :  { %v4876_v58 = vpop.f32.mrf.mxu1  ;;  %v7950_v53 = vpop.f32.mrf.mxu0  ;;  %v4778_v50 = vadd.f32 %v8408_v27, %v4665_v56  ;;  %v8422_v43 = vld [vmem:[#allocation41_spill] sm:$0xff] }
 0x2cb   :  { %5398 = vst [vmem:[#allocation7 + $0xa8] sm:$0xff] %v4873_v17  ;;  %v4877_v49 = vadd.f32 %v4876_v58, %v4764_v11  ;;  %v8410_v17 = vld [vmem:[#allocation26_spill] sm:$0xff] }
 0x2cc   :  { %v4878_v44 = vpop.f32.mrf.mxu1  ;;  %v7956_v57 = vpop.f32.mrf.mxu0  ;;  %v4560_v58 = vadd.f32 %v8410_v17, %v7856_v13 }
 0x2cd   :  { %5401 = vst [vmem:[#allocation7 + $0xc0] sm:$0xff] %v4877_v49  ;;  %v4879_v33 = vadd.f32 %v4878_v44, %v4766_v59  ;;  %v4780_v59 = vadd.f32 %v7811_v62, %v4667_v10 }
 0x2ce   :  { %v4880_v4 = vpop.f32.mrf.mxu1  ;;  %v7962_v22 = vpop.f32.mrf.mxu0 }
 0x2cf   :  { %5402 = vst [vmem:[#allocation7 + $0xc8] sm:$0xff] %v4879_v33  ;;  %v4881_v38 = vadd.f32 %v4880_v4, %v4768_v25  ;;  %v4562_v25 = vadd.f32 %v8413_v35, %v7849_v23  ;;  %v8414_v33 = vld [vmem:[#allocation32_spill] sm:$0xff] }
 0x2d0   :  { %v4882_v18 = vpop.f32.mrf.mxu1  ;;  %v7968_v7 = vpop.f32.mrf.mxu0  ;;  %v4673_v4 = vadd.f32 %v8414_v33, %v4560_v58  ;;  %v8429_v58 = vld [vmem:[#allocation38_spill] sm:$0xff] }
 0x2d1   :  { %5405 = vst [vmem:[#allocation7 + $0xe0] sm:$0xff] %v4881_v38  ;;  %v4883_v8 = vadd.f32 %v4882_v18, %v4770_v14  ;;  %v8416_v14 = vld [vmem:[#allocation28_spill] sm:$0xff]  ;;  %v8417_v38 = vld [vmem:[#allocation33_spill] sm:$0xff] }
 0x2d2   :  { %v4886_v55 = vpop.f32.mrf.mxu1  ;;  %v7974_v9 = vpop.f32.mrf.mxu0  ;;  %v4564_v62 = vadd.f32 %v8416_v14, %v7856_v13  ;;  %v4675_v18 = vadd.f32 %v8417_v38, %v4562_v25  ;;  %v4786_v6 = vadd.f32 %v8418_v47, %v4673_v4  ;;  %v8432_v25 = vld [vmem:[#allocation16_spill] sm:$0xff]  ;;  %v8433_v4 = vld [vmem:[#allocation39_spill] sm:$0xff] }
 0x2d3   :  { %5406 = vst [vmem:[#allocation7 + $0xe8] sm:$0xff] %v4883_v8  ;;  %v4887_v54 = vadd.f32 %v4886_v55, %v4774_v21  ;;  %v8420_v8 = vld [vmem:[#allocation29_spill] sm:$0xff]  ;;  %v8421_v55 = vld [vmem:[#allocation34_spill] sm:$0xff]  ;;  %v4574_v33 = vadd.f32 %v8432_v25, %v7856_v13  ;;  %v8449_v25 = vld [vmem:[#allocation52_spill] sm:$0xff] }
 0x2d4   :  { %v4888_v12 = vpop.f32.mrf.mxu1  ;;  %v7980_v37 = vpop.f32.mrf.mxu0  ;;  %v4568_v3 = vadd.f32 %v8420_v8, %v7849_v23  ;;  %v4677_v19 = vadd.f32 %v8421_v55, %v4564_v62  ;;  %v4788_v45 = vadd.f32 %v8422_v43, %v4675_v18  ;;  %v8436_v18 = vld [vmem:[#allocation17_spill] sm:$0xff] }
 0x2d5   :  { %5409 = vst [vmem:[#allocation7 + $0x100] sm:$0xff] %v4887_v54  ;;  %v4889_v26 = vadd.f32 %v4888_v12, %v4776_v31  ;;  %v8424_v54 = vld [vmem:[#allocation30_spill] sm:$0xff]  ;;  %v4578_v47 = vadd.f32 %v8436_v18, %v7849_v23  ;;  %v8440_v43 = vld [vmem:[#allocation13_spill] sm:$0xff] }
 0x2d6   :  { %v4890_v34 = vpop.f32.mrf.mxu1  ;;  %v7986_v11 = vpop.f32.mrf.mxu0  ;;  %v4570_v12 = vadd.f32 %v8424_v54, %v7856_v13  ;;  %v4681_v52 = vadd.f32 %v8425_v40, %v4568_v3  ;;  %v4790_v10 = vadd.f32 %v8426_v15, %v4677_v19  ;;  %v8442_v54 = vld [vmem:[#allocation50_spill] sm:$0xff] }
 0x2d7   :  { %8409 = vst [vmem:[#allocation21_spill] sm:$0xff] %v7986_v11  ;;  %5410 = vst [vmem:[#allocation7 + $0x108] sm:$0xff] %v4889_v26  ;;  %v4891_v49 = vadd.f32 %v4890_v34, %v4778_v50  ;;  %v8428_v34 = vld [vmem:[#allocation15_spill] sm:$0xff]  ;;  %v8453_v18 = vld [vmem:[#allocation54_spill] sm:$0xff] }
 0x2d8   :  { %v4892_v44 = vpop.f32.mrf.mxu1  ;;  %v7992_v41 = vpop.f32.mrf.mxu0  ;;  %v4572_v17 = vadd.f32 %v8428_v34, %v7849_v23  ;;  %v4683_v24 = vadd.f32 %v8429_v58, %v4570_v12 }
 0x2d9   :  { %8412 = vst [vmem:[#allocation12_spill] sm:$0xff] %v7992_v41  ;;  %5413 = vst [vmem:[#allocation7 + $0x120] sm:$0xff] %v4891_v49  ;;  %v4893_v20 = vadd.f32 %v4892_v44, %v4780_v59  ;;  %v4794_v59 = vadd.f32 %v8430_v36, %v4681_v52 }
 0x2da   :  { %v4896_v46 = vpop.f32.mrf.mxu1  ;;  %v7998_v48 = vpop.f32.mrf.mxu0 }
 0x2db   :  { %8415 = vst [vmem:[#allocation22_spill] sm:$0xff] %v7998_v48  ;;  %5414 = vst [vmem:[#allocation7 + $0x128] sm:$0xff] %v4893_v20  ;;  %v4897_v2 = vadd.f32 %v4896_v46, %v4784_v60  ;;  %v4685_v60 = vadd.f32 %v8433_v4, %v4572_v17  ;;  %v8434_v20 = vld [vmem:[#allocation46_spill] sm:$0xff]  ;;  %v8446_v17 = vld [vmem:[#allocation51_spill] sm:$0xff] }
 0x2dc   :  { %v4898_v1 = vpop.f32.mrf.mxu1  ;;  %v8004_v21 = vpop.f32.mrf.mxu0  ;;  %v4796_v46 = vadd.f32 %v8434_v20, %v4683_v24  ;;  %v8450_v4 = vld [vmem:[#allocation53_spill] sm:$0xff] }
 0x2dd   :  { %8419 = vst [vmem:[#allocation18_spill] sm:$0xff] %v8004_v21  ;;  %5417 = vst [vmem:[#allocation7 + $0x140] sm:$0xff] %v4897_v2  ;;  %v4899_v56 = vadd.f32 %v4898_v1, %v4786_v6  ;;  %v8437_v6 = vld [vmem:[#allocation42_spill] sm:$0xff]  ;;  %v8438_v1 = vld [vmem:[#allocation48_spill] sm:$0xff] }
 0x2de   :  { %v4900_v30 = vpop.f32.mrf.mxu1  ;;  %v8010_v31 = vpop.f32.mrf.mxu0  ;;  %v4687_v2 = vadd.f32 %v8437_v6, %v4574_v33  ;;  %v4798_v8 = vadd.f32 %v8438_v1, %v4685_v60 }
 0x2df   :  { %8423 = vst [vmem:[#allocation24_spill] sm:$0xff] %v8010_v31  ;;  %5418 = vst [vmem:[#allocation7 + $0x148] sm:$0xff] %v4899_v56  ;;  %v4901_v27 = vadd.f32 %v4900_v30, %v4788_v45  ;;  %v4580_v45 = vadd.f32 %v8440_v43, %v7856_v13  ;;  %v8441_v56 = vld [vmem:[#allocation45_spill] sm:$0xff] }
 0x2e0   :  { %v4902_v50 = vpop.f32.mrf.mxu1  ;;  %v8016_v26 = vpop.f32.mrf.mxu0  ;;  %v4691_v30 = vadd.f32 %v8441_v56, %v4578_v47  ;;  %v4800_v12 = vadd.f32 %v8442_v54, %v4687_v2 }
 0x2e1   :  { %8427 = vst [vmem:[#allocation20_spill] sm:$0xff] %v8016_v26  ;;  %5421 = vst [vmem:[#allocation7 + $0x160] sm:$0xff] %v4901_v27  ;;  %v4903_v49 = vadd.f32 %v4902_v50, %v4790_v10  ;;  %v8444_v10 = vld [vmem:[#allocation14_spill] sm:$0xff]  ;;  %v8445_v50 = vld [vmem:[#allocation49_spill] sm:$0xff] }
 0x2e2   :  { %v4906_v44 = vpop.f32.mrf.mxu1  ;;  %v8022_v35 = vpop.f32.mrf.mxu0  ;;  %v4582_v27 = vadd.f32 %v8444_v10, %v7849_v23  ;;  %v4693_v34 = vadd.f32 %v8445_v50, %v4580_v45  ;;  %v4804_v58 = vadd.f32 %v8446_v17, %v4691_v30  ;;  %v8467_v26 = vld [vmem:[#allocation11_spill] sm:$0xff] }
 0x2e3   :  { %8431 = vst [vmem:[#allocation36_spill] sm:$0xff] %v8022_v35  ;;  %5422 = vst [vmem:[#allocation7 + $0x168] sm:$0xff] %v4903_v49  ;;  %v4907_v14 = vadd.f32 %v4906_v44, %v4794_v59  ;;  %v8448_v49 = vld [vmem:[#allocation19_spill] sm:$0xff]  ;;  %v8468_v31 = vsub.s32 2, %v8467_v26  ;;  %v8471_v21 = vsub.s32 3, %v8467_v26 }
 0x2e4   :  { %v4908_v62 = vpop.f32.mrf.mxu1  ;;  %v8028_v38 = vpop.f32.mrf.mxu0  ;;  %v4584_v44 = vadd.f32 %v8448_v49, %v7856_v13  ;;  %v4695_v33 = vadd.f32 %v8449_v25, %v4582_v27  ;;  %v4806_v60 = vadd.f32 %v8450_v4, %v4693_v34 }
 0x2e5   :  { %8435 = vst [vmem:[#allocation25_spill] sm:$0xff] %v8028_v38  ;;  %5425 = vst [vmem:[#allocation7 + $0x180] sm:$0xff] %v4907_v14  ;;  %v4909_v3 = vadd.f32 %v4908_v62, %v4796_v46  ;;  %v8452_v14 = vld [vmem:[#allocation55_spill] sm:$0xff] }
 0x2e6   :  { %v4910_v55 = vpop.f32.mrf.mxu1  ;;  %v8034_v19 = vpop.f32.mrf.mxu0  ;;  %v4697_v62 = vadd.f32 %v8452_v14, %v4584_v44  ;;  %v4808_v47 = vadd.f32 %v8453_v18, %v4695_v33 }
 0x2e7   :  { %8439 = vst [vmem:[#allocation23_spill] sm:$0xff] %v8034_v19  ;;  %5426 = vst [vmem:[#allocation7 + $0x188] sm:$0xff] %v4909_v3  ;;  %v4911_v40 = vadd.f32 %v4910_v55, %v4798_v8  ;;  %v8455_v8 = vld [vmem:[#allocation56_spill] sm:$0xff] }
 0x2e8   :  { %v4912_v52 = vpop.f32.mrf.mxu1  ;;  %v8040_v15 = vpop.f32.mrf.mxu0  ;;  %v4810_v13 = vadd.f32 %v8455_v8, %v4697_v62 }
 0x2e9   :  { %8443 = vst [vmem:[#allocation37_spill] sm:$0xff] %v8040_v15  ;;  %5429 = vst [vmem:[#allocation7 + $0x1a0] sm:$0xff] %v4911_v40  ;;  %v4913_v24 = vadd.f32 %v4912_v52, %v4800_v12 }
 0x2ea   :  { %v4916_v36 = vpop.f32.mrf.mxu1  ;;  %v8046_v59 = vpop.f32.mrf.mxu0 }
 0x2eb   :  { %8447 = vst [vmem:[#allocation26_spill] sm:$0xff] %v8046_v59  ;;  %5430 = vst [vmem:[#allocation7 + $0x1a8] sm:$0xff] %v4913_v24  ;;  %v4917_v20 = vadd.f32 %v4916_v36, %v4804_v58 }
 0x2ec   :  { %v4918_v46 = vpop.f32.mrf.mxu1  ;;  %v8052_v23 = vpop.f32.mrf.mxu0 }
 0x2ed   :  { %8451 = vst [vmem:[#allocation31_spill] sm:$0xff] %v8052_v23  ;;  %5433 = vst [vmem:[#allocation7 + $0x1c0] sm:$0xff] %v4917_v20  ;;  %v4919_v6 = vadd.f32 %v4918_v46, %v4806_v60 }
 0x2ee   :  { %v4920_v2 = vpop.f32.mrf.mxu1  ;;  %v8056_v1 = vpop.f32.mrf.mxu0 }
 0x2ef   :  { %8454 = vst [vmem:[#allocation27_spill] sm:$0xff] %v8056_v1  ;;  %5434 = vst [vmem:[#allocation7 + $0x1c8] sm:$0xff] %v4919_v6  ;;  %v4921_v3 = vadd.f32 %v4920_v2, %v4808_v47 }
 0x2f0   :  { %v4922_v55 = vpop.f32.mrf.mxu1  ;;  %v8059_v43 = vpop.f32.mrf.mxu0 }
 0x2f1   :  { %8456 = vst [vmem:[#allocation32_spill] sm:$0xff] %v8059_v43  ;;  %5437 = vst [vmem:[#allocation7 + $0x1e0] sm:$0xff] %v4921_v3  ;;  %v4923_v45 = vadd.f32 %v4922_v55, %v4810_v13 }
 0x2f2   :  { %v5072_v56 = vpop.f32.mrf.mxu1 }
 0x2f3   :  { %5438 = vst [vmem:[#allocation7 + $0x1e8] sm:$0xff] %v4923_v45  ;;  %v5185_v30 = vpop.f32.mrf.mxu0 }
 0x2f4   :  { %v5074_v54 = vpop.f32.mrf.mxu1 }
 0x2f5   :  { %v5187_v40 = vpop.f32.mrf.mxu0 }
 0x2f6   :  { %v5076_v12 = vpop.f32.mrf.mxu1 }
 0x2f7   :  { %v5189_v27 = vpop.f32.mrf.mxu0 }
 0x2f8   :  { %v5078_v52 = vpop.f32.mrf.mxu1 }
 0x2f9   :  { %v8065_v17 = vpop.f32.mrf.mxu0 }
 0x2fa   :  { %v5082_v10 = vpop.f32.mrf.mxu1 }
 0x2fb   :  { %v8071_v36 = vpop.f32.mrf.mxu0 }
 0x2fc   :  { %v8061_v50 = vpop.f32.mrf.mxu1 }
 0x2fd   :  { %v8077_v25 = vpop.f32.mrf.mxu0 }
 0x2fe   :  { %v8063_v34 = vpop.f32.mrf.mxu1 }
 0x2ff   :  { %v8083_v60 = vpop.f32.mrf.mxu0 }
 0x300   :  { %v8067_v58 = vpop.f32.mrf.mxu1 }
 0x301   :  { %v8089_v14 = vpop.f32.mrf.mxu0 }
 0x302   :  { %v8069_v24 = vpop.f32.mrf.mxu1 }
 0x303   :  { %v8095_v47 = vpop.f32.mrf.mxu0 }
 0x304   :  { %v8073_v49 = vpop.f32.mrf.mxu1 }
 0x305   :  { %v8101_v8 = vpop.f32.mrf.mxu0 }
 0x306   :  { %v8075_v44 = vpop.f32.mrf.mxu1 }
 0x307   :  { %v8107_v55 = vpop.f32.mrf.mxu0 }
 0x308   :  { %v8079_v33 = vpop.f32.mrf.mxu1 }
 0x309   :  { %v8113_v1 = vpop.f32.mrf.mxu0 }
 0x30a   :  { %v8081_v4 = vpop.f32.mrf.mxu1 }
 0x30b   :  { %v8119_v15 = vpop.f32.mrf.mxu0 }
 0x30c   :  { %v8085_v20 = vpop.f32.mrf.mxu1 }
 0x30d   :  { %v8125_v35 = vpop.f32.mrf.mxu0 }
 0x30e   :  { %v8087_v46 = vpop.f32.mrf.mxu1 }
 0x310   :  { %v8091_v62 = vpop.f32.mrf.mxu1 }
 0x312   :  { %v8093_v18 = vpop.f32.mrf.mxu1 }
 0x314   :  { %v8097_v6 = vpop.f32.mrf.mxu1 }
 0x315   :  { %8457 = vst [vmem:[#allocation28_spill] sm:$0xff] %v8097_v6 }
 0x316   :  { %v8099_v2 = vpop.f32.mrf.mxu1 }
 0x317   :  { %8458 = vst [vmem:[#allocation33_spill] sm:$0xff] %v8099_v2 }
 0x318   :  { %v8103_v13 = vpop.f32.mrf.mxu1 }
 0x319   :  { %8459 = vst [vmem:[#allocation40_spill] sm:$0xff] %v8103_v13  ;;  %v8141_v13 = vpop.f32.mrf.mxu0 }
 0x31a   :  { %v8105_v3 = vpop.f32.mrf.mxu1 }
 0x31b   :  { %8460 = vst [vmem:[#allocation29_spill] sm:$0xff] %v8105_v3  ;;  %v8469_v3 = vld [vmem:[#allocation47_spill] sm:$0xff] }
 0x31c   :  { %v8109_v45 = vpop.f32.mrf.mxu1 }
 0x31d   :  { %8461 = vst [vmem:[#allocation34_spill] sm:$0xff] %v8109_v45  ;;  %v8130_v45 = vrot.slane %v8469_v3, %v8468_v31 }
 0x31e   :  { %v8111_v43 = vpop.f32.mrf.mxu1 }
 0x31f   :  { %8462 = vst [vmem:[#allocation41_spill] sm:$0xff] %v8111_v43 }
 0x320   :  { %v8115_v23 = vpop.f32.mrf.mxu1 }
 0x321   :  { %8463 = vst [vmem:[#allocation30_spill] sm:$0xff] %v8115_v23  ;;  %v8137_v23 = vrot.slane %v8469_v3, %v8471_v21  ;;  %v4964_v21 = vadd.f32 %v7890_v63, %v8130_v45 }
 0x322   :  { %v8117_v59 = vpop.f32.mrf.mxu1 }
 0x323   :  { %8464 = vst [vmem:[#allocation35_spill] sm:$0xff] %v8117_v59  ;;  %v4962_v31 = vadd.f32 %v7884_v32, %v8137_v23  ;;  %v5077_v6 = vadd.f32 %v5076_v12, %v4964_v21  ;;  %v4970_v32 = vadd.f32 %v7902_v61, %v8130_v45  ;;  %v4972_v63 = vadd.f32 %v7908_v51, %v8137_v23 }
 0x324   :  { %v8121_v19 = vpop.f32.mrf.mxu1  ;;  %v4974_v12 = vadd.f32 %v7914_v0, %v8130_v45  ;;  %v4976_v51 = vadd.f32 %v7920_v42, %v8137_v23  ;;  %v4980_v0 = vadd.f32 %v7926_v28, %v8130_v45  ;;  %v4982_v42 = vadd.f32 %v7932_v5, %v8137_v23 }
 0x325   :  { %8465 = vst [vmem:[#allocation43_spill] sm:$0xff] %v8121_v19  ;;  %v5075_v26 = vadd.f32 %v5074_v54, %v4962_v31  ;;  %v5190_v54 = vadd.f32 %v5189_v27, %v5077_v6  ;;  %v5083_v31 = vadd.f32 %v5082_v10, %v4970_v32  ;;  %v5085_v61 = vadd.f32 %v8061_v50, %v4972_v63 }
 0x326   :  { %v8123_v38 = vpop.f32.mrf.mxu1  ;;  %v5089_v50 = vadd.f32 %v8067_v58, %v4976_v51  ;;  %v4984_v28 = vadd.f32 %v7938_v39, %v8130_v45  ;;  %v4986_v5 = vadd.f32 %v7944_v29, %v8137_v23  ;;  %v4990_v39 = vadd.f32 %v7950_v53, %v8130_v45 }
 0x327   :  { %8466 = vst [vmem:[#allocation15_spill] sm:$0xff] %v8123_v38  ;;  %v8473_v38 = vld [vmem:[#allocation57_spill] sm:$0xff]  ;;  %v5198_v27 = vadd.f32 %v8077_v25, %v5085_v61  ;;  %v5095_v25 = vadd.f32 %v8073_v49, %v4982_v42  ;;  %v4992_v29 = vadd.f32 %v7956_v57, %v8137_v23  ;;  %v4994_v53 = vadd.f32 %v7962_v22, %v8130_v45 }
 0x328   :  { %v8132_v43 = vpop.f32.mrf.mxu1  ;;  %v4960_v19 = vadd.f32 %v8473_v38, %v8130_v45  ;;  %v5202_v58 = vadd.f32 %v8089_v14, %v5089_v50  ;;  %v5099_v14 = vadd.f32 %v8079_v33, %v4986_v5  ;;  %v4996_v57 = vadd.f32 %v7968_v7, %v8137_v23  ;;  %v8484_v5 = vld [vmem:[#allocation40_spill] sm:$0xff] }
 0x329   :  { %8470 = vst [vmem:[#allocation38_spill] sm:$0xff] %v8132_v43  ;;  %v8151_v43 = vpop.f32.mrf.mxu0  ;;  %v5208_v49 = vadd.f32 %v8101_v8, %v5095_v25  ;;  %v5105_v8 = vadd.f32 %v8085_v20, %v4992_v29  ;;  %v5000_v22 = vadd.f32 %v7974_v9, %v8130_v45  ;;  %v5002_v7 = vadd.f32 %v7980_v37, %v8137_v23  ;;  %v8478_v9 = vld [vmem:[#allocation21_spill] sm:$0xff]  ;;  %v8481_v37 = vld [vmem:[#allocation12_spill] sm:$0xff]  ;;  %v8483_v25 = vld [vmem:[#allocation22_spill] sm:$0xff] }
 0x32a   :  { %v8139_v59 = vpop.f32.mrf.mxu1  ;;  %v5073_v2 = vadd.f32 %v5072_v56, %v4960_v19  ;;  %8476 = vst [vmem:[#allocation46_spill] sm:$0xff] %v8151_v43  ;;  %v5188_v19 = vadd.f32 %v5187_v40, %v5075_v26  ;;  %v5196_v40 = vadd.f32 %v8071_v36, %v5083_v31  ;;  %v5093_v36 = vadd.f32 %v8069_v24, %v4980_v0 }
 0x32b   :  { %8472 = vst [vmem:[#allocation44_spill] sm:$0xff] %v8139_v59  ;;  %v4966_v59 = vadd.f32 %v7896_v16, %v8137_v23  ;;  %v5212_v33 = vadd.f32 %v8113_v1, %v5099_v14  ;;  %v5218_v1 = vadd.f32 %v8125_v35, %v5105_v8  ;;  %v5109_v20 = vadd.f32 %v8091_v62, %v4996_v57  ;;  %v8480_v62 = vld [vmem:[#allocation28_spill] sm:$0xff] }
 0x32c   :  { %v8145_v48 = vpop.f32.mrf.mxu1  ;;  %v5186_v38 = vadd.f32 %v5185_v30, %v5073_v2  ;;  %v5206_v24 = vadd.f32 %v8095_v47, %v5093_v36  ;;  %v5103_v47 = vadd.f32 %v8081_v4, %v4990_v39  ;;  %v5004_v50 = vadd.f32 %v8478_v9, %v8130_v45  ;;  %v8489_v8 = vld [vmem:[#allocation20_spill] sm:$0xff] }
 0x32d   :  { %8474 = vst [vmem:[#allocation16_spill] sm:$0xff] %v8145_v48  ;;  %v8159_v48 = vpop.f32.mrf.mxu0  ;;  %v5079_v56 = vadd.f32 %v5078_v52, %v4966_v59  ;;  %v5006_v36 = vadd.f32 %v8481_v37, %v8137_v23  ;;  %v8497_v37 = vld [vmem:[#allocation37_spill] sm:$0xff] }
 0x32e   :  { %v8149_v41 = vpop.f32.mrf.mxu1  ;;  %v5216_v4 = vadd.f32 %v8119_v15, %v5103_v47 }
 0x32f   :  { %8475 = vst [vmem:[#allocation39_spill] sm:$0xff] %v8149_v41  ;;  %v8165_v16 = vpop.f32.mrf.mxu0  ;;  %v5192_v2 = vadd.f32 %v8065_v17, %v5079_v56 }
 0x330   :  { %v8155_v3 = vpop.f32.mrf.mxu1 }
 0x331   :  { %8477 = vst [vmem:[#allocation17_spill] sm:$0xff] %v8155_v3  ;;  %v8175_v52 = vpop.f32.mrf.mxu0  ;;  %v8479_v35 = vld [vmem:[#allocation46_spill] sm:$0xff] }
 0x333   :  { %v5298_v11 = vpop.f32.mrf.mxu1  ;;  %v8185_v26 = vpop.f32.mrf.mxu0 }
 0x334   :  { %v5299_v41 = vadd.f32 %v5298_v11, %v5186_v38 }
 0x335   :  { %v5300_v43 = vpop.f32.mrf.mxu1  ;;  %v8195_v56 = vpop.f32.mrf.mxu0 }
 0x336   :  { %5379 = vst [vmem:[#allocation7 + $0x10] sm:$0xff] %v5299_v41  ;;  %v5301_v3 = vadd.f32 %v5300_v43, %v5188_v19  ;;  %v5087_v41 = vadd.f32 %v8063_v34, %v4974_v12 }
 0x337   :  { %v5302_v30 = vpop.f32.mrf.mxu1  ;;  %v8205_v12 = vpop.f32.mrf.mxu0 }
 0x338   :  { %5380 = vst [vmem:[#allocation7 + $0x18] sm:$0xff] %v5301_v3  ;;  %v5303_v11 = vadd.f32 %v5302_v30, %v5190_v54  ;;  %v5200_v34 = vadd.f32 %v8083_v60, %v5087_v41  ;;  %v5097_v60 = vadd.f32 %v8075_v44, %v4984_v28 }
 0x339   :  { %v5304_v59 = vpop.f32.mrf.mxu1  ;;  %v5239_v51 = vpop.f32.mrf.mxu0 }
 0x33a   :  { %5383 = vst [vmem:[#allocation7 + $0x30] sm:$0xff] %v5303_v11  ;;  %v5305_v43 = vadd.f32 %v5304_v59, %v5192_v2  ;;  %v5210_v44 = vadd.f32 %v8107_v55, %v5097_v60  ;;  %v5107_v55 = vadd.f32 %v8087_v46, %v4994_v53  ;;  %v5113_v46 = vadd.f32 %v8093_v18, %v5000_v22  ;;  %v8482_v18 = vld [vmem:[#allocation33_spill] sm:$0xff] }
 0x33b   :  { %v5308_v10 = vpop.f32.mrf.mxu1  ;;  %v5241_v0 = vpop.f32.mrf.mxu0 }
 0x33c   :  { %5384 = vst [vmem:[#allocation7 + $0x38] sm:$0xff] %v5305_v43  ;;  %v5309_v17 = vadd.f32 %v5308_v10, %v5196_v40  ;;  %v5220_v15 = vadd.f32 %v8141_v13, %v5107_v55  ;;  %v5226_v13 = vadd.f32 %v8159_v48, %v5113_v46  ;;  %v8494_v46 = vld [vmem:[#allocation35_spill] sm:$0xff] }
 0x33d   :  { %v5310_v6 = vpop.f32.mrf.mxu1  ;;  %v5245_v28 = vpop.f32.mrf.mxu0 }
 0x33e   :  { %5387 = vst [vmem:[#allocation7 + $0x50] sm:$0xff] %v5309_v17  ;;  %v5311_v21 = vadd.f32 %v5310_v6, %v5198_v27  ;;  %v5222_v17 = vadd.f32 %v8479_v35, %v5109_v20  ;;  %v5115_v6 = vadd.f32 %v8480_v62, %v5002_v7  ;;  %v8493_v7 = vld [vmem:[#allocation25_spill] sm:$0xff]  ;;  %v8495_v35 = vld [vmem:[#allocation23_spill] sm:$0xff] }
 0x33f   :  { %v5312_v3 = vpop.f32.mrf.mxu1 }
 0x340   :  { %5388 = vst [vmem:[#allocation7 + $0x58] sm:$0xff] %v5311_v21  ;;  %v5313_v38 = vadd.f32 %v5312_v3, %v5200_v34  ;;  %v5117_v21 = vadd.f32 %v8482_v18, %v5004_v50 }
 0x341   :  { %v5314_v32 = vpop.f32.mrf.mxu1 }
 0x342   :  { %5391 = vst [vmem:[#allocation7 + $0x70] sm:$0xff] %v5313_v38  ;;  %v5315_v19 = vadd.f32 %v5314_v32, %v5202_v58  ;;  %v5010_v38 = vadd.f32 %v8483_v25, %v8130_v45  ;;  %v5228_v32 = vadd.f32 %v8165_v16, %v5115_v6  ;;  %v5230_v48 = vadd.f32 %v8175_v52, %v5117_v21  ;;  %v8499_v25 = vld [vmem:[#allocation26_spill] sm:$0xff] }
 0x343   :  { %v5318_v63 = vpop.f32.mrf.mxu1 }
 0x344   :  { %5392 = vst [vmem:[#allocation7 + $0x78] sm:$0xff] %v5315_v19  ;;  %v5319_v54 = vadd.f32 %v5318_v63, %v5206_v24  ;;  %v5119_v24 = vadd.f32 %v8484_v5, %v5006_v36  ;;  %v8485_v63 = vld [vmem:[#allocation18_spill] sm:$0xff]  ;;  %v5026_v36 = vadd.f32 %v8497_v37, %v8137_v23 }
 0x345   :  { %v5320_v31 = vpop.f32.mrf.mxu1  ;;  %v5012_v39 = vadd.f32 %v8485_v63, %v8137_v23 }
 0x346   :  { %5395 = vst [vmem:[#allocation7 + $0x90] sm:$0xff] %v5319_v54  ;;  %v5321_v30 = vadd.f32 %v5320_v31, %v5208_v49  ;;  %v8486_v49 = vld [vmem:[#allocation29_spill] sm:$0xff]  ;;  %v5247_v31 = vpop.f32.mrf.mxu0  ;;  %v5232_v16 = vadd.f32 %v8185_v26, %v5119_v24 }
 0x347   :  { %v5322_v2 = vpop.f32.mrf.mxu1  ;;  %v5123_v14 = vadd.f32 %v8486_v49, %v5010_v38  ;;  %v5030_v38 = vadd.f32 %v8499_v25, %v8130_v45 }
 0x348   :  { %5396 = vst [vmem:[#allocation7 + $0x98] sm:$0xff] %v5321_v30  ;;  %v5323_v61 = vadd.f32 %v5322_v2, %v5210_v44  ;;  %v8487_v44 = vld [vmem:[#allocation24_spill] sm:$0xff]  ;;  %v8488_v30 = vld [vmem:[#allocation34_spill] sm:$0xff]  ;;  %v5249_v55 = vpop.f32.mrf.mxu0 }
 0x349   :  { %v5324_v11 = vpop.f32.mrf.mxu1  ;;  %v5014_v47 = vadd.f32 %v8487_v44, %v8130_v45  ;;  %v5125_v2 = vadd.f32 %v8488_v30, %v5012_v39  ;;  %v5236_v52 = vadd.f32 %v8195_v56, %v5123_v14 }
 0x34a   :  { %5399 = vst [vmem:[#allocation7 + $0xb0] sm:$0xff] %v5323_v61  ;;  %v5325_v59 = vadd.f32 %v5324_v11, %v5212_v33  ;;  %v5016_v61 = vadd.f32 %v8489_v8, %v8137_v23  ;;  %v8490_v11 = vld [vmem:[#allocation41_spill] sm:$0xff]  ;;  %v5251_v9 = vpop.f32.mrf.mxu0 }
 0x34b   :  { %v5328_v40 = vpop.f32.mrf.mxu1  ;;  %v5127_v57 = vadd.f32 %v8490_v11, %v5014_v47  ;;  %v5238_v26 = vadd.f32 %v8205_v12, %v5125_v2  ;;  %v8496_v12 = vld [vmem:[#allocation43_spill] sm:$0xff] }
 0x34c   :  { %5400 = vst [vmem:[#allocation7 + $0xb8] sm:$0xff] %v5325_v59  ;;  %v5329_v41 = vadd.f32 %v5328_v40, %v5216_v4  ;;  %v8491_v40 = vld [vmem:[#allocation36_spill] sm:$0xff] }
 0x34d   :  { %v5330_v43 = vpop.f32.mrf.mxu1  ;;  %v5020_v22 = vadd.f32 %v8491_v40, %v8130_v45  ;;  %v5240_v56 = vadd.f32 %v5239_v51, %v5127_v57  ;;  %v8498_v51 = vld [vmem:[#allocation15_spill] sm:$0xff] }
 0x34e   :  { %5403 = vst [vmem:[#allocation7 + $0xd0] sm:$0xff] %v5329_v41  ;;  %v5331_v10 = vadd.f32 %v5330_v43, %v5218_v1  ;;  %v8492_v1 = vld [vmem:[#allocation30_spill] sm:$0xff] }
 0x34f   :  { %v5332_v27 = vpop.f32.mrf.mxu1  ;;  %v5129_v20 = vadd.f32 %v8492_v1, %v5016_v61  ;;  %v8506_v61 = vld [vmem:[#allocation39_spill] sm:$0xff] }
 0x350   :  { %5404 = vst [vmem:[#allocation7 + $0xd8] sm:$0xff] %v5331_v10  ;;  %v5333_v42 = vadd.f32 %v5332_v27, %v5220_v15  ;;  %v5022_v15 = vadd.f32 %v8493_v7, %v8137_v23  ;;  %v5133_v10 = vadd.f32 %v8494_v46, %v5020_v22 }
 0x351   :  { %v5334_v34 = vpop.f32.mrf.mxu1  ;;  %v5242_v62 = vadd.f32 %v5241_v0, %v5129_v20  ;;  %v8500_v0 = vld [vmem:[#allocation38_spill] sm:$0xff] }
 0x352   :  { %5407 = vst [vmem:[#allocation7 + $0xf0] sm:$0xff] %v5333_v42  ;;  %v5335_v3 = vadd.f32 %v5334_v34, %v5222_v17  ;;  %v5024_v17 = vadd.f32 %v8495_v35, %v8130_v45  ;;  %v5135_v6 = vadd.f32 %v8496_v12, %v5022_v15  ;;  %v5139_v5 = vadd.f32 %v8500_v0, %v5026_v36 }
 0x353   :  { %v5338_v58 = vpop.f32.mrf.mxu1 }
 0x354   :  { %5408 = vst [vmem:[#allocation7 + $0xf8] sm:$0xff] %v5335_v3  ;;  %v5339_v60 = vadd.f32 %v5338_v58, %v5226_v13  ;;  %v5246_v13 = vadd.f32 %v5245_v28, %v5133_v10  ;;  %v5137_v18 = vadd.f32 %v8498_v51, %v5024_v17  ;;  %v5255_v3 = vpop.f32.mrf.mxu0  ;;  %v8502_v28 = vld [vmem:[#allocation44_spill] sm:$0xff]  ;;  %v5252_v47 = vadd.f32 %v5251_v9, %v5139_v5 }
 0x355   :  { %v5340_v19 = vpop.f32.mrf.mxu1 }
 0x356   :  { %5411 = vst [vmem:[#allocation7 + $0x110] sm:$0xff] %v5339_v60  ;;  %v5341_v54 = vadd.f32 %v5340_v19, %v5228_v32  ;;  %v5248_v32 = vadd.f32 %v5247_v31, %v5135_v6  ;;  %v8501_v19 = vld [vmem:[#allocation31_spill] sm:$0xff]  ;;  %v5250_v39 = vadd.f32 %v5249_v55, %v5137_v18  ;;  %v5257_v14 = vpop.f32.mrf.mxu0  ;;  %v8504_v31 = vld [vmem:[#allocation16_spill] sm:$0xff] }
 0x357   :  { %v5342_v29 = vpop.f32.mrf.mxu1  ;;  %v5032_v63 = vadd.f32 %v8501_v19, %v8137_v23 }
 0x358   :  { %5412 = vst [vmem:[#allocation7 + $0x118] sm:$0xff] %v5341_v54  ;;  %v5343_v53 = vadd.f32 %v5342_v29, %v5230_v48  ;;  %v5143_v48 = vadd.f32 %v8502_v28, %v5030_v38  ;;  %v8503_v29 = vld [vmem:[#allocation27_spill] sm:$0xff]  ;;  %v5259_v57 = vpop.f32.mrf.mxu0 }
 0x359   :  { %v5344_v33 = vpop.f32.mrf.mxu1  ;;  %v5034_v44 = vadd.f32 %v8503_v29, %v8130_v45 }
 0x35a   :  { %5415 = vst [vmem:[#allocation7 + $0x130] sm:$0xff] %v5343_v53  ;;  %v5345_v4 = vadd.f32 %v5344_v33, %v5232_v16  ;;  %v5145_v16 = vadd.f32 %v8504_v31, %v5032_v63  ;;  %v8505_v53 = vld [vmem:[#allocation32_spill] sm:$0xff]  ;;  %v5256_v8 = vadd.f32 %v5255_v3, %v5143_v48  ;;  %v5261_v20 = vpop.f32.mrf.mxu0 }
 0x35b   :  { %v5348_v59 = vpop.f32.mrf.mxu1  ;;  %v5036_v33 = vadd.f32 %v8505_v53, %v8137_v23 }
 0x35c   :  { %5416 = vst [vmem:[#allocation7 + $0x138] sm:$0xff] %v5345_v4  ;;  %v5349_v41 = vadd.f32 %v5348_v59, %v5236_v52  ;;  %v5147_v52 = vadd.f32 %v8506_v61, %v5034_v44  ;;  %v5258_v55 = vadd.f32 %v5257_v14, %v5145_v16  ;;  %v8507_v59 = vld [vmem:[#allocation17_spill] sm:$0xff] }
 0x35d   :  { %v5350_v43 = vpop.f32.mrf.mxu1  ;;  %v5149_v40 = vadd.f32 %v8507_v59, %v5036_v33 }
 0x35e   :  { %5419 = vst [vmem:[#allocation7 + $0x150] sm:$0xff] %v5349_v41  ;;  %v5351_v27 = vadd.f32 %v5350_v43, %v5238_v26  ;;  %v5260_v26 = vadd.f32 %v5259_v57, %v5147_v52 }
 0x35f   :  { %v5352_v50 = vpop.f32.mrf.mxu1  ;;  %v5262_v23 = vadd.f32 %v5261_v20, %v5149_v40 }
 0x360   :  { %5420 = vst [vmem:[#allocation7 + $0x158] sm:$0xff] %v5351_v27  ;;  %v5353_v42 = vadd.f32 %v5352_v50, %v5240_v56 }
 0x361   :  { %v5354_v34 = vpop.f32.mrf.mxu1 }
 0x362   :  { %5423 = vst [vmem:[#allocation7 + $0x170] sm:$0xff] %v5353_v42  ;;  %v5355_v21 = vadd.f32 %v5354_v34, %v5242_v62 }
 0x363   :  { %v5358_v58 = vpop.f32.mrf.mxu1 }
 0x364   :  { %5424 = vst [vmem:[#allocation7 + $0x178] sm:$0xff] %v5355_v21  ;;  %v5359_v24 = vadd.f32 %v5358_v58, %v5246_v13 }
 0x365   :  { %v5360_v60 = vpop.f32.mrf.mxu1 }
 0x366   :  { %5427 = vst [vmem:[#allocation7 + $0x190] sm:$0xff] %v5359_v24  ;;  %v5361_v49 = vadd.f32 %v5360_v60, %v5248_v32 }
 0x367   :  { %v5362_v54 = vpop.f32.mrf.mxu1 }
 0x368   :  { %5428 = vst [vmem:[#allocation7 + $0x198] sm:$0xff] %v5361_v49  ;;  %v5363_v30 = vadd.f32 %v5362_v54, %v5250_v39 }
 0x369   :  { %v5364_v2 = vpop.f32.mrf.mxu1 }
 0x36a   :  { %5431 = vst [vmem:[#allocation7 + $0x1b0] sm:$0xff] %v5363_v30  ;;  %v5365_v11 = vadd.f32 %v5364_v2, %v5252_v47 }
 0x36b   :  { %v5368_v4 = vpop.f32.mrf.mxu1 }
 0x36c   :  { %5432 = vst [vmem:[#allocation7 + $0x1b8] sm:$0xff] %v5365_v11  ;;  %v5369_v45 = vadd.f32 %v5368_v4, %v5256_v8 }
 0x36d   :  { %v5370_v22 = vpop.f32.mrf.mxu1 }
 0x36e   :  { %5435 = vst [vmem:[#allocation7 + $0x1d0] sm:$0xff] %v5369_v45  ;;  %v5371_v1 = vadd.f32 %v5370_v22, %v5258_v55 }
 0x36f   :  { %v5372_v41 = vpop.f32.mrf.mxu1 }
 0x370   :  { %5436 = vst [vmem:[#allocation7 + $0x1d8] sm:$0xff] %v5371_v1  ;;  %v5373_v43 = vadd.f32 %v5372_v41, %v5260_v26 }
 0x371   :  { %v5374_v7 = vpop.f32.mrf.mxu1 }
 0x372   :  { %5439 = vst [vmem:[#allocation7 + $0x1f0] sm:$0xff] %v5373_v43  ;;  %v5375_v15 = vadd.f32 %v5374_v7, %v5262_v23 }
 0x374   :  { %5440 = vst [vmem:[#allocation7 + $0x1f8] sm:$0xff] %v5375_v15 }
 0x375   :  { %6526 = shalt.err (!%p6523_p0)
}
 0x376   :  { %5452 = dma.vmem_to_hbm [thread:$0]  %s5447_s12, 8192, %s8284_s5, [#allocation4], %s6542_s21, %s6542_s21, %s6543_s22  }
 0x377   :  { %6539 = dma.done.wait [#allocation4], 8192  }
 0x378   :  { %6540 = vsyncadd [#allocation4], 4294959104 }
 0x379   :  { %5456 = vsyncpa [#allocation3], 1 }
 0x37a   :  { %5457 = vsyncpa [#allocation6], 1 }
 0x37b   :  { %5458 = vsyncpa [#allocation4], 1 }

</bundles_post_ra>
